<compile_context>
chip_gen: v7x
topology: tpu7x:2x2x1
jax: 0.10.0
libtpu: 0.0.40
codegen_flags: <defaults>
</compile_context>

<pallas_src>
import numpy as np
import jax
import jax.numpy as jnp
from jax import lax
from jax.experimental import pallas as pl
from jax.experimental.pallas import tpu as pltpu

# ---- small, module-consistent config ----------------------------------------
B = 2             # batch
T = 64            # number of points per cloud (fixed)
DIM = 3           # point dimension
H = 32            # hidden_dim
C = 32            # c_dim
RESO = 8          # plane_resolution
N_BLOCKS = 3      # n_blocks
PADDING = 0.1
PLANE_EPS = 1e-5

NPTS = B * T              # 128 points processed as one slab (no padding needed)
NCELL = B * RESO * RESO   # 128 batch-offset plane cells (block-diagonal by construction)
NEG = -1e30               # finite "-inf": must stay finite for the 0*NEG matmul gather
UNROLL = 8                # points per fori_loop step in the scatter-max
NACC = 4                  # independent accumulators (breaks the serial RMW chain)


def lpp_kernel(cidx_sm_ref,        # [NPTS]    int32 SMEM : batch-offset cell id per point
               cidx_v_ref,         # [NPTS,1]  int32 VMEM : same ids (vector copy)
               p_ref,              # [NPTS,3]  f32
               wpos_ref, bpos_ref,            # fc_pos
               w0_ref, b0_ref,                # blocks: fc_0
               wsc1_ref, b1_ref,              # blocks: [shortcut | fc_1] fused
               wc_ref, bc_ref,                # fc_c (+ ones column for counts)
               out_ref,            # [C, NCELL] f32
               net_sc,             # VMEM (NPTS, H)  : point rows for the scatter loop
               *acc_scs):          # NACC x VMEM (NCELL, H) : per-cell running maxes
    # one-hot cell membership, built once and reused by both poolings and the
    # final scatter_mean (each row has exactly one 1; columns are cells).
    cell_iota = lax.broadcasted_iota(jnp.int32, (NPTS, NCELL), 1)
    one_hot = (cell_iota == cidx_v_ref[...]).astype(jnp.float32)        # [NPTS, NCELL]

    def resblock(x, i):
        # ResnetBlockFC: shortcut(x) + fc_1(relu(fc_0(relu(x)))) with the
        # shortcut and fc_1 fused into one [3H, H] matmul.
        h = jnp.dot(jnp.maximum(x, 0.0), w0_ref[i],
                    preferred_element_type=jnp.float32) + b0_ref[i]     # [NPTS, H]
        xcat = jnp.concatenate([x, jnp.maximum(h, 0.0)], axis=1)        # [NPTS, 3H]
        return jnp.dot(xcat, wsc1_ref[i],
                       preferred_element_type=jnp.float32) + b1_ref[i]  # [NPTS, H]

    def pool_local(cur):
        # scatter-max into NACC disjoint [NCELL, H] cell accumulators (true
        # scatter, O(NPTS*H) work, no [T, T, H] masked intermediate); point t
        # updates accumulator t % NACC, so the 4 read-modify-write chains are
        # independent refs and can interleave instead of serialising.  The
        # per-point pooled feature is then gathered back with one MXU matmul.
        net_sc[...] = cur
        for a in range(NACC):
            acc_scs[a][...] = jnp.full((NCELL, H), NEG, jnp.float32)

        def body(i, carry):
            base = pl.multiple_of(i * UNROLL, UNROLL)
            for k in range(UNROLL):
                t = base + k
                a = k % NACC                       # static accumulator choice
                cell = cidx_sm_ref[t]
                acc_scs[a][pl.ds(cell, 1), :] = jnp.maximum(
                    acc_scs[a][pl.ds(cell, 1), :], net_sc[pl.ds(t, 1), :])
            return carry

        lax.fori_loop(0, NPTS // UNROLL, body, 0)

        # merge the independent chains (3 cheap vector maxes); empty cells keep
        # NEG but are multiplied by 0.0 in the gather -> harmless.
        acc = acc_scs[0][...]
        for a in range(1, NACC):
            acc = jnp.maximum(acc, acc_scs[a][...])
        return jnp.dot(one_hot, acc, preferred_element_type=jnp.float32)

    # fc_pos : [NPTS, 3] -> [NPTS, 2H]
    net = jnp.dot(p_ref[...], wpos_ref[...],
                  preferred_element_type=jnp.float32) + bpos_ref[...]
    net = resblock(net, 0)

    for i in range(1, N_BLOCKS):
        pooled = pool_local(net)                                        # [NPTS, H]
        net = resblock(jnp.concatenate([net, pooled], axis=1), i)

    # fc_c, augmented with a ones column so counts come out of the same matmul.
    c_aug = jnp.dot(net, wc_ref[...],
                    preferred_element_type=jnp.float32) + bc_ref[...]   # [NPTS, C+1]

    # generate_plane_features (scatter_mean): contract over the point axis
    # directly -> [C+1, NCELL]; row C holds the per-cell point count.
    sums = lax.dot_general(c_aug, one_hot, (((0,), (0,)), ((), ())),
                           preferred_element_type=jnp.float32)
    counts = sums[C:C + 1, :]                                           # [1, NCELL]
    out_ref[...] = sums[:C, :] / jnp.maximum(counts, 1.0)


def local_pool_pointnet(p, params):
    wpos, bpos, w0, b0, w1, b1, ws, wc, bc = params

    # normalize_coordinate(plane='xz', padding=0.1) + coordinate2index, with a
    # per-batch cell offset so the batch-folded kernel never mixes point clouds.
    # (index plumbing computed once here and passed scalar-prefetch-style.)
    inv = 1.0 / (1.0 + PADDING + PLANE_EPS)
    xy = p[:, :, jnp.array([0, 2])] * inv + 0.5
    xy = jnp.where(xy >= 1.0, 1.0 - PLANE_EPS, xy)
    xy = jnp.where(xy < 0.0, 0.0, xy)
    ixy = jnp.floor(xy * RESO).astype(jnp.int32)
    cell = ixy[:, :, 0] + RESO * ixy[:, :, 1]                                # [B, T]
    cidx = (cell + (jnp.arange(B, dtype=jnp.int32) * RESO * RESO)[:, None]
            ).reshape(NPTS)

    # host-side weight fusion
    wsc1 = jnp.concatenate([ws, w1], axis=1)                                 # [NB, 3H, H]
    wc_aug = jnp.concatenate([wc, jnp.zeros((H, 1), jnp.float32)], axis=1)   # [H, C+1]
    bc_aug = jnp.concatenate([bc, jnp.ones((1, 1), jnp.float32)], axis=1)    # [1, C+1]

    in_specs = ([pl.BlockSpec(memory_space=pltpu.MemorySpace.SMEM)]
                + [pl.BlockSpec(memory_space=pltpu.MemorySpace.VMEM)
                   for _ in range(10)])

    out = pl.pallas_call(
        lpp_kernel,
        out_shape=jax.ShapeDtypeStruct((C, NCELL), jnp.float32),
        in_specs=in_specs,
        out_specs=pl.BlockSpec(memory_space=pltpu.MemorySpace.VMEM),
        scratch_shapes=[pltpu.VMEM((NPTS, H), jnp.float32)]
                      + [pltpu.VMEM((NCELL, H), jnp.float32) for _ in range(NACC)],
    )(cidx, cidx.reshape(NPTS, 1), p.reshape(NPTS, DIM),
      wpos, bpos, w0, b0, wsc1, b1, wc_aug, bc_aug)

    # lane-dense [C, B*R^2] kernel output -> NCHW plane feature (wrapper plumbing)
    fea = out.reshape(C, B, RESO, RESO).transpose(1, 0, 2, 3)
    return {"xz": fea}


def ref_forward(p, params):
    """Pure-JAX reference of the same forward (for correctness check)."""
    wpos, bpos, w0, b0, w1, b1, ws, wc, bc = params
    inv = 1.0 / (1.0 + PADDING + PLANE_EPS)
    xy = p[:, :, jnp.array([0, 2])] * inv + 0.5
    xy = jnp.where(xy >= 1.0, 1.0 - PLANE_EPS, xy)
    xy = jnp.where(xy < 0.0, 0.0, xy)
    ixy = jnp.floor(xy * RESO).astype(jnp.int32)
    index = ixy[:, :, 0] + RESO * ixy[:, :, 1]                    # [B, T]

    def block(x, i):
        h = jnp.maximum(x, 0.0) @ w0[i] + b0[i]
        dx = jnp.maximum(h, 0.0) @ w1[i] + b1[i]
        return x @ ws[i] + dx

    net = p @ wpos + bpos[0]
    net = block(net, 0)
    same = index[:, :, None] == index[:, None, :]                 # [B, T, T]
    for i in range(1, N_BLOCKS):
        pooled = jnp.max(
            jnp.where(same[:, :, :, None], net[:, None, :, :], -jnp.inf), axis=2)
        net = jnp.concatenate([net, pooled], axis=-1)
        net = block(net, i)
    c = net @ wc + bc[0]                                          # [B, T, C]

    one_hot = (index[:, :, None] ==
               jnp.arange(RESO * RESO)[None, None, :]).astype(jnp.float32)  # [B,T,R2]
    counts = one_hot.sum(axis=1)                                  # [B, R2]
    sums = jnp.einsum('btr,btc->brc', one_hot, c)                 # [B, R2, C]
    fea = sums / jnp.maximum(counts, 1.0)[:, :, None]
    fea = jnp.transpose(fea, (0, 2, 1)).reshape(B, C, RESO, RESO)
    return {"xz": fea}


def make_params(key):
    ks = jax.random.split(key, 9)
    s = 0.1
    wpos = jax.random.normal(ks[0], (DIM, 2 * H), jnp.float32) * s
    bpos = jax.random.normal(ks[1], (1, 2 * H), jnp.float32) * s
    w0 = jax.random.normal(ks[2], (N_BLOCKS, 2 * H, H), jnp.float32) * s
    b0 = jax.random.normal(ks[3], (N_BLOCKS, 1, H), jnp.float32) * s
    w1 = jax.random.normal(ks[4], (N_BLOCKS, H, H), jnp.float32) * s
    b1 = jax.random.normal(ks[5], (N_BLOCKS, 1, H), jnp.float32) * s
    ws = jax.random.normal(ks[6], (N_BLOCKS, 2 * H, H), jnp.float32) * s
    wc = jax.random.normal(ks[7], (H, C), jnp.float32) * s
    bc = jax.random.normal(ks[8], (1, C), jnp.float32) * s
    return (wpos, bpos, w0, b0, w1, b1, ws, wc, bc)


if __name__ == "__main__":
    key = jax.random.PRNGKey(0)
    kp, kw = jax.random.split(key)
    # points in the canonical [-0.5, 0.5] unit cube
    p = jax.random.uniform(kp, (B, T, DIM), jnp.float32, minval=-0.5, maxval=0.5)
    params = make_params(kw)

    fea = local_pool_pointnet(p, params)
    out = jax.block_until_ready(fea["xz"])

    ref = jax.block_until_ready(ref_forward(p, params)["xz"])
    np.testing.assert_allclose(np.asarray(out), np.asarray(ref), rtol=1e-4, atol=1e-4)

    assert out.shape == (B, C, RESO, RESO)
    print("KERNEL_OK")
</pallas_src>

<mosaic_0001>
module attributes {stable_mosaic.version = 11 : i64} {
  func.func @lpp_kernel(%arg0: memref<128xi32, #tpu.memory_space<smem>>, %arg1: memref<128x1xi32, #tpu.memory_space<vmem>>, %arg2: memref<128x3xf32, #tpu.memory_space<vmem>>, %arg3: memref<3x64xf32, #tpu.memory_space<vmem>>, %arg4: memref<1x64xf32, #tpu.memory_space<vmem>>, %arg5: memref<3x64x32xf32, #tpu.memory_space<vmem>>, %arg6: memref<3x1x32xf32, #tpu.memory_space<vmem>>, %arg7: memref<3x96x32xf32, #tpu.memory_space<vmem>>, %arg8: memref<3x1x32xf32, #tpu.memory_space<vmem>>, %arg9: memref<32x33xf32, #tpu.memory_space<vmem>>, %arg10: memref<1x33xf32, #tpu.memory_space<vmem>>, %arg11: memref<32x128xf32, #tpu.memory_space<vmem>>, %arg12: memref<128x32xf32, #tpu.memory_space<vmem>>, %arg13: memref<128x32xf32, #tpu.memory_space<vmem>>, %arg14: memref<128x32xf32, #tpu.memory_space<vmem>>, %arg15: memref<128x32xf32, #tpu.memory_space<vmem>>, %arg16: memref<128x32xf32, #tpu.memory_space<vmem>>) attributes {dimension_semantics = [], scalar_prefetch = 0 : i64, scratch_operands = 5 : i64, tpu.core_type = #tpu.core_type<tc>} {
    %0 = tpu.iota {dimensions = array<i32: 1>} : vector<128x128xi32>
    %c0 = arith.constant 0 : index
    %c0_0 = arith.constant 0 : index
    %1 = vector.load %arg1[%c0, %c0_0] : memref<128x1xi32, #tpu.memory_space<vmem>>, vector<128x1xi32>
    %2 = vector.broadcast %1 : vector<128x1xi32> to vector<128x128xi32>
    %3 = arith.cmpi eq, %0, %2 : vector<128x128xi32>
    %4 = arith.extui %3 : vector<128x128xi1> to vector<128x128xi32>
    %5 = arith.sitofp %4 : vector<128x128xi32> to vector<128x128xf32>
    %c0_1 = arith.constant 0 : index
    %c0_2 = arith.constant 0 : index
    %6 = vector.load %arg2[%c0_1, %c0_2] : memref<128x3xf32, #tpu.memory_space<vmem>>, vector<128x3xf32>
    %c0_3 = arith.constant 0 : index
    %c0_4 = arith.constant 0 : index
    %7 = vector.load %arg3[%c0_3, %c0_4] : memref<3x64xf32, #tpu.memory_space<vmem>>, vector<3x64xf32>
    %cst = arith.constant dense<0.000000e+00> : vector<128x64xf32>
    %8 = tpu.matmul %6, %7, %cst {dimension_numbers = #tpu.dot_dimension_numbers<[1], [0], [0], [1], [0, 0, 1, 1], [], []>} : vector<128x3xf32>, vector<3x64xf32>, vector<128x64xf32> -> vector<128x64xf32>
    %c0_5 = arith.constant 0 : index
    %c0_6 = arith.constant 0 : index
    %9 = vector.load %arg4[%c0_5, %c0_6] : memref<1x64xf32, #tpu.memory_space<vmem>>, vector<1x64xf32>
    %10 = vector.broadcast %9 : vector<1x64xf32> to vector<128x64xf32>
    %11 = arith.addf %8, %10 : vector<128x64xf32>
    %cst_7 = arith.constant 0.000000e+00 : f32
    %12 = vector.broadcast %cst_7 : f32 to vector<128x64xf32>
    %13 = arith.maximumf %11, %12 : vector<128x64xf32>
    %c0_8 = arith.constant 0 : index
    %c0_9 = arith.constant 0 : index
    %c0_10 = arith.constant 0 : index
    %14 = vector.load %arg5[%c0_8, %c0_9, %c0_10] : memref<3x64x32xf32, #tpu.memory_space<vmem>>, vector<1x64x32xf32>
    %15 = vector.shape_cast %14 : vector<1x64x32xf32> to vector<64x32xf32>
    %cst_11 = arith.constant dense<0.000000e+00> : vector<128x32xf32>
    %16 = tpu.matmul %13, %15, %cst_11 {dimension_numbers = #tpu.dot_dimension_numbers<[1], [0], [0], [1], [0, 0, 1, 1], [], []>} : vector<128x64xf32>, vector<64x32xf32>, vector<128x32xf32> -> vector<128x32xf32>
    %c0_12 = arith.constant 0 : index
    %c0_13 = arith.constant 0 : index
    %c0_14 = arith.constant 0 : index
    %17 = vector.load %arg6[%c0_12, %c0_13, %c0_14] : memref<3x1x32xf32, #tpu.memory_space<vmem>>, vector<1x1x32xf32>
    %18 = vector.shape_cast %17 : vector<1x1x32xf32> to vector<1x32xf32>
    %19 = vector.broadcast %18 : vector<1x32xf32> to vector<128x32xf32>
    %20 = arith.addf %16, %19 : vector<128x32xf32>
    %cst_15 = arith.constant 0.000000e+00 : f32
    %21 = vector.broadcast %cst_15 : f32 to vector<128x32xf32>
    %22 = arith.maximumf %20, %21 : vector<128x32xf32>
    %23 = tpu.concatenate %11, %22 in 1 : vector<128x64xf32>, vector<128x32xf32> -> vector<128x96xf32>
    %c0_16 = arith.constant 0 : index
    %c0_17 = arith.constant 0 : index
    %c0_18 = arith.constant 0 : index
    %24 = vector.load %arg7[%c0_16, %c0_17, %c0_18] : memref<3x96x32xf32, #tpu.memory_space<vmem>>, vector<1x96x32xf32>
    %25 = vector.shape_cast %24 : vector<1x96x32xf32> to vector<96x32xf32>
    %cst_19 = arith.constant dense<0.000000e+00> : vector<128x32xf32>
    %26 = tpu.matmul %23, %25, %cst_19 {dimension_numbers = #tpu.dot_dimension_numbers<[1], [0], [0], [1], [0, 0, 1, 1], [], []>} : vector<128x96xf32>, vector<96x32xf32>, vector<128x32xf32> -> vector<128x32xf32>
    %c0_20 = arith.constant 0 : index
    %c0_21 = arith.constant 0 : index
    %c0_22 = arith.constant 0 : index
    %27 = vector.load %arg8[%c0_20, %c0_21, %c0_22] : memref<3x1x32xf32, #tpu.memory_space<vmem>>, vector<1x1x32xf32>
    %28 = vector.shape_cast %27 : vector<1x1x32xf32> to vector<1x32xf32>
    %29 = vector.broadcast %28 : vector<1x32xf32> to vector<128x32xf32>
    %30 = arith.addf %26, %29 : vector<128x32xf32>
    %c0_23 = arith.constant 0 : index
    %c0_24 = arith.constant 0 : index
    %31 = vector.load %arg12[%c0_23, %c0_24] : memref<128x32xf32, #tpu.memory_space<vmem>>, vector<128x32xf32>
    tpu.vector_store %arg12[%c0_23, %c0_24], %30 {strides = array<i32>} : memref<128x32xf32, #tpu.memory_space<vmem>>, vector<128x32xf32>,
    %cst_25 = arith.constant -1.000000e+30 : f32
    %32 = vector.broadcast %cst_25 : f32 to vector<128x32xf32>
    %c0_26 = arith.constant 0 : index
    %c0_27 = arith.constant 0 : index
    %33 = vector.load %arg13[%c0_26, %c0_27] : memref<128x32xf32, #tpu.memory_space<vmem>>, vector<128x32xf32>
    tpu.vector_store %arg13[%c0_26, %c0_27], %32 {strides = array<i32>} : memref<128x32xf32, #tpu.memory_space<vmem>>, vector<128x32xf32>,
    %cst_28 = arith.constant -1.000000e+30 : f32
    %34 = vector.broadcast %cst_28 : f32 to vector<128x32xf32>
    %c0_29 = arith.constant 0 : index
    %c0_30 = arith.constant 0 : index
    %35 = vector.load %arg14[%c0_29, %c0_30] : memref<128x32xf32, #tpu.memory_space<vmem>>, vector<128x32xf32>
    tpu.vector_store %arg14[%c0_29, %c0_30], %34 {strides = array<i32>} : memref<128x32xf32, #tpu.memory_space<vmem>>, vector<128x32xf32>,
    %cst_31 = arith.constant -1.000000e+30 : f32
    %36 = vector.broadcast %cst_31 : f32 to vector<128x32xf32>
    %c0_32 = arith.constant 0 : index
    %c0_33 = arith.constant 0 : index
    %37 = vector.load %arg15[%c0_32, %c0_33] : memref<128x32xf32, #tpu.memory_space<vmem>>, vector<128x32xf32>
    tpu.vector_store %arg15[%c0_32, %c0_33], %36 {strides = array<i32>} : memref<128x32xf32, #tpu.memory_space<vmem>>, vector<128x32xf32>,
    %cst_34 = arith.constant -1.000000e+30 : f32
    %38 = vector.broadcast %cst_34 : f32 to vector<128x32xf32>
    %c0_35 = arith.constant 0 : index
    %c0_36 = arith.constant 0 : index
    %39 = vector.load %arg16[%c0_35, %c0_36] : memref<128x32xf32, #tpu.memory_space<vmem>>, vector<128x32xf32>
    tpu.vector_store %arg16[%c0_35, %c0_36], %38 {strides = array<i32>} : memref<128x32xf32, #tpu.memory_space<vmem>>, vector<128x32xf32>,
    %c0_i32 = arith.constant 0 : i32
    %c16_i32 = arith.constant 16 : i32
    %40 = arith.addi %c0_i32, %c16_i32 : i32
    %c1_i32 = arith.constant 1 : i32
    scf.for %arg17 = %c0_i32 to %40 step %c1_i32  : i32 {
      %c8_i32 = arith.constant 8 : i32
      %120 = arith.muli %arg17, %c8_i32 : i32
      %121 = tpu.assume_multiple %120, 8 : i32
      %c0_i32_113 = arith.constant 0 : i32
      %122 = arith.addi %121, %c0_i32_113 : i32
      %123 = arith.index_cast %122 : i32 to index
      %124 = memref.load %arg0[%123] : memref<128xi32, #tpu.memory_space<smem>>
      %125 = arith.index_cast %124 : i32 to index
      %c0_114 = arith.constant 0 : index
      %126 = vector.load %arg13[%125, %c0_114] : memref<128x32xf32, #tpu.memory_space<vmem>>, vector<1x32xf32>
      %127 = arith.index_cast %122 : i32 to index
      %c0_115 = arith.constant 0 : index
      %128 = vector.load %arg12[%127, %c0_115] : memref<128x32xf32, #tpu.memory_space<vmem>>, vector<1x32xf32>
      %129 = arith.maximumf %126, %128 : vector<1x32xf32>
      %130 = arith.index_cast %124 : i32 to index
      %c0_116 = arith.constant 0 : index
      %131 = vector.load %arg13[%130, %c0_116] : memref<128x32xf32, #tpu.memory_space<vmem>>, vector<1x32xf32>
      tpu.vector_store %arg13[%130, %c0_116], %129 {strides = array<i32>} : memref<128x32xf32, #tpu.memory_space<vmem>>, vector<1x32xf32>,
      %c1_i32_117 = arith.constant 1 : i32
      %132 = arith.addi %121, %c1_i32_117 : i32
      %133 = arith.index_cast %132 : i32 to index
      %134 = memref.load %arg0[%133] : memref<128xi32, #tpu.memory_space<smem>>
      %135 = arith.index_cast %134 : i32 to index
      %c0_118 = arith.constant 0 : index
      %136 = vector.load %arg14[%135, %c0_118] : memref<128x32xf32, #tpu.memory_space<vmem>>, vector<1x32xf32>
      %137 = arith.index_cast %132 : i32 to index
      %c0_119 = arith.constant 0 : index
      %138 = vector.load %arg12[%137, %c0_119] : memref<128x32xf32, #tpu.memory_space<vmem>>, vector<1x32xf32>
      %139 = arith.maximumf %136, %138 : vector<1x32xf32>
      %140 = arith.index_cast %134 : i32 to index
      %c0_120 = arith.constant 0 : index
      %141 = vector.load %arg14[%140, %c0_120] : memref<128x32xf32, #tpu.memory_space<vmem>>, vector<1x32xf32>
      tpu.vector_store %arg14[%140, %c0_120], %139 {strides = array<i32>} : memref<128x32xf32, #tpu.memory_space<vmem>>, vector<1x32xf32>,
      %c2_i32 = arith.constant 2 : i32
      %142 = arith.addi %121, %c2_i32 : i32
      %143 = arith.index_cast %142 : i32 to index
      %144 = memref.load %arg0[%143] : memref<128xi32, #tpu.memory_space<smem>>
      %145 = arith.index_cast %144 : i32 to index
      %c0_121 = arith.constant 0 : index
      %146 = vector.load %arg15[%145, %c0_121] : memref<128x32xf32, #tpu.memory_space<vmem>>, vector<1x32xf32>
      %147 = arith.index_cast %142 : i32 to index
      %c0_122 = arith.constant 0 : index
      %148 = vector.load %arg12[%147, %c0_122] : memref<128x32xf32, #tpu.memory_space<vmem>>, vector<1x32xf32>
      %149 = arith.maximumf %146, %148 : vector<1x32xf32>
      %150 = arith.index_cast %144 : i32 to index
      %c0_123 = arith.constant 0 : index
      %151 = vector.load %arg15[%150, %c0_123] : memref<128x32xf32, #tpu.memory_space<vmem>>, vector<1x32xf32>
      tpu.vector_store %arg15[%150, %c0_123], %149 {strides = array<i32>} : memref<128x32xf32, #tpu.memory_space<vmem>>, vector<1x32xf32>,
      %c3_i32 = arith.constant 3 : i32
      %152 = arith.addi %121, %c3_i32 : i32
      %153 = arith.index_cast %152 : i32 to index
      %154 = memref.load %arg0[%153] : memref<128xi32, #tpu.memory_space<smem>>
      %155 = arith.index_cast %154 : i32 to index
      %c0_124 = arith.constant 0 : index
      %156 = vector.load %arg16[%155, %c0_124] : memref<128x32xf32, #tpu.memory_space<vmem>>, vector<1x32xf32>
      %157 = arith.index_cast %152 : i32 to index
      %c0_125 = arith.constant 0 : index
      %158 = vector.load %arg12[%157, %c0_125] : memref<128x32xf32, #tpu.memory_space<vmem>>, vector<1x32xf32>
      %159 = arith.maximumf %156, %158 : vector<1x32xf32>
      %160 = arith.index_cast %154 : i32 to index
      %c0_126 = arith.constant 0 : index
      %161 = vector.load %arg16[%160, %c0_126] : memref<128x32xf32, #tpu.memory_space<vmem>>, vector<1x32xf32>
      tpu.vector_store %arg16[%160, %c0_126], %159 {strides = array<i32>} : memref<128x32xf32, #tpu.memory_space<vmem>>, vector<1x32xf32>,
      %c4_i32 = arith.constant 4 : i32
      %162 = arith.addi %121, %c4_i32 : i32
      %163 = arith.index_cast %162 : i32 to index
      %164 = memref.load %arg0[%163] : memref<128xi32, #tpu.memory_space<smem>>
      %165 = arith.index_cast %164 : i32 to index
      %c0_127 = arith.constant 0 : index
      %166 = vector.load %arg13[%165, %c0_127] : memref<128x32xf32, #tpu.memory_space<vmem>>, vector<1x32xf32>
      %167 = arith.index_cast %162 : i32 to index
      %c0_128 = arith.constant 0 : index
      %168 = vector.load %arg12[%167, %c0_128] : memref<128x32xf32, #tpu.memory_space<vmem>>, vector<1x32xf32>
      %169 = arith.maximumf %166, %168 : vector<1x32xf32>
      %170 = arith.index_cast %164 : i32 to index
      %c0_129 = arith.constant 0 : index
      %171 = vector.load %arg13[%170, %c0_129] : memref<128x32xf32, #tpu.memory_space<vmem>>, vector<1x32xf32>
      tpu.vector_store %arg13[%170, %c0_129], %169 {strides = array<i32>} : memref<128x32xf32, #tpu.memory_space<vmem>>, vector<1x32xf32>,
      %c5_i32 = arith.constant 5 : i32
      %172 = arith.addi %121, %c5_i32 : i32
      %173 = arith.index_cast %172 : i32 to index
      %174 = memref.load %arg0[%173] : memref<128xi32, #tpu.memory_space<smem>>
      %175 = arith.index_cast %174 : i32 to index
      %c0_130 = arith.constant 0 : index
      %176 = vector.load %arg14[%175, %c0_130] : memref<128x32xf32, #tpu.memory_space<vmem>>, vector<1x32xf32>
      %177 = arith.index_cast %172 : i32 to index
      %c0_131 = arith.constant 0 : index
      %178 = vector.load %arg12[%177, %c0_131] : memref<128x32xf32, #tpu.memory_space<vmem>>, vector<1x32xf32>
      %179 = arith.maximumf %176, %178 : vector<1x32xf32>
      %180 = arith.index_cast %174 : i32 to index
      %c0_132 = arith.constant 0 : index
      %181 = vector.load %arg14[%180, %c0_132] : memref<128x32xf32, #tpu.memory_space<vmem>>, vector<1x32xf32>
      tpu.vector_store %arg14[%180, %c0_132], %179 {strides = array<i32>} : memref<128x32xf32, #tpu.memory_space<vmem>>, vector<1x32xf32>,
      %c6_i32 = arith.constant 6 : i32
      %182 = arith.addi %121, %c6_i32 : i32
      %183 = arith.index_cast %182 : i32 to index
      %184 = memref.load %arg0[%183] : memref<128xi32, #tpu.memory_space<smem>>
      %185 = arith.index_cast %184 : i32 to index
      %c0_133 = arith.constant 0 : index
      %186 = vector.load %arg15[%185, %c0_133] : memref<128x32xf32, #tpu.memory_space<vmem>>, vector<1x32xf32>
      %187 = arith.index_cast %182 : i32 to index
      %c0_134 = arith.constant 0 : index
      %188 = vector.load %arg12[%187, %c0_134] : memref<128x32xf32, #tpu.memory_space<vmem>>, vector<1x32xf32>
      %189 = arith.maximumf %186, %188 : vector<1x32xf32>
      %190 = arith.index_cast %184 : i32 to index
      %c0_135 = arith.constant 0 : index
      %191 = vector.load %arg15[%190, %c0_135] : memref<128x32xf32, #tpu.memory_space<vmem>>, vector<1x32xf32>
      tpu.vector_store %arg15[%190, %c0_135], %189 {strides = array<i32>} : memref<128x32xf32, #tpu.memory_space<vmem>>, vector<1x32xf32>,
      %c7_i32 = arith.constant 7 : i32
      %192 = arith.addi %121, %c7_i32 : i32
      %193 = arith.index_cast %192 : i32 to index
      %194 = memref.load %arg0[%193] : memref<128xi32, #tpu.memory_space<smem>>
      %195 = arith.index_cast %194 : i32 to index
      %c0_136 = arith.constant 0 : index
      %196 = vector.load %arg16[%195, %c0_136] : memref<128x32xf32, #tpu.memory_space<vmem>>, vector<1x32xf32>
      %197 = arith.index_cast %192 : i32 to index
      %c0_137 = arith.constant 0 : index
      %198 = vector.load %arg12[%197, %c0_137] : memref<128x32xf32, #tpu.memory_space<vmem>>, vector<1x32xf32>
      %199 = arith.maximumf %196, %198 : vector<1x32xf32>
      %200 = arith.index_cast %194 : i32 to index
      %c0_138 = arith.constant 0 : index
      %201 = vector.load %arg16[%200, %c0_138] : memref<128x32xf32, #tpu.memory_space<vmem>>, vector<1x32xf32>
      tpu.vector_store %arg16[%200, %c0_138], %199 {strides = array<i32>} : memref<128x32xf32, #tpu.memory_space<vmem>>, vector<1x32xf32>,
    }
    %c16_i32_37 = arith.constant 16 : i32
    %c0_38 = arith.constant 0 : index
    %c0_39 = arith.constant 0 : index
    %41 = vector.load %arg13[%c0_38, %c0_39] : memref<128x32xf32, #tpu.memory_space<vmem>>, vector<128x32xf32>
    %c0_40 = arith.constant 0 : index
    %c0_41 = arith.constant 0 : index
    %42 = vector.load %arg14[%c0_40, %c0_41] : memref<128x32xf32, #tpu.memory_space<vmem>>, vector<128x32xf32>
    %43 = arith.maximumf %41, %42 : vector<128x32xf32>
    %c0_42 = arith.constant 0 : index
    %c0_43 = arith.constant 0 : index
    %44 = vector.load %arg15[%c0_42, %c0_43] : memref<128x32xf32, #tpu.memory_space<vmem>>, vector<128x32xf32>
    %45 = arith.maximumf %43, %44 : vector<128x32xf32>
    %c0_44 = arith.constant 0 : index
    %c0_45 = arith.constant 0 : index
    %46 = vector.load %arg16[%c0_44, %c0_45] : memref<128x32xf32, #tpu.memory_space<vmem>>, vector<128x32xf32>
    %47 = arith.maximumf %45, %46 : vector<128x32xf32>
    %cst_46 = arith.constant dense<0.000000e+00> : vector<128x32xf32>
    %48 = tpu.matmul %5, %47, %cst_46 {dimension_numbers = #tpu.dot_dimension_numbers<[1], [0], [0], [1], [0, 0, 1, 1], [], []>} : vector<128x128xf32>, vector<128x32xf32>, vector<128x32xf32> -> vector<128x32xf32>
    %49 = tpu.concatenate %30, %48 in 1 : vector<128x32xf32>, vector<128x32xf32> -> vector<128x64xf32>
    %cst_47 = arith.constant 0.000000e+00 : f32
    %50 = vector.broadcast %cst_47 : f32 to vector<128x64xf32>
    %51 = arith.maximumf %49, %50 : vector<128x64xf32>
    %c1 = arith.constant 1 : index
    %c0_48 = arith.constant 0 : index
    %c0_49 = arith.constant 0 : index
    %52 = vector.load %arg5[%c1, %c0_48, %c0_49] : memref<3x64x32xf32, #tpu.memory_space<vmem>>, vector<1x64x32xf32>
    %53 = vector.shape_cast %52 : vector<1x64x32xf32> to vector<64x32xf32>
    %cst_50 = arith.constant dense<0.000000e+00> : vector<128x32xf32>
    %54 = tpu.matmul %51, %53, %cst_50 {dimension_numbers = #tpu.dot_dimension_numbers<[1], [0], [0], [1], [0, 0, 1, 1], [], []>} : vector<128x64xf32>, vector<64x32xf32>, vector<128x32xf32> -> vector<128x32xf32>
    %c1_51 = arith.constant 1 : index
    %c0_52 = arith.constant 0 : index
    %c0_53 = arith.constant 0 : index
    %55 = vector.load %arg6[%c1_51, %c0_52, %c0_53] : memref<3x1x32xf32, #tpu.memory_space<vmem>>, vector<1x1x32xf32>
    %56 = vector.shape_cast %55 : vector<1x1x32xf32> to vector<1x32xf32>
    %57 = vector.broadcast %56 : vector<1x32xf32> to vector<128x32xf32>
    %58 = arith.addf %54, %57 : vector<128x32xf32>
    %cst_54 = arith.constant 0.000000e+00 : f32
    %59 = vector.broadcast %cst_54 : f32 to vector<128x32xf32>
    %60 = arith.maximumf %58, %59 : vector<128x32xf32>
    %61 = tpu.concatenate %49, %60 in 1 : vector<128x64xf32>, vector<128x32xf32> -> vector<128x96xf32>
    %c1_55 = arith.constant 1 : index
    %c0_56 = arith.constant 0 : index
    %c0_57 = arith.constant 0 : index
    %62 = vector.load %arg7[%c1_55, %c0_56, %c0_57] : memref<3x96x32xf32, #tpu.memory_space<vmem>>, vector<1x96x32xf32>
    %63 = vector.shape_cast %62 : vector<1x96x32xf32> to vector<96x32xf32>
    %cst_58 = arith.constant dense<0.000000e+00> : vector<128x32xf32>
    %64 = tpu.matmul %61, %63, %cst_58 {dimension_numbers = #tpu.dot_dimension_numbers<[1], [0], [0], [1], [0, 0, 1, 1], [], []>} : vector<128x96xf32>, vector<96x32xf32>, vector<128x32xf32> -> vector<128x32xf32>
    %c1_59 = arith.constant 1 : index
    %c0_60 = arith.constant 0 : index
    %c0_61 = arith.constant 0 : index
    %65 = vector.load %arg8[%c1_59, %c0_60, %c0_61] : memref<3x1x32xf32, #tpu.memory_space<vmem>>, vector<1x1x32xf32>
    %66 = vector.shape_cast %65 : vector<1x1x32xf32> to vector<1x32xf32>
    %67 = vector.broadcast %66 : vector<1x32xf32> to vector<128x32xf32>
    %68 = arith.addf %64, %67 : vector<128x32xf32>
    %c0_62 = arith.constant 0 : index
    %c0_63 = arith.constant 0 : index
    %69 = vector.load %arg12[%c0_62, %c0_63] : memref<128x32xf32, #tpu.memory_space<vmem>>, vector<128x32xf32>
    tpu.vector_store %arg12[%c0_62, %c0_63], %68 {strides = array<i32>} : memref<128x32xf32, #tpu.memory_space<vmem>>, vector<128x32xf32>,
    %cst_64 = arith.constant -1.000000e+30 : f32
    %70 = vector.broadcast %cst_64 : f32 to vector<128x32xf32>
    %c0_65 = arith.constant 0 : index
    %c0_66 = arith.constant 0 : index
    %71 = vector.load %arg13[%c0_65, %c0_66] : memref<128x32xf32, #tpu.memory_space<vmem>>, vector<128x32xf32>
    tpu.vector_store %arg13[%c0_65, %c0_66], %70 {strides = array<i32>} : memref<128x32xf32, #tpu.memory_space<vmem>>, vector<128x32xf32>,
    %cst_67 = arith.constant -1.000000e+30 : f32
    %72 = vector.broadcast %cst_67 : f32 to vector<128x32xf32>
    %c0_68 = arith.constant 0 : index
    %c0_69 = arith.constant 0 : index
    %73 = vector.load %arg14[%c0_68, %c0_69] : memref<128x32xf32, #tpu.memory_space<vmem>>, vector<128x32xf32>
    tpu.vector_store %arg14[%c0_68, %c0_69], %72 {strides = array<i32>} : memref<128x32xf32, #tpu.memory_space<vmem>>, vector<128x32xf32>,
    %cst_70 = arith.constant -1.000000e+30 : f32
    %74 = vector.broadcast %cst_70 : f32 to vector<128x32xf32>
    %c0_71 = arith.constant 0 : index
    %c0_72 = arith.constant 0 : index
    %75 = vector.load %arg15[%c0_71, %c0_72] : memref<128x32xf32, #tpu.memory_space<vmem>>, vector<128x32xf32>
    tpu.vector_store %arg15[%c0_71, %c0_72], %74 {strides = array<i32>} : memref<128x32xf32, #tpu.memory_space<vmem>>, vector<128x32xf32>,
    %cst_73 = arith.constant -1.000000e+30 : f32
    %76 = vector.broadcast %cst_73 : f32 to vector<128x32xf32>
    %c0_74 = arith.constant 0 : index
    %c0_75 = arith.constant 0 : index
    %77 = vector.load %arg16[%c0_74, %c0_75] : memref<128x32xf32, #tpu.memory_space<vmem>>, vector<128x32xf32>
    tpu.vector_store %arg16[%c0_74, %c0_75], %76 {strides = array<i32>} : memref<128x32xf32, #tpu.memory_space<vmem>>, vector<128x32xf32>,
    %c0_i32_76 = arith.constant 0 : i32
    %c16_i32_77 = arith.constant 16 : i32
    %78 = arith.addi %c0_i32_76, %c16_i32_77 : i32
    %c1_i32_78 = arith.constant 1 : i32
    scf.for %arg17 = %c0_i32_76 to %78 step %c1_i32_78  : i32 {
      %c8_i32 = arith.constant 8 : i32
      %120 = arith.muli %arg17, %c8_i32 : i32
      %121 = tpu.assume_multiple %120, 8 : i32
      %c0_i32_113 = arith.constant 0 : i32
      %122 = arith.addi %121, %c0_i32_113 : i32
      %123 = arith.index_cast %122 : i32 to index
      %124 = memref.load %arg0[%123] : memref<128xi32, #tpu.memory_space<smem>>
      %125 = arith.index_cast %124 : i32 to index
      %c0_114 = arith.constant 0 : index
      %126 = vector.load %arg13[%125, %c0_114] : memref<128x32xf32, #tpu.memory_space<vmem>>, vector<1x32xf32>
      %127 = arith.index_cast %122 : i32 to index
      %c0_115 = arith.constant 0 : index
      %128 = vector.load %arg12[%127, %c0_115] : memref<128x32xf32, #tpu.memory_space<vmem>>, vector<1x32xf32>
      %129 = arith.maximumf %126, %128 : vector<1x32xf32>
      %130 = arith.index_cast %124 : i32 to index
      %c0_116 = arith.constant 0 : index
      %131 = vector.load %arg13[%130, %c0_116] : memref<128x32xf32, #tpu.memory_space<vmem>>, vector<1x32xf32>
      tpu.vector_store %arg13[%130, %c0_116], %129 {strides = array<i32>} : memref<128x32xf32, #tpu.memory_space<vmem>>, vector<1x32xf32>,
      %c1_i32_117 = arith.constant 1 : i32
      %132 = arith.addi %121, %c1_i32_117 : i32
      %133 = arith.index_cast %132 : i32 to index
      %134 = memref.load %arg0[%133] : memref<128xi32, #tpu.memory_space<smem>>
      %135 = arith.index_cast %134 : i32 to index
      %c0_118 = arith.constant 0 : index
      %136 = vector.load %arg14[%135, %c0_118] : memref<128x32xf32, #tpu.memory_space<vmem>>, vector<1x32xf32>
      %137 = arith.index_cast %132 : i32 to index
      %c0_119 = arith.constant 0 : index
      %138 = vector.load %arg12[%137, %c0_119] : memref<128x32xf32, #tpu.memory_space<vmem>>, vector<1x32xf32>
      %139 = arith.maximumf %136, %138 : vector<1x32xf32>
      %140 = arith.index_cast %134 : i32 to index
      %c0_120 = arith.constant 0 : index
      %141 = vector.load %arg14[%140, %c0_120] : memref<128x32xf32, #tpu.memory_space<vmem>>, vector<1x32xf32>
      tpu.vector_store %arg14[%140, %c0_120], %139 {strides = array<i32>} : memref<128x32xf32, #tpu.memory_space<vmem>>, vector<1x32xf32>,
      %c2_i32 = arith.constant 2 : i32
      %142 = arith.addi %121, %c2_i32 : i32
      %143 = arith.index_cast %142 : i32 to index
      %144 = memref.load %arg0[%143] : memref<128xi32, #tpu.memory_space<smem>>
      %145 = arith.index_cast %144 : i32 to index
      %c0_121 = arith.constant 0 : index
      %146 = vector.load %arg15[%145, %c0_121] : memref<128x32xf32, #tpu.memory_space<vmem>>, vector<1x32xf32>
      %147 = arith.index_cast %142 : i32 to index
      %c0_122 = arith.constant 0 : index
      %148 = vector.load %arg12[%147, %c0_122] : memref<128x32xf32, #tpu.memory_space<vmem>>, vector<1x32xf32>
      %149 = arith.maximumf %146, %148 : vector<1x32xf32>
      %150 = arith.index_cast %144 : i32 to index
      %c0_123 = arith.constant 0 : index
      %151 = vector.load %arg15[%150, %c0_123] : memref<128x32xf32, #tpu.memory_space<vmem>>, vector<1x32xf32>
      tpu.vector_store %arg15[%150, %c0_123], %149 {strides = array<i32>} : memref<128x32xf32, #tpu.memory_space<vmem>>, vector<1x32xf32>,
      %c3_i32 = arith.constant 3 : i32
      %152 = arith.addi %121, %c3_i32 : i32
      %153 = arith.index_cast %152 : i32 to index
      %154 = memref.load %arg0[%153] : memref<128xi32, #tpu.memory_space<smem>>
      %155 = arith.index_cast %154 : i32 to index
      %c0_124 = arith.constant 0 : index
      %156 = vector.load %arg16[%155, %c0_124] : memref<128x32xf32, #tpu.memory_space<vmem>>, vector<1x32xf32>
      %157 = arith.index_cast %152 : i32 to index
      %c0_125 = arith.constant 0 : index
      %158 = vector.load %arg12[%157, %c0_125] : memref<128x32xf32, #tpu.memory_space<vmem>>, vector<1x32xf32>
      %159 = arith.maximumf %156, %158 : vector<1x32xf32>
      %160 = arith.index_cast %154 : i32 to index
      %c0_126 = arith.constant 0 : index
      %161 = vector.load %arg16[%160, %c0_126] : memref<128x32xf32, #tpu.memory_space<vmem>>, vector<1x32xf32>
      tpu.vector_store %arg16[%160, %c0_126], %159 {strides = array<i32>} : memref<128x32xf32, #tpu.memory_space<vmem>>, vector<1x32xf32>,
      %c4_i32 = arith.constant 4 : i32
      %162 = arith.addi %121, %c4_i32 : i32
      %163 = arith.index_cast %162 : i32 to index
      %164 = memref.load %arg0[%163] : memref<128xi32, #tpu.memory_space<smem>>
      %165 = arith.index_cast %164 : i32 to index
      %c0_127 = arith.constant 0 : index
      %166 = vector.load %arg13[%165, %c0_127] : memref<128x32xf32, #tpu.memory_space<vmem>>, vector<1x32xf32>
      %167 = arith.index_cast %162 : i32 to index
      %c0_128 = arith.constant 0 : index
      %168 = vector.load %arg12[%167, %c0_128] : memref<128x32xf32, #tpu.memory_space<vmem>>, vector<1x32xf32>
      %169 = arith.maximumf %166, %168 : vector<1x32xf32>
      %170 = arith.index_cast %164 : i32 to index
      %c0_129 = arith.constant 0 : index
      %171 = vector.load %arg13[%170, %c0_129] : memref<128x32xf32, #tpu.memory_space<vmem>>, vector<1x32xf32>
      tpu.vector_store %arg13[%170, %c0_129], %169 {strides = array<i32>} : memref<128x32xf32, #tpu.memory_space<vmem>>, vector<1x32xf32>,
      %c5_i32 = arith.constant 5 : i32
      %172 = arith.addi %121, %c5_i32 : i32
      %173 = arith.index_cast %172 : i32 to index
      %174 = memref.load %arg0[%173] : memref<128xi32, #tpu.memory_space<smem>>
      %175 = arith.index_cast %174 : i32 to index
      %c0_130 = arith.constant 0 : index
      %176 = vector.load %arg14[%175, %c0_130] : memref<128x32xf32, #tpu.memory_space<vmem>>, vector<1x32xf32>
      %177 = arith.index_cast %172 : i32 to index
      %c0_131 = arith.constant 0 : index
      %178 = vector.load %arg12[%177, %c0_131] : memref<128x32xf32, #tpu.memory_space<vmem>>, vector<1x32xf32>
      %179 = arith.maximumf %176, %178 : vector<1x32xf32>
      %180 = arith.index_cast %174 : i32 to index
      %c0_132 = arith.constant 0 : index
      %181 = vector.load %arg14[%180, %c0_132] : memref<128x32xf32, #tpu.memory_space<vmem>>, vector<1x32xf32>
      tpu.vector_store %arg14[%180, %c0_132], %179 {strides = array<i32>} : memref<128x32xf32, #tpu.memory_space<vmem>>, vector<1x32xf32>,
      %c6_i32 = arith.constant 6 : i32
      %182 = arith.addi %121, %c6_i32 : i32
      %183 = arith.index_cast %182 : i32 to index
      %184 = memref.load %arg0[%183] : memref<128xi32, #tpu.memory_space<smem>>
      %185 = arith.index_cast %184 : i32 to index
      %c0_133 = arith.constant 0 : index
      %186 = vector.load %arg15[%185, %c0_133] : memref<128x32xf32, #tpu.memory_space<vmem>>, vector<1x32xf32>
      %187 = arith.index_cast %182 : i32 to index
      %c0_134 = arith.constant 0 : index
      %188 = vector.load %arg12[%187, %c0_134] : memref<128x32xf32, #tpu.memory_space<vmem>>, vector<1x32xf32>
      %189 = arith.maximumf %186, %188 : vector<1x32xf32>
      %190 = arith.index_cast %184 : i32 to index
      %c0_135 = arith.constant 0 : index
      %191 = vector.load %arg15[%190, %c0_135] : memref<128x32xf32, #tpu.memory_space<vmem>>, vector<1x32xf32>
      tpu.vector_store %arg15[%190, %c0_135], %189 {strides = array<i32>} : memref<128x32xf32, #tpu.memory_space<vmem>>, vector<1x32xf32>,
      %c7_i32 = arith.constant 7 : i32
      %192 = arith.addi %121, %c7_i32 : i32
      %193 = arith.index_cast %192 : i32 to index
      %194 = memref.load %arg0[%193] : memref<128xi32, #tpu.memory_space<smem>>
      %195 = arith.index_cast %194 : i32 to index
      %c0_136 = arith.constant 0 : index
      %196 = vector.load %arg16[%195, %c0_136] : memref<128x32xf32, #tpu.memory_space<vmem>>, vector<1x32xf32>
      %197 = arith.index_cast %192 : i32 to index
      %c0_137 = arith.constant 0 : index
      %198 = vector.load %arg12[%197, %c0_137] : memref<128x32xf32, #tpu.memory_space<vmem>>, vector<1x32xf32>
      %199 = arith.maximumf %196, %198 : vector<1x32xf32>
      %200 = arith.index_cast %194 : i32 to index
      %c0_138 = arith.constant 0 : index
      %201 = vector.load %arg16[%200, %c0_138] : memref<128x32xf32, #tpu.memory_space<vmem>>, vector<1x32xf32>
      tpu.vector_store %arg16[%200, %c0_138], %199 {strides = array<i32>} : memref<128x32xf32, #tpu.memory_space<vmem>>, vector<1x32xf32>,
    }
    %c16_i32_79 = arith.constant 16 : i32
    %c0_80 = arith.constant 0 : index
    %c0_81 = arith.constant 0 : index
    %79 = vector.load %arg13[%c0_80, %c0_81] : memref<128x32xf32, #tpu.memory_space<vmem>>, vector<128x32xf32>
    %c0_82 = arith.constant 0 : index
    %c0_83 = arith.constant 0 : index
    %80 = vector.load %arg14[%c0_82, %c0_83] : memref<128x32xf32, #tpu.memory_space<vmem>>, vector<128x32xf32>
    %81 = arith.maximumf %79, %80 : vector<128x32xf32>
    %c0_84 = arith.constant 0 : index
    %c0_85 = arith.constant 0 : index
    %82 = vector.load %arg15[%c0_84, %c0_85] : memref<128x32xf32, #tpu.memory_space<vmem>>, vector<128x32xf32>
    %83 = arith.maximumf %81, %82 : vector<128x32xf32>
    %c0_86 = arith.constant 0 : index
    %c0_87 = arith.constant 0 : index
    %84 = vector.load %arg16[%c0_86, %c0_87] : memref<128x32xf32, #tpu.memory_space<vmem>>, vector<128x32xf32>
    %85 = arith.maximumf %83, %84 : vector<128x32xf32>
    %cst_88 = arith.constant dense<0.000000e+00> : vector<128x32xf32>
    %86 = tpu.matmul %5, %85, %cst_88 {dimension_numbers = #tpu.dot_dimension_numbers<[1], [0], [0], [1], [0, 0, 1, 1], [], []>} : vector<128x128xf32>, vector<128x32xf32>, vector<128x32xf32> -> vector<128x32xf32>
    %87 = tpu.concatenate %68, %86 in 1 : vector<128x32xf32>, vector<128x32xf32> -> vector<128x64xf32>
    %cst_89 = arith.constant 0.000000e+00 : f32
    %88 = vector.broadcast %cst_89 : f32 to vector<128x64xf32>
    %89 = arith.maximumf %87, %88 : vector<128x64xf32>
    %c2 = arith.constant 2 : index
    %c0_90 = arith.constant 0 : index
    %c0_91 = arith.constant 0 : index
    %90 = vector.load %arg5[%c2, %c0_90, %c0_91] : memref<3x64x32xf32, #tpu.memory_space<vmem>>, vector<1x64x32xf32>
    %91 = vector.shape_cast %90 : vector<1x64x32xf32> to vector<64x32xf32>
    %cst_92 = arith.constant dense<0.000000e+00> : vector<128x32xf32>
    %92 = tpu.matmul %89, %91, %cst_92 {dimension_numbers = #tpu.dot_dimension_numbers<[1], [0], [0], [1], [0, 0, 1, 1], [], []>} : vector<128x64xf32>, vector<64x32xf32>, vector<128x32xf32> -> vector<128x32xf32>
    %c2_93 = arith.constant 2 : index
    %c0_94 = arith.constant 0 : index
    %c0_95 = arith.constant 0 : index
    %93 = vector.load %arg6[%c2_93, %c0_94, %c0_95] : memref<3x1x32xf32, #tpu.memory_space<vmem>>, vector<1x1x32xf32>
    %94 = vector.shape_cast %93 : vector<1x1x32xf32> to vector<1x32xf32>
    %95 = vector.broadcast %94 : vector<1x32xf32> to vector<128x32xf32>
    %96 = arith.addf %92, %95 : vector<128x32xf32>
    %cst_96 = arith.constant 0.000000e+00 : f32
    %97 = vector.broadcast %cst_96 : f32 to vector<128x32xf32>
    %98 = arith.maximumf %96, %97 : vector<128x32xf32>
    %99 = tpu.concatenate %87, %98 in 1 : vector<128x64xf32>, vector<128x32xf32> -> vector<128x96xf32>
    %c2_97 = arith.constant 2 : index
    %c0_98 = arith.constant 0 : index
    %c0_99 = arith.constant 0 : index
    %100 = vector.load %arg7[%c2_97, %c0_98, %c0_99] : memref<3x96x32xf32, #tpu.memory_space<vmem>>, vector<1x96x32xf32>
    %101 = vector.shape_cast %100 : vector<1x96x32xf32> to vector<96x32xf32>
    %cst_100 = arith.constant dense<0.000000e+00> : vector<128x32xf32>
    %102 = tpu.matmul %99, %101, %cst_100 {dimension_numbers = #tpu.dot_dimension_numbers<[1], [0], [0], [1], [0, 0, 1, 1], [], []>} : vector<128x96xf32>, vector<96x32xf32>, vector<128x32xf32> -> vector<128x32xf32>
    %c2_101 = arith.constant 2 : index
    %c0_102 = arith.constant 0 : index
    %c0_103 = arith.constant 0 : index
    %103 = vector.load %arg8[%c2_101, %c0_102, %c0_103] : memref<3x1x32xf32, #tpu.memory_space<vmem>>, vector<1x1x32xf32>
    %104 = vector.shape_cast %103 : vector<1x1x32xf32> to vector<1x32xf32>
    %105 = vector.broadcast %104 : vector<1x32xf32> to vector<128x32xf32>
    %106 = arith.addf %102, %105 : vector<128x32xf32>
    %c0_104 = arith.constant 0 : index
    %c0_105 = arith.constant 0 : index
    %107 = vector.load %arg9[%c0_104, %c0_105] : memref<32x33xf32, #tpu.memory_space<vmem>>, vector<32x33xf32>
    %cst_106 = arith.constant dense<0.000000e+00> : vector<128x33xf32>
    %108 = tpu.matmul %106, %107, %cst_106 {dimension_numbers = #tpu.dot_dimension_numbers<[1], [0], [0], [1], [0, 0, 1, 1], [], []>} : vector<128x32xf32>, vector<32x33xf32>, vector<128x33xf32> -> vector<128x33xf32>
    %c0_107 = arith.constant 0 : index
    %c0_108 = arith.constant 0 : index
    %109 = vector.load %arg10[%c0_107, %c0_108] : memref<1x33xf32, #tpu.memory_space<vmem>>, vector<1x33xf32>
    %110 = vector.broadcast %109 : vector<1x33xf32> to vector<128x33xf32>
    %111 = arith.addf %108, %110 : vector<128x33xf32>
    %cst_109 = arith.constant dense<0.000000e+00> : vector<33x128xf32>
    %112 = tpu.matmul %111, %5, %cst_109 {dimension_numbers = #tpu.dot_dimension_numbers<[0], [0], [1], [1], [0, 1, 1, 1], [], []>} : vector<128x33xf32>, vector<128x128xf32>, vector<33x128xf32> -> vector<33x128xf32>
    %113 = vector.extract_strided_slice %112 {offsets = [32, 0], sizes = [1, 128], strides = [1, 1]} : vector<33x128xf32> to vector<1x128xf32>
    %114 = vector.extract_strided_slice %112 {offsets = [0, 0], sizes = [32, 128], strides = [1, 1]} : vector<33x128xf32> to vector<32x128xf32>
    %cst_110 = arith.constant 1.000000e+00 : f32
    %115 = vector.broadcast %cst_110 : f32 to vector<1x128xf32>
    %116 = arith.maximumf %113, %115 : vector<1x128xf32>
    %117 = vector.broadcast %116 : vector<1x128xf32> to vector<32x128xf32>
    %118 = arith.divf %114, %117 : vector<32x128xf32>
    %c0_111 = arith.constant 0 : index
    %c0_112 = arith.constant 0 : index
    %119 = vector.load %arg11[%c0_111, %c0_112] : memref<32x128xf32, #tpu.memory_space<vmem>>, vector<32x128xf32>
    tpu.vector_store %arg11[%c0_111, %c0_112], %118 {strides = array<i32>} : memref<32x128xf32, #tpu.memory_space<vmem>>, vector<32x128xf32>,
    return
  }
}

</mosaic_0001>

<bundles_post_ra>
// kernel: tpu_custom_call.1
= control target key start
LH: loop header
LB: loop body
LE: loop exit
PB: predicated region body
PF: predicated region fallthrough
CT: control target
= control target key end

     0   :  { %16 = vsyncpa [#allocation9], 0  ;;  %s6437_s0 = inlined_call_operand.vmem [shape: s32[128], index: 0, kind: input, shape index: {}]   ;;  %s6438_s1 = inlined_call_operand.vmem [shape: s32[128,1], index: 1, kind: input, shape index: {}]   ;;  %s6439_s2 = inlined_call_operand.vmem [shape: f32[128,3], index: 2, kind: input, shape index: {}]   ;;  %s6440_s3 = inlined_call_operand.vmem [shape: f32[3,64], index: 3, kind: input, shape index: {}]   ;;  %s6441_s4 = inlined_call_operand.vmem [shape: f32[1,64], index: 4, kind: input, shape index: {}]   ;;  %s6442_s5 = inlined_call_operand.vmem [shape: f32[3,64,32], index: 5, kind: input, shape index: {}]   ;;  %s6443_s6 = inlined_call_operand.vmem [shape: f32[3,1,32], index: 6, kind: input, shape index: {}]   ;;  %s6444_s7 = inlined_call_operand.vmem [shape: f32[3,96,32], index: 7, kind: input, shape index: {}]   ;;  %s6445_s8 = inlined_call_operand.vmem [shape: f32[3,1,32], index: 8, kind: input, shape index: {}]   ;;  %s6446_s9 = inlined_call_operand.vmem [shape: f32[32,33], index: 9, kind: input, shape index: {}]   ;;  %s6447_s10 = inlined_call_operand.vmem [shape: f32[1,33], index: 10, kind: input, shape index: {}]   ;;  %s6448_s11 = inlined_call_operand.hbm [shape: f32[32,128], index: 11, kind: output, shape index: {}]  }
   0x1   :  { %17 = vsyncpa [#allocation8], 0  ;;  %s24_s19 = sshll.u32 %s6437_s0, 4  ;;  %s25_s19 = int_to_ptr.vmem [resolvable:$true] %s24_s19 }
   0x2   :  { %s4685_s20 = scalar_lea.vmem %s25_s19, 16  ;;  %p4690_p1 = scmp.lt.s32.totalorder %s25_s19, %s25_s19 }
   0x3   :  { %p4686_p0 = scmp.ne.s32.totalorder %s25_s19, %s4685_s20  ;;  %p4691_p2 = scmp.lt.s32.totalorder %s4685_s20, %s4685_s20 }
   0x5   :  { %p4692_p3 = por %p4691_p2, %p4690_p1 }
   0x7   :  { %p4693_p4 = pnand %p4692_p3, %p4686_p0 }
   0x9   :  { %4696 = shalt.err (!%p4693_p4)
}
   0xa   :  { %s4739_s21 = smov [#allocation7]  }
   0xb   :  { %27 = dma.vmem_to_smem %s25_s19, 16, %s4739_s21, [#allocation9]  }
   0xc   :  { %4727 = dma.done.wait [#allocation9], 16  }
   0xd   :  { %4728 = vsyncadd [#allocation9], 4294967280 }
   0xe   :  { %51 = sfence }
   0xf   :  { %v182_v0 = vld [vmem:[%s6440_s3] sm:$0x7]  ;;  %vm239_vm0 = vcmask 1042432   ;;  %vm190_vm1 = vcmask 23552   ;;  %v167_v2 = vld [vmem:[%s6439_s2 + $0x8] sm:$0xff]  ;;  %v168_v3 = vld [vmem:[%s6439_s2 + $0x10] sm:$0xff] }
  0x10   :  { %v166_v1 = vld [vmem:[%s6439_s2] sm:$0xff]  ;;  %3953 = vmatprep.subr.msk.mxu0 %vm239_vm0, %v182_v0  ;;  %4650 = vmatprep.subr.msk.mxu1 %vm239_vm0, %v182_v0  ;;  %v169_v4 = vld [vmem:[%s6439_s2 + $0x18] sm:$0xff]  ;;  %v179_v6 = vld [vmem:[%s6439_s2 + $0x68] sm:$0xff]  ;;  %vm6450_vm2 = vcmask 523264   ;;  %s4740_s12 = smov 64   ;;  %vm6449_vm3 = vcmask 785408  }
  0x11   :  { %3955 = vmatprep.mubr.msk.f32.mxu0 %vm190_vm1, %v166_v1  ;;  %3954 = vmatpush3.msk.msra.mxu0 %vm239_vm0, %v182_v0  ;;  %v178_v5 = vld [vmem:[%s6439_s2 + $0x60] sm:$0xff]  ;;  %v180_v8 = vld [vmem:[%s6439_s2 + $0x70] sm:$0xff]  ;;  %v405_v10 = vld [vmem:[%s6442_s5 + $0x8] sm:$0xff]  ;;  %s5404_s24 = smov 0  }
  0x12   :  { %3956 = vmatmul.mubr.msk.f32.vlgmr.msra.gmra.mrb[0].mxu0 %vm190_vm1, %v167_v2  ;;  %4651 = vmatpush3.msk.msra.mxu1 %vm239_vm0, %v182_v0  ;;  %v170_v7 = vld [vmem:[%s6439_s2 + $0x20] sm:$0xff]  ;;  %v406_v11 = vld [vmem:[%s6442_s5 + $0x10] sm:$0xff]  ;;  %v407_v12 = vld [vmem:[%s6442_s5 + $0x18] sm:$0xff] }
  0x13   :  { %3958 = vmatprep.mubr.msk.f32.mxu0 %vm190_vm1, %v168_v3  ;;  %3973 = vmatprep.mubr.msk.f32.mxu1 %vm190_vm1, %v178_v5  ;;  %v404_v9 = vld [vmem:[%s6442_s5] sm:$0xff]  ;;  %v181_v13 = vld [vmem:[%s6439_s2 + $0x78] sm:$0xff]  ;;  %v171_v15 = vld [vmem:[%s6439_s2 + $0x28] sm:$0xff]  ;;  %v4438_v16 = vpack.c.bf16 %v407_v12, %v406_v11 }
  0x14   :  { %3974 = vmatmul.mubr.msk.f32.vlgmr.msra.gmra.mrb[0].mxu1 %vm190_vm1, %v179_v6  ;;  %v4434_v14 = vpack.c.bf16 %v405_v10, %v404_v9  ;;  %v172_v17 = vld [vmem:[%s6439_s2 + $0x30] sm:$0xff]  ;;  %v408_v18 = vld [vmem:[%s6442_s5 + $0x20] sm:$0xff]  ;;  %v409_v19 = vld [vmem:[%s6442_s5 + $0x28] sm:$0xff] }
  0x15   :  { %3976 = vmatprep.mubr.msk.f32.mxu1 %vm190_vm1, %v180_v8  ;;  %v173_v20 = vld [vmem:[%s6439_s2 + $0x38] sm:$0xff]  ;;  %v4442_v21 = vpack.c.bf16 %v409_v19, %v408_v18  ;;  %v174_v22 = vld [vmem:[%s6439_s2 + $0x40] sm:$0xff]  ;;  %v175_v23 = vld [vmem:[%s6439_s2 + $0x48] sm:$0xff] }
  0x16   :  { %3959 = vmatmul.mubr.msk.f32.gmra.mrb[2].mxu0 %vm190_vm1, %v169_v4  ;;  %4435 = vmatprep.subr.bf16.mxu1 %v4434_v14  ;;  %v176_v24 = vld [vmem:[%s6439_s2 + $0x50] sm:$0xff]  ;;  %v177_v25 = vld [vmem:[%s6439_s2 + $0x58] sm:$0xff]  ;;  %v3416_v29 = vld [vmem:[%s6441_s4] ss:$0 sm:$0xff] }
  0x17   :  { %3961 = vmatprep.mubr.msk.f32.mxu0 %vm190_vm1, %v170_v7  ;;  %4437 = vmatpush3.bf16.msra.mxu1 %v4434_v14  ;;  %v410_v26 = vld [vmem:[%s6442_s5 + $0x30] sm:$0xff]  ;;  %v411_v27 = vld [vmem:[%s6442_s5 + $0x38] sm:$0xff]  ;;  %v709_v14 = vld [vmem:[%s6444_s7] sm:$0xff] }
  0x18   :  { %3977 = vmatmul.mubr.msk.f32.gmra.mrb[2].mxu1 %vm190_vm1, %v181_v13  ;;  %4439 = vmatprep.subr.bf16.mxu1 %v4438_v16  ;;  %v4446_v28 = vpack.c.bf16 %v411_v27, %v410_v26  ;;  %v712_v18 = vld [vmem:[%s6444_s7 + $0x18] sm:$0xff]  ;;  %v717_v26 = vld [vmem:[%s6444_s7 + $0x40] sm:$0xff]  ;;  %v718_v27 = vld [vmem:[%s6444_s7 + $0x48] sm:$0xff] }
  0x1a   :  { %3962 = vmatmul.mubr.msk.f32.gmra.mrb[4].mxu0 %vm190_vm1, %v171_v15  ;;  %v710_v15 = vld [vmem:[%s6444_s7 + $0x8] sm:$0xff] }
  0x1b   :  { %3964 = vmatprep.mubr.msk.f32.mxu0 %vm190_vm1, %v172_v17  ;;  %4441 = vmatpush3.bf16.msra.mxu1 %v4438_v16  ;;  %v711_v16 = vld [vmem:[%s6444_s7 + $0x10] sm:$0xff]  ;;  %v4450_v17 = vpack.c.bf16 %v710_v15, %v709_v14 }
  0x1c   :  { %4443 = vmatprep.subr.bf16.mxu1 %v4442_v21  ;;  %v4454_v19 = vpack.c.bf16 %v712_v18, %v711_v16 }
  0x1d   :  { %4451 = vmatprep.subr.bf16.mxu0 %v4450_v17 }
  0x1e   :  { %3965 = vmatmul.mubr.msk.f32.gmra.mrb[6].mxu0 %vm190_vm1, %v173_v20  ;;  %v713_v20 = vld [vmem:[%s6444_s7 + $0x20] sm:$0xff] }
  0x1f   :  { %3967 = vmatprep.mubr.msk.f32.mxu0 %vm190_vm1, %v174_v22  ;;  %4445 = vmatpush3.bf16.msra.mxu1 %v4442_v21  ;;  %v714_v21 = vld [vmem:[%s6444_s7 + $0x28] sm:$0xff] }
  0x20   :  { %4447 = vmatprep.subr.bf16.mxu1 %v4446_v28  ;;  %4453 = vmatpush3.bf16.msra.mxu0 %v4450_v17  ;;  %v4458_v22 = vpack.c.bf16 %v714_v21, %v713_v20 }
  0x21   :  { %4455 = vmatprep.subr.bf16.mxu0 %v4454_v19 }
  0x22   :  { %3968 = vmatmul.mubr.msk.f32.gmra.mrb[8].mxu0 %vm190_vm1, %v175_v23  ;;  %v715_v23 = vld [vmem:[%s6444_s7 + $0x30] sm:$0xff] }
  0x23   :  { %3970 = vmatprep.mubr.msk.f32.mxu0 %vm190_vm1, %v176_v24  ;;  %4449 = vmatpush3.bf16.msra.mxu1 %v4446_v28  ;;  %v716_v24 = vld [vmem:[%s6444_s7 + $0x38] sm:$0xff]  ;;  %v4466_v28 = vpack.c.bf16 %v718_v27, %v717_v26 }
  0x24   :  { %4457 = vmatpush3.bf16.msra.mxu0 %v4454_v19 }
  0x25   :  { %4459 = vmatprep.subr.bf16.mxu0 %v4458_v22 }
  0x26   :  { %3971 = vmatmul.mubr.msk.f32.gmra.mrb[10].mxu0 %vm190_vm1, %v177_v25  ;;  %v4462_v25 = vpack.c.bf16 %v716_v24, %v715_v23  ;;  %v4741_v23 = vmov 0  }
  0x27   :  { %4682 = vset.pattern.permute.xlu1 %v4741_v23  ;;  %4681 = vset.pattern.permute.xlu0 %v4741_v23 }
  0x28   :  { %4461 = vmatpush3.bf16.msra.mxu0 %v4458_v22 }
  0x29   :  { %4463 = vmatprep.subr.bf16.mxu0 %v4462_v25 }
  0x2c   :  { %4465 = vmatpush3.bf16.msra.mxu0 %v4462_v25 }
  0x2d   :  { %4467 = vmatprep.subr.bf16.mxu0 %v4466_v28 }
  0x30   :  { %4469 = vmatpush3.bf16.msra.mxu0 %v4466_v28 }
  0xe5   :  { %v3957_v30 = vpop.f32.mrb[0].mxu0 }
  0xe6   :  { %v4909_v31 = vadd.f32 %v3957_v30, %v3416_v29  ;;  %v309_v32 = vpop.f32.mrb[1].mxu0  ;;  %v720_v30 = vld [vmem:[%s6444_s7 + $0x58] sm:$0xff] }
  0xe7   :  { %v4911_v33 = vadd.f32 %v3416_v29, %v309_v32  ;;  %v3975_v34 = vpop.f32.mrb[0].mxu1 }
  0xe8   :  { %v369_v37 = vpop.f32.mrb[1].mxu1  ;;  %v389_v38 = vmax.f32 %v4909_v31, 0.0  ;;  %v4956_v6 = vadd.f32 %v3975_v34, %v3416_v29  ;;  %v5012_v34 = vld [vmem:[%s6443_s6] ss:$0 sm:$0xff] }
  0xe9   :  { %v388_v35 = vmax.f32 %v4911_v33, 0.0  ;;  %v3960_v36 = vpop.f32.mrb[2].mxu0  ;;  %v4947_v1 = vadd.f32 %v3416_v29, %v369_v37 }
  0xea   :  { %v4915_v39 = vadd.f32 %v3960_v36, %v3416_v29  ;;  %v319_v40 = vpop.f32.mrb[3].mxu0  ;;  %v401_v10 = vmax.f32 %v4956_v6, 0.0 }
  0xeb   :  { %v4917_v41 = vadd.f32 %v3416_v29, %v319_v40  ;;  %3995 = vmatprep.mubr.msk.f32.mxu1 %vm6450_vm2, %v388_v35  ;;  %v3978_v42 = vpop.f32.mrb[2].mxu1  ;;  %v400_v8 = vmax.f32 %v4947_v1, 0.0 }
  0xec   :  { %3996 = vmatmul.mubr.msk.f32.vlgmr.msra.gmra.mrb[4].mxu1 %vm6450_vm2, %v389_v38  ;;  %v379_v45 = vpop.f32.mrb[3].mxu1  ;;  %v391_v46 = vmax.f32 %v4915_v39, 0.0  ;;  %v4965_v11 = vadd.f32 %v3978_v42, %v3416_v29 }
  0xed   :  { %v390_v43 = vmax.f32 %v4917_v41, 0.0  ;;  %v3963_v44 = vpop.f32.mrb[4].mxu0  ;;  %v4960_v9 = vadd.f32 %v3416_v29, %v379_v45 }
  0xee   :  { %v4923_v47 = vadd.f32 %v3963_v44, %v3416_v29  ;;  %v329_v48 = vpop.f32.mrb[5].mxu0  ;;  %v403_v13 = vmax.f32 %v4965_v11, 0.0 }
  0xef   :  { %v4925_v49 = vadd.f32 %v3416_v29, %v329_v48  ;;  %3998 = vmatprep.mubr.msk.f32.mxu1 %vm6450_vm2, %v390_v43  ;;  %v402_v12 = vmax.f32 %v4960_v9, 0.0 }
  0xf0   :  { %v393_v50 = vmax.f32 %v4923_v47, 0.0  ;;  %3999 = vmatmul.mubr.msk.f32.gmra.mrb[6].mxu1 %vm6450_vm2, %v391_v46 }
  0xf1   :  { %v392_v51 = vmax.f32 %v4925_v49, 0.0  ;;  %v3966_v52 = vpop.f32.mrb[6].mxu0 }
  0xf2   :  { %v4931_v53 = vadd.f32 %v3966_v52, %v3416_v29  ;;  %v339_v54 = vpop.f32.mrb[7].mxu0 }
  0xf3   :  { %v4933_v55 = vadd.f32 %v3416_v29, %v339_v54  ;;  %4001 = vmatprep.mubr.msk.f32.mxu1 %vm6450_vm2, %v392_v51 }
  0xf4   :  { %v395_v56 = vmax.f32 %v4931_v53, 0.0  ;;  %4002 = vmatmul.mubr.msk.f32.gmra.mrb[8].mxu1 %vm6450_vm2, %v393_v50 }
  0xf5   :  { %v394_v57 = vmax.f32 %v4933_v55, 0.0  ;;  %v3969_v58 = vpop.f32.mrb[8].mxu0 }
  0xf6   :  { %v4939_v59 = vadd.f32 %v3969_v58, %v3416_v29  ;;  %v349_v60 = vpop.f32.mrb[9].mxu0 }
  0xf7   :  { %v4941_v61 = vadd.f32 %v3416_v29, %v349_v60  ;;  %4004 = vmatprep.mubr.msk.f32.mxu1 %vm6450_vm2, %v394_v57 }
  0xf8   :  { %v397_v62 = vmax.f32 %v4939_v59, 0.0  ;;  %4005 = vmatmul.mubr.msk.f32.gmra.mrb[10].mxu1 %vm6450_vm2, %v395_v56 }
  0xf9   :  { %v396_v63 = vmax.f32 %v4941_v61, 0.0  ;;  %v3972_v0 = vpop.f32.mrb[10].mxu0 }
  0xfa   :  { %v4949_v2 = vadd.f32 %v3972_v0, %v3416_v29  ;;  %v359_v3 = vpop.f32.mrb[11].mxu0 }
  0xfb   :  { %v4951_v4 = vadd.f32 %v3416_v29, %v359_v3  ;;  %4007 = vmatprep.mubr.msk.f32.mxu1 %vm6450_vm2, %v396_v63  ;;  %v719_v29 = vld [vmem:[%s6444_s7 + $0x50] sm:$0xff] }
  0xfc   :  { %v399_v5 = vmax.f32 %v4949_v2, 0.0  ;;  %4008 = vmatmul.mubr.msk.f32.gmra.mrb[12].mxu1 %vm6450_vm2, %v397_v62  ;;  %v4470_v32 = vpack.c.bf16 %v720_v30, %v719_v29 }
  0xfd   :  { %v398_v7 = vmax.f32 %v4951_v4, 0.0 }
  0xfe   :  { %4471 = vmatprep.subr.bf16.mxu0 %v4470_v32 }
  0xff   :  { %4010 = vmatprep.mubr.msk.f32.mxu1 %vm6450_vm2, %v398_v7  ;;  %4473 = vmatpush3.bf16.msra.mxu0 %v4470_v32 }
 0x100   :  { %4011 = vmatmul.mubr.msk.f32.gmra.mrb[14].mxu1 %vm6450_vm2, %v399_v5 }
 0x101   :  { %4013 = vmatprep.mubr.msk.f32.mxu1 %vm6450_vm2, %v400_v8 }
 0x104   :  { %4014 = vmatmul.mubr.msk.f32.gmra.mrb[16].mxu1 %vm6450_vm2, %v401_v10 }
 0x105   :  { %4016 = vmatprep.mubr.msk.f32.mxu1 %vm6450_vm2, %v402_v12 }
 0x108   :  { %4017 = vmatmul.mubr.msk.f32.gmra.mrb[18].mxu1 %vm6450_vm2, %v403_v13 }
 0x1bf   :  { %v3997_v35 = vpop.f32.mrb[4].mxu1 }
 0x1c0   :  { %v534_v36 = vpop.f32.mrb[5].mxu1  ;;  %v540_v38 = vadd.f32 %v3997_v35, %v5012_v34 }
 0x1c1   :  { %v535_v37 = vadd.f32 %v5012_v34, %v534_v36  ;;  %v54_v36 = vld [vmem:[%s6438_s1] sm:$0xff] }
 0x1c2   :  { %v614_v45 = vmax.f32 %v540_v38, 0.0  ;;  %v55_v38 = vld [vmem:[%s6438_s1 + $0x8] sm:$0xff] }
 0x1c3   :  { %v613_v40 = vmax.f32 %v535_v37, 0.0  ;;  %v4000_v42 = vpop.f32.mrb[6].mxu1 }
 0x1c4   :  { %v544_v43 = vpop.f32.mrb[7].mxu1  ;;  %v550_v46 = vadd.f32 %v4000_v42, %v5012_v34  ;;  %v59_v42 = vld [vmem:[%s6438_s1 + $0x28] sm:$0xff] }
 0x1c5   :  { %v545_v44 = vadd.f32 %v5012_v34, %v544_v43  ;;  %645 = vrot.lane.b32.xlu0 %v613_v40, %s4740_s12  ;;  %v56_v40 = vld [vmem:[%s6438_s1 + $0x10] sm:$0xff]  ;;  %v58_v43 = vld [vmem:[%s6438_s1 + $0x20] sm:$0xff] }
 0x1c6   :  { %v616_v54 = vmax.f32 %v550_v46, 0.0  ;;  %v63_v46 = vld [vmem:[%s6438_s1 + $0x48] sm:$0xff] }
 0x1c7   :  { %v615_v48 = vmax.f32 %v545_v44, 0.0  ;;  %v4003_v50 = vpop.f32.mrb[8].mxu1  ;;  %v61_v44 = vld [vmem:[%s6438_s1 + $0x38] sm:$0xff] }
 0x1c8   :  { %v554_v51 = vpop.f32.mrb[9].mxu1  ;;  %v560_v56 = vadd.f32 %v4003_v50, %v5012_v34  ;;  %v65_v50 = vld [vmem:[%s6438_s1 + $0x58] sm:$0xff] }
 0x1c9   :  { %v555_v52 = vadd.f32 %v5012_v34, %v554_v51  ;;  %649 = vrot.lane.b32.xlu1 %v615_v48, %s4740_s12  ;;  %647 = vrot.lane.b32.xlu0 %v614_v45, %s4740_s12  ;;  %v60_v45 = vld [vmem:[%s6438_s1 + $0x30] sm:$0xff]  ;;  %v62_v48 = vld [vmem:[%s6438_s1 + $0x40] sm:$0xff] }
 0x1ca   :  { %v618_v63 = vmax.f32 %v560_v56, 0.0  ;;  %v64_v51 = vld [vmem:[%s6438_s1 + $0x50] sm:$0xff]  ;;  %v69_v56 = vld [vmem:[%s6438_s1 + $0x78] sm:$0xff] }
 0x1cb   :  { %v617_v57 = vmax.f32 %v555_v52, 0.0  ;;  %v4006_v58 = vpop.f32.mrb[10].mxu1  ;;  %v67_v52 = vld [vmem:[%s6438_s1 + $0x68] sm:$0xff] }
 0x1cc   :  { %v564_v60 = vpop.f32.mrb[11].mxu1  ;;  %v570_v0 = vadd.f32 %v4006_v58, %v5012_v34 }
 0x1cd   :  { %v565_v62 = vadd.f32 %v5012_v34, %v564_v60  ;;  %651 = vrot.lane.b32.xlu1 %v616_v54, %s4740_s12  ;;  %653 = vrot.lane.b32.xlu0 %v617_v57, %s4740_s12  ;;  %v66_v54 = vld [vmem:[%s6438_s1 + $0x60] sm:$0xff]  ;;  %v68_v57 = vld [vmem:[%s6438_s1 + $0x70] sm:$0xff] }
 0x1ce   :  { %v620_v10 = vmax.f32 %v570_v0, 0.0 }
 0x1cf   :  { %v619_v3 = vmax.f32 %v565_v62, 0.0  ;;  %v4009_v5 = vpop.f32.mrb[12].mxu1 }
 0x1d0   :  { %v574_v7 = vpop.f32.mrb[13].mxu1  ;;  %v580_v12 = vadd.f32 %v4009_v5, %v5012_v34 }
 0x1d1   :  { %v575_v8 = vadd.f32 %v5012_v34, %v574_v7  ;;  %655 = vrot.lane.b32.xlu1 %v618_v63, %s4740_s12  ;;  %657 = vrot.lane.b32.xlu0 %v619_v3, %s4740_s12 }
 0x1d2   :  { %v622_v17 = vmax.f32 %v580_v12, 0.0 }
 0x1d3   :  { %v621_v13 = vmax.f32 %v575_v8, 0.0  ;;  %v4012_v14 = vpop.f32.mrb[14].mxu1 }
 0x1d4   :  { %v584_v15 = vpop.f32.mrb[15].mxu1  ;;  %v590_v18 = vadd.f32 %v4012_v14, %v5012_v34 }
 0x1d5   :  { %v585_v16 = vadd.f32 %v5012_v34, %v584_v15  ;;  %659 = vrot.lane.b32.xlu1 %v620_v10, %s4740_s12  ;;  %661 = vrot.lane.b32.xlu0 %v621_v13, %s4740_s12 }
 0x1d6   :  { %v624_v24 = vmax.f32 %v590_v18, 0.0 }
 0x1d7   :  { %v623_v19 = vmax.f32 %v585_v16, 0.0  ;;  %v4015_v20 = vpop.f32.mrb[16].mxu1 }
 0x1d8   :  { %v594_v21 = vpop.f32.mrb[17].mxu1  ;;  %v600_v25 = vadd.f32 %v4015_v20, %v5012_v34 }
 0x1d9   :  { %v595_v22 = vadd.f32 %v5012_v34, %v594_v21  ;;  %663 = vrot.lane.b32.xlu1 %v622_v17, %s4740_s12  ;;  %665 = vrot.lane.b32.xlu0 %v623_v19, %s4740_s12  ;;  %v6459_v21 = vlaneseq }
 0x1da   :  { %v626_v30 = vmax.f32 %v600_v25, 0.0 }
 0x1db   :  { %v625_v26 = vmax.f32 %v595_v22, 0.0  ;;  %v4018_v27 = vpop.f32.mrb[18].mxu1  ;;  %v5143_v22 = vand.u32 127, %v6459_v21 }
 0x1dc   :  { %v604_v28 = vpop.f32.mrb[19].mxu1  ;;  %v610_v32 = vadd.f32 %v4018_v27, %v5012_v34 }
 0x1dd   :  { %v605_v29 = vadd.f32 %v5012_v34, %v604_v28  ;;  %667 = vrot.lane.b32.xlu1 %v624_v24, %s4740_s12  ;;  %669 = vrot.lane.b32.xlu0 %v625_v26, %s4740_s12  ;;  %v57_v34 = vld [vmem:[%s6438_s1 + $0x18] sm:$0xff] }
 0x1de   :  { %v628_v37 = vmax.f32 %v610_v32, 0.0 }
 0x1df   :  { %v627_v35 = vmax.f32 %v605_v29, 0.0 }
 0x1e1   :  { %671 = vrot.lane.b32.xlu1 %v626_v30, %s4740_s12  ;;  %673 = vrot.lane.b32.xlu0 %v627_v35, %s4740_s12 }
 0x1e5   :  { %675 = vrot.lane.b32.xlu1 %v628_v37, %s4740_s12  ;;  %71 = vperm.xlu0 %4681, %v54_v36  }
 0x1e9   :  { %74 = vperm.xlu1 %4682, %v55_v38   ;;  %80 = vperm.xlu0 %4681, %v57_v34   ;;  %v4742_v34 = vmov -1e+30  }
 0x1ed   :  { %77 = vperm.xlu1 %4682, %v56_v40   ;;  %86 = vperm.xlu0 %4681, %v59_v42   ;;  %v3451_v40 = vld [vmem:[%s6445_s8] ss:$0 sm:$0xff] }
 0x1f1   :  { %83 = vperm.xlu1 %4682, %v58_v43   ;;  %92 = vperm.xlu0 %4681, %v61_v44  }
 0x1f5   :  { %89 = vperm.xlu1 %4682, %v60_v45   ;;  %98 = vperm.xlu0 %4681, %v63_v46  }
 0x1f9   :  { %95 = vperm.xlu1 %4682, %v62_v48   ;;  %104 = vperm.xlu0 %4681, %v65_v50  }
 0x1fd   :  { %101 = vperm.xlu1 %4682, %v64_v51   ;;  %110 = vperm.xlu0 %4681, %v67_v52  }
 0x201   :  { %107 = vperm.xlu1 %4682, %v66_v54   ;;  %116 = vperm.xlu0 %4681, %v69_v56  }
 0x205   :  { %113 = vperm.xlu1 %4682, %v68_v57  }
 0x237   :  { %v646_v58 = vpop.permute.xlu0 %645 }
 0x238   :  { %v693_v60 = vsel %vm6450_vm2, %v4911_v33, %v646_v58 }
 0x239   :  { %4043 = vmatprep.mubr.msk.f32.mxu0 %vm6449_vm3, %v693_v60 }
 0x23b   :  { %v650_v62 = vpop.permute.xlu1 %649  ;;  %v648_v63 = vpop.permute.xlu0 %647 }
 0x23c   :  { %v695_v0 = vsel %vm6450_vm2, %v4917_v41, %v650_v62  ;;  %v694_v3 = vsel %vm6450_vm2, %v4909_v31, %v648_v63 }
 0x23d   :  { %4044 = vmatmul.mubr.msk.f32.vlgmr.msra.gmra.mrb[12].mxu0 %vm6449_vm3, %v694_v3 }
 0x23e   :  { %4046 = vmatprep.mubr.msk.f32.mxu0 %vm6449_vm3, %v695_v0 }
 0x23f   :  { %v652_v5 = vpop.permute.xlu1 %651  ;;  %v654_v7 = vpop.permute.xlu0 %653 }
 0x240   :  { %v696_v8 = vsel %vm6450_vm2, %v4915_v39, %v652_v5  ;;  %v697_v33 = vsel %vm6450_vm2, %v4925_v49, %v654_v7 }
 0x241   :  { %4047 = vmatmul.mubr.msk.f32.gmra.mrb[14].mxu0 %vm6449_vm3, %v696_v8 }
 0x242   :  { %4049 = vmatprep.mubr.msk.f32.mxu0 %vm6449_vm3, %v697_v33 }
 0x243   :  { %v656_v41 = vpop.permute.xlu1 %655  ;;  %v658_v10 = vpop.permute.xlu0 %657 }
 0x244   :  { %v698_v31 = vsel %vm6450_vm2, %v4923_v47, %v656_v41  ;;  %v699_v12 = vsel %vm6450_vm2, %v4933_v55, %v658_v10 }
 0x245   :  { %4050 = vmatmul.mubr.msk.f32.gmra.mrb[16].mxu0 %vm6449_vm3, %v698_v31 }
 0x246   :  { %4052 = vmatprep.mubr.msk.f32.mxu0 %vm6449_vm3, %v699_v12 }
 0x247   :  { %v660_v39 = vpop.permute.xlu1 %659  ;;  %v662_v13 = vpop.permute.xlu0 %661 }
 0x248   :  { %v700_v49 = vsel %vm6450_vm2, %v4931_v53, %v660_v39  ;;  %v701_v14 = vsel %vm6450_vm2, %v4941_v61, %v662_v13 }
 0x249   :  { %4053 = vmatmul.mubr.msk.f32.gmra.mrb[18].mxu0 %vm6449_vm3, %v700_v49 }
 0x24a   :  { %4055 = vmatprep.mubr.msk.f32.mxu0 %vm6449_vm3, %v701_v14 }
 0x24b   :  { %v664_v47 = vpop.permute.xlu1 %663  ;;  %v666_v15 = vpop.permute.xlu0 %665 }
 0x24c   :  { %v702_v55 = vsel %vm6450_vm2, %v4939_v59, %v664_v47  ;;  %v703_v16 = vsel %vm6450_vm2, %v4951_v4, %v666_v15 }
 0x24d   :  { %4056 = vmatmul.mubr.msk.f32.gmra.mrb[20].mxu0 %vm6449_vm3, %v702_v55 }
 0x24e   :  { %4058 = vmatprep.mubr.msk.f32.mxu0 %vm6449_vm3, %v703_v16 }
 0x24f   :  { %v668_v53 = vpop.permute.xlu1 %667  ;;  %v670_v17 = vpop.permute.xlu0 %669 }
 0x250   :  { %v704_v61 = vsel %vm6450_vm2, %v4949_v2, %v668_v53  ;;  %v705_v18 = vsel %vm6450_vm2, %v4947_v1, %v670_v17 }
 0x251   :  { %4059 = vmatmul.mubr.msk.f32.gmra.mrb[22].mxu0 %vm6449_vm3, %v704_v61 }
 0x252   :  { %4061 = vmatprep.mubr.msk.f32.mxu0 %vm6449_vm3, %v705_v18 }
 0x253   :  { %v672_v59 = vpop.permute.xlu1 %671  ;;  %v674_v19 = vpop.permute.xlu0 %673 }
 0x254   :  { %v706_v4 = vsel %vm6450_vm2, %v4956_v6, %v672_v59  ;;  %v707_v20 = vsel %vm6450_vm2, %v4960_v9, %v674_v19 }
 0x255   :  { %4062 = vmatmul.mubr.msk.f32.gmra.mrb[24].mxu0 %vm6449_vm3, %v706_v4 }
 0x256   :  { %4064 = vmatprep.mubr.msk.f32.mxu0 %vm6449_vm3, %v707_v20 }
 0x257   :  { %v676_v2 = vpop.permute.xlu1 %675 }
 0x258   :  { %v708_v1 = vsel %vm6450_vm2, %v4965_v11, %v676_v2 }
 0x259   :  { %4065 = vmatmul.mubr.msk.f32.gmra.mrb[26].mxu0 %vm6449_vm3, %v708_v1  ;;  %vm922_vm3 = vcmask 261120  }
 0x25a   :  { %939 = vst.msk [vmem:[#allocation3] sm:$0xff] %vm922_vm3, %v4742_v34  ;;  %940 = vst.msk [vmem:[#allocation3 + $0x8] sm:$0xff] %vm922_vm3, %v4742_v34 }
 0x25b   :  { %941 = vst.msk [vmem:[#allocation3 + $0x10] sm:$0xff] %vm922_vm3, %v4742_v34  ;;  %942 = vst.msk [vmem:[#allocation3 + $0x18] sm:$0xff] %vm922_vm3, %v4742_v34 }
 0x25c   :  { %943 = vst.msk [vmem:[#allocation3 + $0x20] sm:$0xff] %vm922_vm3, %v4742_v34  ;;  %944 = vst.msk [vmem:[#allocation3 + $0x28] sm:$0xff] %vm922_vm3, %v4742_v34 }
 0x25d   :  { %945 = vst.msk [vmem:[#allocation3 + $0x30] sm:$0xff] %vm922_vm3, %v4742_v34  ;;  %946 = vst.msk [vmem:[#allocation3 + $0x38] sm:$0xff] %vm922_vm3, %v4742_v34 }
 0x25e   :  { %947 = vst.msk [vmem:[#allocation3 + $0x40] sm:$0xff] %vm922_vm3, %v4742_v34  ;;  %948 = vst.msk [vmem:[#allocation3 + $0x48] sm:$0xff] %vm922_vm3, %v4742_v34 }
 0x25f   :  { %949 = vst.msk [vmem:[#allocation3 + $0x50] sm:$0xff] %vm922_vm3, %v4742_v34  ;;  %950 = vst.msk [vmem:[#allocation3 + $0x58] sm:$0xff] %vm922_vm3, %v4742_v34 }
 0x260   :  { %951 = vst.msk [vmem:[#allocation3 + $0x60] sm:$0xff] %vm922_vm3, %v4742_v34  ;;  %952 = vst.msk [vmem:[#allocation3 + $0x68] sm:$0xff] %vm922_vm3, %v4742_v34 }
 0x261   :  { %953 = vst.msk [vmem:[#allocation3 + $0x70] sm:$0xff] %vm922_vm3, %v4742_v34  ;;  %954 = vst.msk [vmem:[#allocation3 + $0x78] sm:$0xff] %vm922_vm3, %v4742_v34 }
 0x262   :  { %955 = vst.msk [vmem:[#allocation4] sm:$0xff] %vm922_vm3, %v4742_v34  ;;  %956 = vst.msk [vmem:[#allocation4 + $0x8] sm:$0xff] %vm922_vm3, %v4742_v34 }
 0x263   :  { %957 = vst.msk [vmem:[#allocation4 + $0x10] sm:$0xff] %vm922_vm3, %v4742_v34  ;;  %958 = vst.msk [vmem:[#allocation4 + $0x18] sm:$0xff] %vm922_vm3, %v4742_v34 }
 0x264   :  { %v5145_v23 = vpop.permute.xlu0 %71  ;;  %959 = vst.msk [vmem:[#allocation4 + $0x20] sm:$0xff] %vm922_vm3, %v4742_v34  ;;  %960 = vst.msk [vmem:[#allocation4 + $0x28] sm:$0xff] %vm922_vm3, %v4742_v34 }
 0x265   :  { %6463 = vst [vmem:[#allocation13_spill] sm:$0xff] %v5145_v23  ;;  %vm118_vm4 = vcmp.eq.s32.totalorder %v5143_v22, %v5145_v23  ;;  %961 = vst.msk [vmem:[#allocation4 + $0x30] sm:$0xff] %vm922_vm3, %v4742_v34 }
 0x266   :  { %962 = vst.msk [vmem:[#allocation4 + $0x38] sm:$0xff] %vm922_vm3, %v4742_v34  ;;  %963 = vst.msk [vmem:[#allocation4 + $0x40] sm:$0xff] %vm922_vm3, %v4742_v34 }
 0x267   :  { %964 = vst.msk [vmem:[#allocation4 + $0x48] sm:$0xff] %vm922_vm3, %v4742_v34  ;;  %965 = vst.msk [vmem:[#allocation4 + $0x50] sm:$0xff] %vm922_vm3, %v4742_v34 }
 0x268   :  { %v5149_v6 = vpop.permute.xlu1 %74  ;;  %v5151_v9 = vpop.permute.xlu0 %80  ;;  %966 = vst.msk [vmem:[#allocation4 + $0x58] sm:$0xff] %vm922_vm3, %v4742_v34  ;;  %967 = vst.msk [vmem:[#allocation4 + $0x60] sm:$0xff] %vm922_vm3, %v4742_v34 }
 0x269   :  { %vm119_vm5 = vcmp.eq.s32.totalorder %v5143_v22, %v5149_v6  ;;  %vm121_vm6 = vcmp.eq.s32.totalorder %v5143_v22, %v5151_v9  ;;  %968 = vst.msk [vmem:[#allocation4 + $0x68] sm:$0xff] %vm922_vm3, %v4742_v34  ;;  %969 = vst.msk [vmem:[#allocation4 + $0x70] sm:$0xff] %vm922_vm3, %v4742_v34 }
 0x26a   :  { %970 = vst.msk [vmem:[#allocation4 + $0x78] sm:$0xff] %vm922_vm3, %v4742_v34  ;;  %971 = vst.msk [vmem:[#allocation5] sm:$0xff] %vm922_vm3, %v4742_v34 }
 0x26b   :  { %972 = vst.msk [vmem:[#allocation5 + $0x8] sm:$0xff] %vm922_vm3, %v4742_v34  ;;  %973 = vst.msk [vmem:[#allocation5 + $0x10] sm:$0xff] %vm922_vm3, %v4742_v34 }
 0x26c   :  { %v5157_v11 = vpop.permute.xlu1 %77  ;;  %v5159_v24 = vpop.permute.xlu0 %86  ;;  %974 = vst.msk [vmem:[#allocation5 + $0x18] sm:$0xff] %vm922_vm3, %v4742_v34  ;;  %975 = vst.msk [vmem:[#allocation5 + $0x20] sm:$0xff] %vm922_vm3, %v4742_v34 }
 0x26d   :  { %vm120_vm7 = vcmp.eq.s32.totalorder %v5143_v22, %v5157_v11  ;;  %vm123_vm8 = vcmp.eq.s32.totalorder %v5143_v22, %v5159_v24  ;;  %976 = vst.msk [vmem:[#allocation5 + $0x28] sm:$0xff] %vm922_vm3, %v4742_v34  ;;  %977 = vst.msk [vmem:[#allocation5 + $0x30] sm:$0xff] %vm922_vm3, %v4742_v34 }
 0x26e   :  { %978 = vst.msk [vmem:[#allocation5 + $0x38] sm:$0xff] %vm922_vm3, %v4742_v34  ;;  %979 = vst.msk [vmem:[#allocation5 + $0x40] sm:$0xff] %vm922_vm3, %v4742_v34 }
 0x26f   :  { %980 = vst.msk [vmem:[#allocation5 + $0x48] sm:$0xff] %vm922_vm3, %v4742_v34  ;;  %981 = vst.msk [vmem:[#allocation5 + $0x50] sm:$0xff] %vm922_vm3, %v4742_v34 }
 0x270   :  { %v5165_v25 = vpop.permute.xlu1 %83  ;;  %v5167_v26 = vpop.permute.xlu0 %92  ;;  %982 = vst.msk [vmem:[#allocation5 + $0x58] sm:$0xff] %vm922_vm3, %v4742_v34  ;;  %983 = vst.msk [vmem:[#allocation5 + $0x60] sm:$0xff] %vm922_vm3, %v4742_v34 }
 0x271   :  { %vm122_vm9 = vcmp.eq.s32.totalorder %v5143_v22, %v5165_v25  ;;  %vm6457_vm10 = vcmp.eq.s32.totalorder %v5143_v22, %v5167_v26  ;;  %984 = vst.msk [vmem:[#allocation5 + $0x68] sm:$0xff] %vm922_vm3, %v4742_v34  ;;  %985 = vst.msk [vmem:[#allocation5 + $0x70] sm:$0xff] %vm922_vm3, %v4742_v34 }
 0x272   :  { %986 = vst.msk [vmem:[#allocation5 + $0x78] sm:$0xff] %vm922_vm3, %v4742_v34  ;;  %987 = vst.msk [vmem:[#allocation6] sm:$0xff] %vm922_vm3, %v4742_v34 }
 0x273   :  { %988 = vst.msk [vmem:[#allocation6 + $0x8] sm:$0xff] %vm922_vm3, %v4742_v34  ;;  %989 = vst.msk [vmem:[#allocation6 + $0x10] sm:$0xff] %vm922_vm3, %v4742_v34 }
 0x274   :  { %v5173_v27 = vpop.permute.xlu1 %89  ;;  %v5175_v28 = vpop.permute.xlu0 %98  ;;  %990 = vst.msk [vmem:[#allocation6 + $0x18] sm:$0xff] %vm922_vm3, %v4742_v34  ;;  %991 = vst.msk [vmem:[#allocation6 + $0x20] sm:$0xff] %vm922_vm3, %v4742_v34 }
 0x275   :  { %vm6458_vm11 = vcmp.eq.s32.totalorder %v5143_v22, %v5173_v27  ;;  %vm6456_vm12 = vcmp.eq.s32.totalorder %v5143_v22, %v5175_v28  ;;  %992 = vst.msk [vmem:[#allocation6 + $0x28] sm:$0xff] %vm922_vm3, %v4742_v34  ;;  %993 = vst.msk [vmem:[#allocation6 + $0x30] sm:$0xff] %vm922_vm3, %v4742_v34 }
 0x276   :  { %994 = vst.msk [vmem:[#allocation6 + $0x38] sm:$0xff] %vm922_vm3, %v4742_v34  ;;  %995 = vst.msk [vmem:[#allocation6 + $0x40] sm:$0xff] %vm922_vm3, %v4742_v34 }
 0x277   :  { %996 = vst.msk [vmem:[#allocation6 + $0x48] sm:$0xff] %vm922_vm3, %v4742_v34  ;;  %997 = vst.msk [vmem:[#allocation6 + $0x50] sm:$0xff] %vm922_vm3, %v4742_v34 }
 0x278   :  { %v5181_v29 = vpop.permute.xlu1 %95  ;;  %v5183_v30 = vpop.permute.xlu0 %104  ;;  %998 = vst.msk [vmem:[#allocation6 + $0x58] sm:$0xff] %vm922_vm3, %v4742_v34  ;;  %999 = vst.msk [vmem:[#allocation6 + $0x60] sm:$0xff] %vm922_vm3, %v4742_v34 }
 0x279   :  { %vm6451_vm13 = vcmp.eq.s32.totalorder %v5143_v22, %v5181_v29  ;;  %vm6455_vm14 = vcmp.eq.s32.totalorder %v5143_v22, %v5183_v30  ;;  %1000 = vst.msk [vmem:[#allocation6 + $0x68] sm:$0xff] %vm922_vm3, %v4742_v34  ;;  %1001 = vst.msk [vmem:[#allocation6 + $0x70] sm:$0xff] %vm922_vm3, %v4742_v34 }
 0x27a   :  { %1002 = vst.msk [vmem:[#allocation6 + $0x78] sm:$0xff] %vm922_vm3, %v4742_v34 }
 0x27c   :  { %v5189_v32 = vpop.permute.xlu1 %101  ;;  %v5191_v35 = vpop.permute.xlu0 %110 }
 0x27d   :  { %vm6452_vm15 = vcmp.eq.s32.totalorder %v5143_v22, %v5189_v32 }
 0x280   :  { %v5197_v36 = vpop.permute.xlu1 %107  ;;  %v5203_v38 = vpop.permute.xlu0 %116 }
 0x281   :  { %vm6454_vm1 = vcmp.eq.s32.totalorder %v5143_v22, %v5197_v36 }
 0x284   :  { %v5201_v37 = vpop.permute.xlu1 %113 }
 0x285   :  { %vm6453_vm2 = vcmp.eq.s32.totalorder %v5143_v22, %v5201_v37 }
 0x310   :  { %v4045_v42 = vpop.f32.mrb[12].mxu0 }
 0x311   :  { %v5340_v43 = vadd.f32 %v4045_v42, %v3451_v40  ;;  %v843_v44 = vpop.f32.mrb[13].mxu0 }
 0x312   :  { %v5342_v45 = vadd.f32 %v3451_v40, %v843_v44 }
 0x313   :  { %924 = vst.msk [vmem:[#allocation2 + $0x8] sm:$0xff] %vm922_vm3, %v5340_v43 }
 0x314   :  { %923 = vst.msk [vmem:[#allocation2] sm:$0xff] %vm922_vm3, %v5342_v45  ;;  %v4048_v46 = vpop.f32.mrb[14].mxu0 }
 0x315   :  { %v5348_v48 = vadd.f32 %v4048_v46, %v3451_v40  ;;  %v853_v50 = vpop.f32.mrb[15].mxu0 }
 0x316   :  { %v5350_v51 = vadd.f32 %v3451_v40, %v853_v50 }
 0x317   :  { %926 = vst.msk [vmem:[#allocation2 + $0x18] sm:$0xff] %vm922_vm3, %v5348_v48 }
 0x318   :  { %925 = vst.msk [vmem:[#allocation2 + $0x10] sm:$0xff] %vm922_vm3, %v5350_v51  ;;  %v4051_v52 = vpop.f32.mrb[16].mxu0 }
 0x319   :  { %v5356_v54 = vadd.f32 %v4051_v52, %v3451_v40  ;;  %v863_v56 = vpop.f32.mrb[17].mxu0 }
 0x31a   :  { %v5358_v57 = vadd.f32 %v3451_v40, %v863_v56 }
 0x31b   :  { %928 = vst.msk [vmem:[#allocation2 + $0x28] sm:$0xff] %vm922_vm3, %v5356_v54 }
 0x31c   :  { %927 = vst.msk [vmem:[#allocation2 + $0x20] sm:$0xff] %vm922_vm3, %v5358_v57  ;;  %v4054_v58 = vpop.f32.mrb[18].mxu0 }
 0x31d   :  { %v5364_v60 = vadd.f32 %v4054_v58, %v3451_v40  ;;  %v873_v62 = vpop.f32.mrb[19].mxu0 }
 0x31e   :  { %v5366_v63 = vadd.f32 %v3451_v40, %v873_v62 }
 0x31f   :  { %930 = vst.msk [vmem:[#allocation2 + $0x38] sm:$0xff] %vm922_vm3, %v5364_v60 }
 0x320   :  { %929 = vst.msk [vmem:[#allocation2 + $0x30] sm:$0xff] %vm922_vm3, %v5366_v63  ;;  %v4057_v0 = vpop.f32.mrb[20].mxu0 }
 0x321   :  { %v5372_v3 = vadd.f32 %v4057_v0, %v3451_v40  ;;  %v883_v5 = vpop.f32.mrb[21].mxu0 }
 0x322   :  { %v5374_v7 = vadd.f32 %v3451_v40, %v883_v5 }
 0x323   :  { %932 = vst.msk [vmem:[#allocation2 + $0x48] sm:$0xff] %vm922_vm3, %v5372_v3 }
 0x324   :  { %931 = vst.msk [vmem:[#allocation2 + $0x40] sm:$0xff] %vm922_vm3, %v5374_v7  ;;  %v4060_v8 = vpop.f32.mrb[22].mxu0 }
 0x325   :  { %v5380_v33 = vadd.f32 %v4060_v8, %v3451_v40  ;;  %v893_v41 = vpop.f32.mrb[23].mxu0 }
 0x326   :  { %v5382_v10 = vadd.f32 %v3451_v40, %v893_v41 }
 0x327   :  { %934 = vst.msk [vmem:[#allocation2 + $0x58] sm:$0xff] %vm922_vm3, %v5380_v33 }
 0x328   :  { %933 = vst.msk [vmem:[#allocation2 + $0x50] sm:$0xff] %vm922_vm3, %v5382_v10  ;;  %v4063_v31 = vpop.f32.mrb[24].mxu0 }
 0x329   :  { %v5388_v12 = vadd.f32 %v4063_v31, %v3451_v40  ;;  %v903_v39 = vpop.f32.mrb[25].mxu0 }
 0x32a   :  { %v5390_v13 = vadd.f32 %v3451_v40, %v903_v39 }
 0x32b   :  { %936 = vst.msk [vmem:[#allocation2 + $0x68] sm:$0xff] %vm922_vm3, %v5388_v12 }
 0x32c   :  { %935 = vst.msk [vmem:[#allocation2 + $0x60] sm:$0xff] %vm922_vm3, %v5390_v13  ;;  %v4066_v49 = vpop.f32.mrb[26].mxu0 }
 0x32d   :  { %v5396_v14 = vadd.f32 %v4066_v49, %v3451_v40  ;;  %v913_v47 = vpop.f32.mrb[27].mxu0 }
 0x32e   :  { %v5398_v15 = vadd.f32 %v3451_v40, %v913_v47 }
 0x32f   :  { %938 = vst.msk [vmem:[#allocation2 + $0x78] sm:$0xff] %vm922_vm3, %v5396_v14 }
 0x330   :  { %937 = vst.msk [vmem:[#allocation2 + $0x70] sm:$0xff] %vm922_vm3, %v5398_v15 }
 0x331 LB: > { %s5410_s0 = sshll.u32 %s4733_s24, 3  ;;  %vm1016_vm0 = vcmask 253952   ;;  %s1008_s24 = sadd.s32 1, %s4733_s24   ;;  %s4733_s24 = sphi %s5404_s24, %s1008_s24  }
 0x332   : > { %s1010_s25 = sld [smem:[#allocation7 + %s5410_s0]]  ;;  %s1018_s26 = sadd.s32 1, %s5410_s0 }
 0x333   : > { %s1026_s27 = sadd.s32 2, %s5410_s0  ;;  %s5415_s28 = sld [smem:[#allocation7 + %s1018_s26]] }
 0x334   : > { %s5417_s3 = sld [smem:[#allocation7 + %s1026_s27]]  ;;  %s1034_s29 = sadd.s32 3, %s5410_s0 }
 0x335   : > { %s1042_s2 = sadd.s32 4, %s5410_s0  ;;  %s5421_s4 = sld [smem:[#allocation7 + %s1034_s29]] }
 0x336   : > { %s5423_s30 = sld [smem:[#allocation7 + %s1042_s2]]  ;;  %s5426_s13 = scalar_lea.vmem [#allocation2], %s5410_s0 }
 0x337   : > { %v1014_v55 = vld [vmem:[%s5426_s13] sm:$0x1]  ;;  %s1050_s14 = sadd.s32 5, %s5410_s0  ;;  %s1058_s15 = sadd.s32 6, %s5410_s0  ;;  %v3470_v16 = vld [vmem:[%s5426_s13 + $0x1] sm:$0x1] }
 0x338   : > { %s5432_s16 = sld [smem:[#allocation7 + %s1050_s14]]  ;;  %s1011_s17 = scalar_lea.vmem [#allocation3], %s1010_s25  ;;  %v3472_v17 = vld [vmem:[%s5426_s13 + $0x2] sm:$0x1]  ;;  %v3474_v19 = vld [vmem:[%s5426_s13 + $0x3] sm:$0x1] }
 0x339   : > { %v1012_v53 = vld [vmem:[%s1011_s17] sm:$0x1]  ;;  %s5435_s18 = sld [smem:[#allocation7 + %s1058_s15]]  ;;  %s1066_s19 = sadd.s32 7, %s5410_s0  ;;  %v3476_v40 = vld [vmem:[%s5426_s13 + $0x4] sm:$0x1] }
 0x33a   : > { %v1015_v61 = vmax.f32 %v1012_v53, %v1014_v55  ;;  %s1020_s20 = scalar_lea.vmem [#allocation4], %s5415_s28  ;;  %s1028_s21 = scalar_lea.vmem [#allocation5], %s5417_s3  ;;  %v3478_v44 = vld [vmem:[%s5426_s13 + $0x5] sm:$0x1]  ;;  %v3480_v46 = vld [vmem:[%s5426_s13 + $0x6] sm:$0x1] }
 0x33b   : > { %v1021_v18 = vld [vmem:[%s1020_s20] sm:$0x1]  ;;  %s1067_s22 = sld [smem:[#allocation7 + %s1066_s19]]  ;;  %s1036_s1 = scalar_lea.vmem [#allocation6], %s5421_s4  ;;  %v3482_v58 = vld [vmem:[%s5426_s13 + $0x7] sm:$0x1] }
 0x33c   : > { %v1029_v59 = vld [vmem:[%s1028_s21] sm:$0x1]  ;;  %1017 = vst.msk [vmem:[%s1011_s17] sm:$0x1] %vm1016_vm0, %v1015_v61  ;;  %v1024_v4 = vmax.f32 %v1021_v18, %v3470_v16  ;;  %s1044_s23 = scalar_lea.vmem [#allocation3], %s5423_s30  ;;  %p1005_p5 = scmp.ge.s32.totalorder %s1008_s24, 16  }
 0x33d   : > { %v1032_v20 = vmax.f32 %v1029_v59, %v3472_v17  ;;  %v1037_v2 = vld [vmem:[%s1036_s1] sm:$0x1]  ;;  %v6460_v53 = vmov (%p1005_p5), 1.0   ;;  %s5958_s24 = smov (%p1005_p5), 0  }
 0x33e   : > { %1025 = vst.msk [vmem:[%s1020_s20] sm:$0x1] %vm1016_vm0, %v1024_v4  ;;  %v1040_v1 = vmax.f32 %v1037_v2, %v3474_v19  ;;  %s1052_s0 = scalar_lea.vmem [#allocation4], %s5432_s16  ;;  %4099 = vmatprep.mubr.msk.f32.mxu1 (%p1005_p5), %vm118_vm4, %v6460_v53 }
 0x33f   : > { %1033 = vst.msk [vmem:[%s1028_s21] sm:$0x1] %vm1016_vm0, %v1032_v20  ;;  %s1060_s25 = scalar_lea.vmem [#allocation5], %s5435_s18  ;;  %s4744_s21 = smov (%p1005_p5), 32  }
 0x340   : > { %1041 = vst.msk [vmem:[%s1036_s1] sm:$0x1] %vm1016_vm0, %v1040_v1 }
 0x341   : > { %s1068_s26 = scalar_lea.vmem [#allocation6], %s1067_s22 }
 0x343   : > { %v1045_v42 = vld [vmem:[%s1044_s23] sm:$0x1] }
 0x344   : > { %v1048_v50 = vmax.f32 %v1045_v42, %v3476_v40  ;;  %1007 = sbr.rel (!%p1005_p5) target bundleno = 817 (0x331), region = 122 }
 0x345   : > { %v1053_v52 = vld [vmem:[%s1052_s0] sm:$0x1] }
 0x346   : > { %v1061_v56 = vld [vmem:[%s1060_s25] sm:$0x1]  ;;  %1049 = vst.msk [vmem:[%s1044_s23] sm:$0x1] %vm1016_vm0, %v1048_v50  ;;  %v1056_v62 = vmax.f32 %v1053_v52, %v3478_v44 }
 0x347   : > { %v1064_v0 = vmax.f32 %v1061_v56, %v3480_v46  ;;  %v1069_v5 = vld [vmem:[%s1068_s26] sm:$0x1] }
 0x348   : > { %1057 = vst.msk [vmem:[%s1052_s0] sm:$0x1] %vm1016_vm0, %v1056_v62  ;;  %v1072_v8 = vmax.f32 %v1069_v5, %v3482_v58 }
 0x349   : > { %1065 = vst.msk [vmem:[%s1060_s25] sm:$0x1] %vm1016_vm0, %v1064_v0 }
 0x34a   : > { %1073 = vst.msk [vmem:[%s1068_s26] sm:$0x1] %vm1016_vm0, %v1072_v8 }
 0x34d   :  { %v1074_v41 = vld [vmem:[#allocation3] sm:$0xff]  ;;  %v1075_v31 = vld [vmem:[#allocation3 + $0x8] sm:$0xff]  ;;  %v1076_v59 = vld [vmem:[#allocation3 + $0x10] sm:$0xff] }
 0x34e   :  { %1963 = vst.msk [vmem:[#allocation3] sm:$0xff] %vm922_vm3, %v4742_v34  ;;  %1964 = vst.msk [vmem:[#allocation3 + $0x8] sm:$0xff] %vm922_vm3, %v4742_v34  ;;  %v1077_v4 = vld [vmem:[#allocation3 + $0x18] sm:$0xff]  ;;  %v1078_v58 = vld [vmem:[#allocation3 + $0x20] sm:$0xff] }
 0x34f   :  { %v1090_v39 = vld [vmem:[#allocation4] sm:$0xff]  ;;  %v1091_v49 = vld [vmem:[#allocation4 + $0x8] sm:$0xff]  ;;  %v1092_v20 = vld [vmem:[#allocation4 + $0x10] sm:$0xff]  ;;  %1965 = vst.msk [vmem:[#allocation3 + $0x10] sm:$0xff] %vm922_vm3, %v4742_v34 }
 0x350   :  { %v1106_v47 = vmax.f32 %v1074_v41, %v1090_v39  ;;  %v1122_v55 = vld [vmem:[#allocation5] sm:$0xff]  ;;  %v1123_v16 = vld [vmem:[#allocation5 + $0x8] sm:$0xff]  ;;  %1979 = vst.msk [vmem:[#allocation4] sm:$0xff] %vm922_vm3, %v4742_v34  ;;  %v1107_v17 = vmax.f32 %v1075_v31, %v1091_v49  ;;  %1980 = vst.msk [vmem:[#allocation4 + $0x8] sm:$0xff] %vm922_vm3, %v4742_v34  ;;  %v1108_v40 = vmax.f32 %v1076_v59, %v1092_v20 }
 0x351   :  { %v1154_v61 = vld [vmem:[#allocation6] sm:$0xff]  ;;  %v1155_v18 = vld [vmem:[#allocation6 + $0x8] sm:$0xff]  ;;  %1995 = vst.msk [vmem:[#allocation5] sm:$0xff] %vm922_vm3, %v4742_v34  ;;  %1996 = vst.msk [vmem:[#allocation5 + $0x8] sm:$0xff] %vm922_vm3, %v4742_v34 }
 0x352   :  { %v1138_v19 = vmax.f32 %v1106_v47, %v1122_v55  ;;  %2011 = vst.msk [vmem:[#allocation6] sm:$0xff] %vm922_vm3, %v4742_v34  ;;  %2012 = vst.msk [vmem:[#allocation6 + $0x8] sm:$0xff] %vm922_vm3, %v4742_v34  ;;  %v1093_v2 = vld [vmem:[#allocation4 + $0x18] sm:$0xff]  ;;  %v1139_v1 = vmax.f32 %v1107_v17, %v1123_v16  ;;  %v1124_v44 = vld [vmem:[#allocation5 + $0x10] sm:$0xff] }
 0x353   :  { %v1109_v42 = vmax.f32 %v1077_v4, %v1093_v2  ;;  %v1125_v46 = vld [vmem:[#allocation5 + $0x18] sm:$0xff]  ;;  %v1156_v50 = vld [vmem:[#allocation6 + $0x10] sm:$0xff]  ;;  %1966 = vst.msk [vmem:[#allocation3 + $0x18] sm:$0xff] %vm922_vm3, %v4742_v34  ;;  %1981 = vst.msk [vmem:[#allocation4 + $0x10] sm:$0xff] %vm922_vm3, %v4742_v34  ;;  %v1140_v5 = vmax.f32 %v1108_v40, %v1124_v44 }
 0x354   :  { %1982 = vst.msk [vmem:[#allocation4 + $0x18] sm:$0xff] %vm922_vm3, %v4742_v34  ;;  %v1170_v52 = vmax.f32 %v1138_v19, %v1154_v61  ;;  %v1157_v56 = vld [vmem:[#allocation6 + $0x18] sm:$0xff]  ;;  %1997 = vst.msk [vmem:[#allocation5 + $0x10] sm:$0xff] %vm922_vm3, %v4742_v34  ;;  %v1079_v62 = vld [vmem:[#allocation3 + $0x28] sm:$0xff]  ;;  %v1171_v0 = vmax.f32 %v1139_v1, %v1155_v18 }
 0x355   :  { %1998 = vst.msk [vmem:[#allocation5 + $0x18] sm:$0xff] %vm922_vm3, %v4742_v34  ;;  %2013 = vst.msk [vmem:[#allocation6 + $0x10] sm:$0xff] %vm922_vm3, %v4742_v34  ;;  %v1141_v8 = vmax.f32 %v1109_v42, %v1125_v46  ;;  %v1094_v41 = vld [vmem:[#allocation4 + $0x20] sm:$0xff]  ;;  %v1095_v31 = vld [vmem:[#allocation4 + $0x28] sm:$0xff]  ;;  %v1172_v18 = vmax.f32 %v1140_v5, %v1156_v50 }
 0x356   :  { %2014 = vst.msk [vmem:[#allocation6 + $0x18] sm:$0xff] %vm922_vm3, %v4742_v34  ;;  %v1126_v39 = vld [vmem:[#allocation5 + $0x20] sm:$0xff]  ;;  %1967 = vst.msk [vmem:[#allocation3 + $0x20] sm:$0xff] %vm922_vm3, %v4742_v34  ;;  %v1110_v49 = vmax.f32 %v1078_v58, %v1094_v41  ;;  %v1111_v47 = vmax.f32 %v1079_v62, %v1095_v31  ;;  %v1127_v55 = vld [vmem:[#allocation5 + $0x28] sm:$0xff]  ;;  %v4474_v61 = vpack.c.bf16 %v1171_v0, %v1170_v52 }
 0x357   :  { %1968 = vst.msk [vmem:[#allocation3 + $0x28] sm:$0xff] %vm922_vm3, %v4742_v34  ;;  %v1158_v16 = vld [vmem:[#allocation6 + $0x20] sm:$0xff]  ;;  %v1159_v17 = vld [vmem:[#allocation6 + $0x28] sm:$0xff]  ;;  %1983 = vst.msk [vmem:[#allocation4 + $0x20] sm:$0xff] %vm922_vm3, %v4742_v34  ;;  %v1173_v59 = vmax.f32 %v1141_v8, %v1157_v56 }
 0x358   :  { %1984 = vst.msk [vmem:[#allocation4 + $0x28] sm:$0xff] %vm922_vm3, %v4742_v34  ;;  %1999 = vst.msk [vmem:[#allocation5 + $0x20] sm:$0xff] %vm922_vm3, %v4742_v34  ;;  %v1080_v19 = vld [vmem:[#allocation3 + $0x30] sm:$0xff]  ;;  %v1081_v4 = vld [vmem:[#allocation3 + $0x38] sm:$0xff]  ;;  %v1142_v2 = vmax.f32 %v1110_v49, %v1126_v39  ;;  %v1143_v1 = vmax.f32 %v1111_v47, %v1127_v55  ;;  %4475 = vmatprep.subr.bf16.mxu1 %v4474_v61 }
 0x359   :  { %2000 = vst.msk [vmem:[#allocation5 + $0x28] sm:$0xff] %vm922_vm3, %v4742_v34  ;;  %2015 = vst.msk [vmem:[#allocation6 + $0x20] sm:$0xff] %vm922_vm3, %v4742_v34  ;;  %v1096_v20 = vld [vmem:[#allocation4 + $0x30] sm:$0xff]  ;;  %v1097_v40 = vld [vmem:[#allocation4 + $0x38] sm:$0xff]  ;;  %v4478_v50 = vpack.c.bf16 %v1173_v59, %v1172_v18  ;;  %4477 = vmatpush3.bf16.msra.mxu1 %v4474_v61 }
 0x35a   :  { %2016 = vst.msk [vmem:[#allocation6 + $0x28] sm:$0xff] %vm922_vm3, %v4742_v34  ;;  %v1112_v42 = vmax.f32 %v1080_v19, %v1096_v20  ;;  %v1128_v44 = vld [vmem:[#allocation5 + $0x30] sm:$0xff]  ;;  %v1129_v46 = vld [vmem:[#allocation5 + $0x38] sm:$0xff]  ;;  %1969 = vst.msk [vmem:[#allocation3 + $0x30] sm:$0xff] %vm922_vm3, %v4742_v34  ;;  %v1113_v52 = vmax.f32 %v1081_v4, %v1097_v40  ;;  %v1174_v0 = vmax.f32 %v1142_v2, %v1158_v16 }
 0x35b   :  { %1970 = vst.msk [vmem:[#allocation3 + $0x38] sm:$0xff] %vm922_vm3, %v4742_v34  ;;  %1985 = vst.msk [vmem:[#allocation4 + $0x30] sm:$0xff] %vm922_vm3, %v4742_v34  ;;  %v1160_v56 = vld [vmem:[#allocation6 + $0x30] sm:$0xff]  ;;  %v1161_v58 = vld [vmem:[#allocation6 + $0x38] sm:$0xff]  ;;  %v1175_v5 = vmax.f32 %v1143_v1, %v1159_v17  ;;  %4479 = vmatprep.subr.bf16.mxu1 %v4478_v50 }
 0x35c   :  { %1986 = vst.msk [vmem:[#allocation4 + $0x38] sm:$0xff] %vm922_vm3, %v4742_v34  ;;  %2001 = vst.msk [vmem:[#allocation5 + $0x30] sm:$0xff] %vm922_vm3, %v4742_v34  ;;  %v1082_v62 = vld [vmem:[#allocation3 + $0x40] sm:$0xff]  ;;  %v1144_v8 = vmax.f32 %v1112_v42, %v1128_v44  ;;  %v1083_v41 = vld [vmem:[#allocation3 + $0x48] sm:$0xff]  ;;  %v1145_v49 = vmax.f32 %v1113_v52, %v1129_v46 }
 0x35d   :  { %2002 = vst.msk [vmem:[#allocation5 + $0x38] sm:$0xff] %vm922_vm3, %v4742_v34  ;;  %2017 = vst.msk [vmem:[#allocation6 + $0x30] sm:$0xff] %vm922_vm3, %v4742_v34  ;;  %v1098_v31 = vld [vmem:[#allocation4 + $0x40] sm:$0xff]  ;;  %v1099_v39 = vld [vmem:[#allocation4 + $0x48] sm:$0xff]  ;;  %v4482_v18 = vpack.c.bf16 %v1175_v5, %v1174_v0  ;;  %4481 = vmatpush3.bf16.msra.mxu1 %v4478_v50 }
 0x35e   :  { %2018 = vst.msk [vmem:[#allocation6 + $0x38] sm:$0xff] %vm922_vm3, %v4742_v34  ;;  %1971 = vst.msk [vmem:[#allocation3 + $0x40] sm:$0xff] %vm922_vm3, %v4742_v34  ;;  %v1114_v47 = vmax.f32 %v1082_v62, %v1098_v31  ;;  %v1115_v55 = vmax.f32 %v1083_v41, %v1099_v39  ;;  %v1130_v61 = vld [vmem:[#allocation5 + $0x40] sm:$0xff]  ;;  %v1131_v16 = vld [vmem:[#allocation5 + $0x48] sm:$0xff]  ;;  %v1176_v59 = vmax.f32 %v1144_v8, %v1160_v56 }
 0x35f   :  { %v1162_v17 = vld [vmem:[#allocation6 + $0x40] sm:$0xff]  ;;  %1972 = vst.msk [vmem:[#allocation3 + $0x48] sm:$0xff] %vm922_vm3, %v4742_v34  ;;  %1987 = vst.msk [vmem:[#allocation4 + $0x40] sm:$0xff] %vm922_vm3, %v4742_v34  ;;  %v1163_v19 = vld [vmem:[#allocation6 + $0x48] sm:$0xff]  ;;  %v1177_v2 = vmax.f32 %v1145_v49, %v1161_v58  ;;  %4483 = vmatprep.subr.bf16.mxu1 %v4482_v18 }
 0x360   :  { %1988 = vst.msk [vmem:[#allocation4 + $0x48] sm:$0xff] %vm922_vm3, %v4742_v34  ;;  %2003 = vst.msk [vmem:[#allocation5 + $0x40] sm:$0xff] %vm922_vm3, %v4742_v34  ;;  %v1084_v4 = vld [vmem:[#allocation3 + $0x50] sm:$0xff]  ;;  %v1085_v20 = vld [vmem:[#allocation3 + $0x58] sm:$0xff]  ;;  %v1146_v1 = vmax.f32 %v1114_v47, %v1130_v61  ;;  %v1147_v40 = vmax.f32 %v1115_v55, %v1131_v16 }
 0x361   :  { %2004 = vst.msk [vmem:[#allocation5 + $0x48] sm:$0xff] %vm922_vm3, %v4742_v34  ;;  %2019 = vst.msk [vmem:[#allocation6 + $0x40] sm:$0xff] %vm922_vm3, %v4742_v34  ;;  %v1100_v42 = vld [vmem:[#allocation4 + $0x50] sm:$0xff]  ;;  %v1101_v44 = vld [vmem:[#allocation4 + $0x58] sm:$0xff]  ;;  %v4486_v5 = vpack.c.bf16 %v1177_v2, %v1176_v59  ;;  %4485 = vmatpush3.bf16.msra.mxu1 %v4482_v18 }
 0x362   :  { %2020 = vst.msk [vmem:[#allocation6 + $0x48] sm:$0xff] %vm922_vm3, %v4742_v34  ;;  %v1132_v46 = vld [vmem:[#allocation5 + $0x50] sm:$0xff]  ;;  %1973 = vst.msk [vmem:[#allocation3 + $0x50] sm:$0xff] %vm922_vm3, %v4742_v34  ;;  %v1116_v52 = vmax.f32 %v1084_v4, %v1100_v42  ;;  %v1117_v56 = vmax.f32 %v1085_v20, %v1101_v44  ;;  %v1133_v62 = vld [vmem:[#allocation5 + $0x58] sm:$0xff]  ;;  %v1178_v8 = vmax.f32 %v1146_v1, %v1162_v17 }
 0x363   :  { %1974 = vst.msk [vmem:[#allocation3 + $0x58] sm:$0xff] %vm922_vm3, %v4742_v34  ;;  %v1164_v0 = vld [vmem:[#allocation6 + $0x50] sm:$0xff]  ;;  %v1165_v58 = vld [vmem:[#allocation6 + $0x58] sm:$0xff]  ;;  %1989 = vst.msk [vmem:[#allocation4 + $0x50] sm:$0xff] %vm922_vm3, %v4742_v34  ;;  %v1179_v41 = vmax.f32 %v1147_v40, %v1163_v19  ;;  %4487 = vmatprep.subr.bf16.mxu1 %v4486_v5 }
 0x364   :  { %1990 = vst.msk [vmem:[#allocation4 + $0x58] sm:$0xff] %vm922_vm3, %v4742_v34  ;;  %2005 = vst.msk [vmem:[#allocation5 + $0x50] sm:$0xff] %vm922_vm3, %v4742_v34  ;;  %v1086_v50 = vld [vmem:[#allocation3 + $0x60] sm:$0xff]  ;;  %v1087_v31 = vld [vmem:[#allocation3 + $0x68] sm:$0xff]  ;;  %v1148_v49 = vmax.f32 %v1116_v52, %v1132_v46  ;;  %v1149_v47 = vmax.f32 %v1117_v56, %v1133_v62 }
 0x365   :  { %2006 = vst.msk [vmem:[#allocation5 + $0x58] sm:$0xff] %vm922_vm3, %v4742_v34  ;;  %2021 = vst.msk [vmem:[#allocation6 + $0x50] sm:$0xff] %vm922_vm3, %v4742_v34  ;;  %v1102_v39 = vld [vmem:[#allocation4 + $0x60] sm:$0xff]  ;;  %v1103_v55 = vld [vmem:[#allocation4 + $0x68] sm:$0xff]  ;;  %v4490_v2 = vpack.c.bf16 %v1179_v41, %v1178_v8  ;;  %4489 = vmatpush3.bf16.msra.mxu1 %v4486_v5 }
 0x366   :  { %2022 = vst.msk [vmem:[#allocation6 + $0x58] sm:$0xff] %vm922_vm3, %v4742_v34  ;;  %v1118_v61 = vmax.f32 %v1086_v50, %v1102_v39  ;;  %v1134_v16 = vld [vmem:[#allocation5 + $0x60] sm:$0xff]  ;;  %v1135_v59 = vld [vmem:[#allocation5 + $0x68] sm:$0xff]  ;;  %1975 = vst.msk [vmem:[#allocation3 + $0x60] sm:$0xff] %vm922_vm3, %v4742_v34  ;;  %v1119_v17 = vmax.f32 %v1087_v31, %v1103_v55  ;;  %v1180_v1 = vmax.f32 %v1148_v49, %v1164_v0 }
 0x367   :  { %1976 = vst.msk [vmem:[#allocation3 + $0x68] sm:$0xff] %vm922_vm3, %v4742_v34  ;;  %1991 = vst.msk [vmem:[#allocation4 + $0x60] sm:$0xff] %vm922_vm3, %v4742_v34  ;;  %v1166_v19 = vld [vmem:[#allocation6 + $0x60] sm:$0xff]  ;;  %v1167_v4 = vld [vmem:[#allocation6 + $0x68] sm:$0xff]  ;;  %v1181_v40 = vmax.f32 %v1149_v47, %v1165_v58  ;;  %4491 = vmatprep.subr.bf16.mxu1 %v4490_v2 }
 0x368   :  { %1992 = vst.msk [vmem:[#allocation4 + $0x68] sm:$0xff] %vm922_vm3, %v4742_v34  ;;  %2007 = vst.msk [vmem:[#allocation5 + $0x60] sm:$0xff] %vm922_vm3, %v4742_v34  ;;  %v1088_v20 = vld [vmem:[#allocation3 + $0x70] sm:$0xff]  ;;  %v1089_v42 = vld [vmem:[#allocation3 + $0x78] sm:$0xff]  ;;  %v1150_v52 = vmax.f32 %v1118_v61, %v1134_v16  ;;  %v1151_v56 = vmax.f32 %v1119_v17, %v1135_v59 }
 0x369   :  { %2008 = vst.msk [vmem:[#allocation5 + $0x68] sm:$0xff] %vm922_vm3, %v4742_v34  ;;  %2023 = vst.msk [vmem:[#allocation6 + $0x60] sm:$0xff] %vm922_vm3, %v4742_v34  ;;  %v1104_v44 = vld [vmem:[#allocation4 + $0x70] sm:$0xff]  ;;  %v1105_v46 = vld [vmem:[#allocation4 + $0x78] sm:$0xff]  ;;  %v4494_v50 = vpack.c.bf16 %v1181_v40, %v1180_v1  ;;  %4493 = vmatpush3.bf16.msra.mxu1 %v4490_v2 }
 0x36a   :  { %2024 = vst.msk [vmem:[#allocation6 + $0x68] sm:$0xff] %vm922_vm3, %v4742_v34  ;;  %1977 = vst.msk [vmem:[#allocation3 + $0x70] sm:$0xff] %vm922_vm3, %v4742_v34  ;;  %v1120_v62 = vmax.f32 %v1088_v20, %v1104_v44  ;;  %v1121_v18 = vmax.f32 %v1089_v42, %v1105_v46  ;;  %v1136_v8 = vld [vmem:[#allocation5 + $0x70] sm:$0xff]  ;;  %v1137_v0 = vld [vmem:[#allocation5 + $0x78] sm:$0xff]  ;;  %v1182_v31 = vmax.f32 %v1150_v52, %v1166_v19 }
 0x36b   :  { %v1168_v58 = vld [vmem:[#allocation6 + $0x70] sm:$0xff]  ;;  %1978 = vst.msk [vmem:[#allocation3 + $0x78] sm:$0xff] %vm922_vm3, %v4742_v34  ;;  %1993 = vst.msk [vmem:[#allocation4 + $0x70] sm:$0xff] %vm922_vm3, %v4742_v34  ;;  %v1169_v41 = vld [vmem:[#allocation6 + $0x78] sm:$0xff]  ;;  %v1183_v39 = vmax.f32 %v1151_v56, %v1167_v4  ;;  %4495 = vmatprep.subr.bf16.mxu1 %v4494_v50 }
 0x36c   :  { %1994 = vst.msk [vmem:[#allocation4 + $0x78] sm:$0xff] %vm922_vm3, %v4742_v34  ;;  %2009 = vst.msk [vmem:[#allocation5 + $0x70] sm:$0xff] %vm922_vm3, %v4742_v34  ;;  %v1152_v49 = vmax.f32 %v1120_v62, %v1136_v8  ;;  %v1153_v47 = vmax.f32 %v1121_v18, %v1137_v0  ;;  %v3500_v5 = vld [vmem:[%s6442_s5 + $0x48] sm:$0xff]  ;;  %v3501_v17 = vld [vmem:[%s6442_s5 + $0x50] sm:$0xff] }
 0x36d   :  { %2010 = vst.msk [vmem:[#allocation5 + $0x78] sm:$0xff] %vm922_vm3, %v4742_v34  ;;  %2025 = vst.msk [vmem:[#allocation6 + $0x70] sm:$0xff] %vm922_vm3, %v4742_v34  ;;  %v4498_v55 = vpack.c.bf16 %v1183_v39, %v1182_v31  ;;  %4497 = vmatpush3.bf16.msra.mxu1 %v4494_v50  ;;  %v3502_v4 = vld [vmem:[%s6442_s5 + $0x58] sm:$0xff]  ;;  %v3503_v2 = vld [vmem:[%s6442_s5 + $0x60] sm:$0xff] }
 0x36e   :  { %2026 = vst.msk [vmem:[#allocation6 + $0x78] sm:$0xff] %vm922_vm3, %v4742_v34  ;;  %v1184_v61 = vmax.f32 %v1152_v49, %v1168_v58  ;;  %v1185_v16 = vmax.f32 %v1153_v47, %v1169_v41  ;;  %v3499_v34 = vld [vmem:[%s6442_s5 + $0x40] sm:$0xff]  ;;  %v4510_v20 = vpack.c.bf16 %v3502_v4, %v3501_v17  ;;  %v3504_v1 = vld [vmem:[%s6442_s5 + $0x68] sm:$0xff]  ;;  %v3505_v42 = vld [vmem:[%s6442_s5 + $0x70] sm:$0xff] }
 0x36f   :  { %4499 = vmatprep.subr.bf16.mxu1 %v4498_v55  ;;  %v4506_v19 = vpack.c.bf16 %v3500_v5, %v3499_v34  ;;  %v4514_v40 = vpack.c.bf16 %v3504_v1, %v3503_v2  ;;  %v3506_v44 = vld [vmem:[%s6442_s5 + $0x78] sm:$0xff] }
 0x370   :  { %v4502_v59 = vpack.c.bf16 %v1185_v16, %v1184_v61  ;;  %v4518_v46 = vpack.c.bf16 %v3506_v44, %v3505_v42 }
 0x371   :  { %4501 = vmatpush3.bf16.msra.mxu1 %v4498_v55  ;;  %4507 = vmatprep.subr.bf16.mxu0 %v4506_v19 }
 0x372   :  { %4503 = vmatprep.subr.bf16.mxu1 %v4502_v59  ;;  %4509 = vmatpush3.bf16.msra.mxu0 %v4506_v19 }
 0x373   :  { %4511 = vmatprep.subr.bf16.mxu0 %v4510_v20 }
 0x375   :  { %4505 = vmatpush3.bf16.msra.mxu1 %v4502_v59 }
 0x376   :  { %4513 = vmatpush3.bf16.msra.mxu0 %v4510_v20 }
 0x377   :  { %4515 = vmatprep.subr.bf16.mxu0 %v4514_v40 }
 0x378   :  { %4100 = vmatmul.mubr.msk.f32.vlgmr.msra.gmra.mrb[20].mxu1 %vm119_vm5, %v6460_v53 }
 0x379   :  { %4102 = vmatprep.mubr.msk.f32.mxu1 %vm120_vm7, %v6460_v53 }
 0x37a   :  { %4517 = vmatpush3.bf16.msra.mxu0 %v4514_v40 }
 0x37b   :  { %4519 = vmatprep.subr.bf16.mxu0 %v4518_v46 }
 0x37c   :  { %4103 = vmatmul.mubr.msk.f32.gmra.mrb[22].mxu1 %vm121_vm6, %v6460_v53 }
 0x37d   :  { %4105 = vmatprep.mubr.msk.f32.mxu1 %vm122_vm9, %v6460_v53 }
 0x37e   :  { %4521 = vmatpush3.bf16.msra.mxu0 %v4518_v46 }
 0x380   :  { %4106 = vmatmul.mubr.msk.f32.gmra.mrb[24].mxu1 %vm123_vm8, %v6460_v53 }
 0x381   :  { %4108 = vmatprep.mubr.msk.f32.mxu1 %vm6458_vm11, %v6460_v53 }
 0x384   :  { %4109 = vmatmul.mubr.msk.f32.gmra.mrb[26].mxu1 %vm6457_vm10, %v6460_v53 }
 0x385   :  { %4111 = vmatprep.mubr.msk.f32.mxu1 %vm6451_vm13, %v6460_v53  ;;  %vm6464_vm13 = vcmp.eq.s32.totalorder %v5143_v22, %v5191_v35 }
 0x388   :  { %4112 = vmatmul.mubr.msk.f32.gmra.mrb[28].mxu1 %vm6456_vm12, %v6460_v53 }
 0x389   :  { %4114 = vmatprep.mubr.msk.f32.mxu1 %vm6452_vm15, %v6460_v53  ;;  %vm6465_vm15 = vcmp.eq.s32.totalorder %v5143_v22, %v5203_v38 }
 0x38c   :  { %4115 = vmatmul.mubr.msk.f32.gmra.mrb[30].mxu1 %vm6455_vm14, %v6460_v53 }
 0x38d   :  { %4117 = vmatprep.mubr.msk.f32.mxu1 %vm6454_vm1, %v6460_v53 }
 0x390   :  { %4118 = vmatmul.mubr.msk.f32.gmra.mrb[32].mxu1 %vm6464_vm13, %v6460_v53  ;;  %vm6466_vm13 = vcmask 523264  }
 0x391   :  { %4120 = vmatprep.mubr.msk.f32.mxu1 %vm6453_vm2, %v6460_v53  ;;  %vm6468_vm2 = vmmov %vm6466_vm13 }
 0x394   :  { %4121 = vmatmul.mubr.msk.f32.gmra.mrb[34].mxu1 %vm6465_vm15, %v6460_v53  ;;  %vm6467_vm15 = vmmov %vm6466_vm13 }
 0x44b   :  { %v4101_v52 = vpop.f32.mrb[20].mxu1 }
 0x44c   :  { %v1252_v56 = vpop.f32.mrb[21].mxu1 }
 0x44d   :  { %1347 = vrot.lane.b32.xlu0 %v1252_v56, %s4744_s21 }
 0x44f   :  { %v4104_v62 = vpop.f32.mrb[22].mxu1 }
 0x450   :  { %v1262_v18 = vpop.f32.mrb[23].mxu1 }
 0x451   :  { %1349 = vrot.lane.b32.xlu0 %v4101_v52, %s4744_s21  ;;  %1351 = vrot.lane.b32.xlu1 %v1262_v18, %s4744_s21 }
 0x453   :  { %v4107_v8 = vpop.f32.mrb[24].mxu1 }
 0x454   :  { %v1272_v0 = vpop.f32.mrb[25].mxu1 }
 0x455   :  { %1353 = vrot.lane.b32.xlu1 %v4104_v62, %s4744_s21  ;;  %1355 = vrot.lane.b32.xlu0 %v1272_v0, %s4744_s21 }
 0x457   :  { %v4110_v58 = vpop.f32.mrb[26].mxu1 }
 0x458   :  { %v1282_v41 = vpop.f32.mrb[27].mxu1 }
 0x459   :  { %1357 = vrot.lane.b32.xlu1 %v4107_v8, %s4744_s21  ;;  %1359 = vrot.lane.b32.xlu0 %v1282_v41, %s4744_s21 }
 0x45b   :  { %v4113_v50 = vpop.f32.mrb[28].mxu1 }
 0x45c   :  { %v1292_v31 = vpop.f32.mrb[29].mxu1 }
 0x45d   :  { %1361 = vrot.lane.b32.xlu1 %v4110_v58, %s4744_s21  ;;  %1363 = vrot.lane.b32.xlu0 %v1292_v31, %s4744_s21 }
 0x45f   :  { %v4116_v39 = vpop.f32.mrb[30].mxu1 }
 0x460   :  { %v1302_v49 = vpop.f32.mrb[31].mxu1 }
 0x461   :  { %1365 = vrot.lane.b32.xlu1 %v4113_v50, %s4744_s21  ;;  %1367 = vrot.lane.b32.xlu0 %v1302_v49, %s4744_s21 }
 0x463   :  { %v4119_v47 = vpop.f32.mrb[32].mxu1 }
 0x464   :  { %v1312_v55 = vpop.f32.mrb[33].mxu1 }
 0x465   :  { %1369 = vrot.lane.b32.xlu1 %v4116_v39, %s4744_s21  ;;  %1371 = vrot.lane.b32.xlu0 %v1312_v55, %s4744_s21 }
 0x467   :  { %v4122_v61 = vpop.f32.mrb[34].mxu1 }
 0x468   :  { %v1322_v16 = vpop.f32.mrb[35].mxu1 }
 0x469   :  { %1373 = vrot.lane.b32.xlu1 %v4119_v47, %s4744_s21  ;;  %1375 = vrot.lane.b32.xlu0 %v1322_v16, %s4744_s21 }
 0x46d   :  { %1377 = vrot.lane.b32.xlu1 %v4122_v61, %s4744_s21 }
 0x4bf   :  { %v1348_v59 = vpop.permute.xlu0 %1347 }
 0x4c0   :  { %v5694_v34 = vsel %vm922_vm3, %v5342_v45, %v1348_v59 }
 0x4c1   :  { %v1411_v5 = vmax.f32 %v5694_v34, 0.0 }
 0x4c3   :  { %4139 = vmatprep.mubr.msk.f32.mxu0 %vm6466_vm13, %v1411_v5  ;;  %v1350_v17 = vpop.permute.xlu0 %1349  ;;  %v1352_v19 = vpop.permute.xlu1 %1351 }
 0x4c4   :  { %v5700_v4 = vsel %vm922_vm3, %v5340_v43, %v1350_v17  ;;  %v5704_v20 = vsel %vm922_vm3, %v5350_v51, %v1352_v19 }
 0x4c5   :  { %v1412_v2 = vmax.f32 %v5700_v4, 0.0  ;;  %v1413_v1 = vmax.f32 %v5704_v20, 0.0 }
 0x4c7   :  { %4140 = vmatmul.mubr.msk.f32.vlgmr.msra.gmra.mrb[28].mxu0 %vm6467_vm15, %v1412_v2  ;;  %v1354_v45 = vpop.permute.xlu1 %1353  ;;  %v1356_v40 = vpop.permute.xlu0 %1355  ;;  %vm6469_vm15 = vmmov %vm6468_vm2 }
 0x4c8   :  { %v5711_v42 = vsel %vm922_vm3, %v5348_v48, %v1354_v45  ;;  %4142 = vmatprep.mubr.msk.f32.mxu0 %vm6466_vm13, %v1413_v1  ;;  %v5716_v43 = vsel %vm922_vm3, %v5358_v57, %v1356_v40  ;;  %vm6470_vm13 = vmmov %vm6468_vm2  ;;  %v3526_v1 = vld [vmem:[%s6444_s7 + $0x68] sm:$0xff]  ;;  %v3527_v45 = vld [vmem:[%s6444_s7 + $0x70] sm:$0xff] }
 0x4c9   :  { %v1414_v51 = vmax.f32 %v5711_v42, 0.0  ;;  %v1415_v44 = vmax.f32 %v5716_v43, 0.0  ;;  %v3528_v40 = vld [vmem:[%s6444_s7 + $0x78] sm:$0xff] }
 0x4cb   :  { %4143 = vmatmul.mubr.msk.f32.gmra.mrb[30].mxu0 %vm6468_vm2, %v1414_v51  ;;  %v1358_v46 = vpop.permute.xlu1 %1357  ;;  %v1360_v52 = vpop.permute.xlu0 %1359  ;;  %v4526_v51 = vpack.c.bf16 %v3528_v40, %v3527_v45 }
 0x4cc   :  { %v5723_v56 = vsel %vm922_vm3, %v5356_v54, %v1358_v46  ;;  %4145 = vmatprep.mubr.msk.f32.mxu0 %vm6469_vm15, %v1415_v44  ;;  %v5728_v48 = vsel %vm922_vm3, %v5366_v63, %v1360_v52  ;;  %vm6471_vm15 = vmmov %vm6468_vm2  ;;  %v3529_v44 = vld [vmem:[%s6444_s7 + $0x80] sm:$0xff]  ;;  %v3530_v46 = vld [vmem:[%s6444_s7 + $0x88] sm:$0xff] }
 0x4cd   :  { %v1416_v57 = vmax.f32 %v5723_v56, 0.0  ;;  %v1417_v62 = vmax.f32 %v5728_v48, 0.0  ;;  %v4530_v52 = vpack.c.bf16 %v3530_v46, %v3529_v44 }
 0x4cf   :  { %4146 = vmatmul.mubr.msk.f32.gmra.mrb[32].mxu0 %vm6470_vm13, %v1416_v57  ;;  %v1362_v18 = vpop.permute.xlu1 %1361  ;;  %v1364_v8 = vpop.permute.xlu0 %1363  ;;  %vm6472_vm13 = vmmov %vm6468_vm2  ;;  %v3531_v57 = vld [vmem:[%s6444_s7 + $0x90] sm:$0xff] }
 0x4d0   :  { %v5735_v0 = vsel %vm922_vm3, %v5364_v60, %v1362_v18  ;;  %4148 = vmatprep.mubr.msk.f32.mxu0 %vm6468_vm2, %v1417_v62  ;;  %v5740_v54 = vsel %vm922_vm3, %v5374_v7, %v1364_v8  ;;  %v3532_v62 = vld [vmem:[%s6444_s7 + $0x98] sm:$0xff]  ;;  %v3533_v8 = vld [vmem:[%s6444_s7 + $0xa0] sm:$0xff] }
 0x4d1   :  { %v1418_v63 = vmax.f32 %v5735_v0, 0.0  ;;  %v1419_v58 = vmax.f32 %v5740_v54, 0.0  ;;  %v4534_v18 = vpack.c.bf16 %v3532_v62, %v3531_v57 }
 0x4d3   :  { %4149 = vmatmul.mubr.msk.f32.gmra.mrb[34].mxu0 %vm6471_vm15, %v1418_v63  ;;  %v1366_v41 = vpop.permute.xlu1 %1365  ;;  %v1368_v50 = vpop.permute.xlu0 %1367  ;;  %vm6473_vm15 = vmmov %vm6468_vm2  ;;  %v3534_v63 = vld [vmem:[%s6444_s7 + $0xa8] sm:$0xff] }
 0x4d4   :  { %v5747_v31 = vsel %vm922_vm3, %v5372_v3, %v1366_v41  ;;  %4151 = vmatprep.mubr.msk.f32.mxu0 %vm6472_vm13, %v1419_v58  ;;  %v5752_v60 = vsel %vm922_vm3, %v5382_v10, %v1368_v50  ;;  %vm6474_vm13 = vmmov %vm6468_vm2  ;;  %v4538_v58 = vpack.c.bf16 %v3534_v63, %v3533_v8  ;;  %v3535_v41 = vld [vmem:[%s6444_s7 + $0xb0] sm:$0xff]  ;;  %v3536_v50 = vld [vmem:[%s6444_s7 + $0xb8] sm:$0xff] }
 0x4d5   :  { %v1420_v7 = vmax.f32 %v5747_v31, 0.0  ;;  %v1421_v39 = vmax.f32 %v5752_v60, 0.0 }
 0x4d7   :  { %4152 = vmatmul.mubr.msk.f32.gmra.mrb[36].mxu0 %vm6468_vm2, %v1420_v7  ;;  %v1370_v49 = vpop.permute.xlu1 %1369  ;;  %v1372_v47 = vpop.permute.xlu0 %1371  ;;  %v4542_v7 = vpack.c.bf16 %v3536_v50, %v3535_v41 }
 0x4d8   :  { %v5759_v55 = vsel %vm922_vm3, %v5380_v33, %v1370_v49  ;;  %4154 = vmatprep.mubr.msk.f32.mxu0 %vm6473_vm15, %v1421_v39  ;;  %v5764_v3 = vsel %vm922_vm3, %v5390_v13, %v1372_v47  ;;  %vm6475_vm15 = vmmov %vm6468_vm2  ;;  %v3508_v39 = vld [vmem:[%s6443_s6 + $0x1] ss:$0 sm:$0xff] }
 0x4d9   :  { %v1422_v10 = vmax.f32 %v5759_v55, 0.0  ;;  %v1423_v61 = vmax.f32 %v5764_v3, 0.0 }
 0x4db   :  { %4155 = vmatmul.mubr.msk.f32.gmra.mrb[38].mxu0 %vm6474_vm13, %v1422_v10  ;;  %v1374_v16 = vpop.permute.xlu1 %1373  ;;  %v1376_v59 = vpop.permute.xlu0 %1375  ;;  %vm6476_vm13 = vmmov %vm6468_vm2 }
 0x4dc   :  { %v5771_v5 = vsel %vm922_vm3, %v5388_v12, %v1374_v16  ;;  %4157 = vmatprep.mubr.msk.f32.mxu0 %vm6468_vm2, %v1423_v61  ;;  %v5776_v33 = vsel %vm922_vm3, %v5398_v15, %v1376_v59  ;;  %v3525_v15 = vld [vmem:[%s6444_s7 + $0x60] sm:$0xff] }
 0x4dd   :  { %v1424_v13 = vmax.f32 %v5771_v5, 0.0  ;;  %v1425_v17 = vmax.f32 %v5776_v33, 0.0 }
 0x4df   :  { %4158 = vmatmul.mubr.msk.f32.gmra.mrb[40].mxu0 %vm6475_vm15, %v1424_v13  ;;  %v1378_v19 = vpop.permute.xlu1 %1377  ;;  %vm6477_vm15 = vmmov %vm6468_vm2 }
 0x4e0   :  { %v5783_v2 = vsel %vm922_vm3, %v5396_v14, %v1378_v19  ;;  %4160 = vmatprep.mubr.msk.f32.mxu0 %vm6476_vm13, %v1425_v17  ;;  %v4522_v14 = vpack.c.bf16 %v3526_v1, %v3525_v15  ;;  %vm6478_vm13 = vmmov %vm6468_vm2 }
 0x4e1   :  { %v1426_v12 = vmax.f32 %v5783_v2, 0.0  ;;  %vm6481_vm14 = vmmov %vm6478_vm13 }
 0x4e2   :  { %4523 = vmatprep.subr.bf16.mxu1 %v4522_v14  ;;  %vm6482_vm12 = vmmov %vm6478_vm13 }
 0x4e3   :  { %4161 = vmatmul.mubr.msk.f32.gmra.mrb[42].mxu0 %vm6468_vm2, %v1426_v12  ;;  %4525 = vmatpush3.bf16.msra.mxu1 %v4522_v14  ;;  %vm6479_vm2 = vcmask 785408  }
 0x4e4   :  { %4527 = vmatprep.subr.bf16.mxu1 %v4526_v51  ;;  %vm6480_vm1 = vmmov %vm6479_vm2 }
 0x4e5   :  { %vm6483_vm10 = vmmov %vm6480_vm1 }
 0x4e6   :  { %vm6484_vm11 = vmmov %vm6480_vm1 }
 0x4e7   :  { %4529 = vmatpush3.bf16.msra.mxu1 %v4526_v51 }
 0x4e8   :  { %4531 = vmatprep.subr.bf16.mxu1 %v4530_v52 }
 0x4eb   :  { %4533 = vmatpush3.bf16.msra.mxu1 %v4530_v52 }
 0x4ec   :  { %4535 = vmatprep.subr.bf16.mxu1 %v4534_v18 }
 0x4ef   :  { %4537 = vmatpush3.bf16.msra.mxu1 %v4534_v18 }
 0x4f0   :  { %4539 = vmatprep.subr.bf16.mxu1 %v4538_v58 }
 0x4f3   :  { %4541 = vmatpush3.bf16.msra.mxu1 %v4538_v58 }
 0x4f4   :  { %4543 = vmatprep.subr.bf16.mxu1 %v4542_v7 }
 0x4f7   :  { %4545 = vmatpush3.bf16.msra.mxu1 %v4542_v7 }
 0x59a   :  { %v4141_v49 = vpop.f32.mrb[28].mxu0 }
 0x59b   :  { %v1564_v47 = vadd.f32 %v4141_v49, %v3508_v39  ;;  %v1558_v10 = vpop.f32.mrb[29].mxu0 }
 0x59c   :  { %v1559_v61 = vadd.f32 %v3508_v39, %v1558_v10 }
 0x59d   :  { %v1638_v16 = vmax.f32 %v1564_v47, 0.0 }
 0x59e   :  { %v1637_v59 = vmax.f32 %v1559_v61, 0.0  ;;  %v4144_v13 = vpop.f32.mrb[30].mxu0 }
 0x59f   :  { %v1574_v17 = vadd.f32 %v4144_v13, %v3508_v39  ;;  %v1568_v19 = vpop.f32.mrb[31].mxu0  ;;  %1671 = vrot.lane.b32.xlu1 %v1638_v16, %s4740_s12 }
 0x5a0   :  { %v1569_v12 = vadd.f32 %v3508_v39, %v1568_v19  ;;  %1669 = vrot.lane.b32.xlu0 %v1637_v59, %s4740_s12 }
 0x5a1   :  { %v1640_v15 = vmax.f32 %v1574_v17, 0.0 }
 0x5a2   :  { %v1639_v1 = vmax.f32 %v1569_v12, 0.0  ;;  %v4147_v45 = vpop.f32.mrb[32].mxu0 }
 0x5a3   :  { %v1584_v14 = vadd.f32 %v4147_v45, %v3508_v39  ;;  %v1578_v40 = vpop.f32.mrb[33].mxu0  ;;  %1675 = vrot.lane.b32.xlu1 %v1640_v15, %s4740_s12 }
 0x5a4   :  { %v1579_v51 = vadd.f32 %v3508_v39, %v1578_v40  ;;  %1673 = vrot.lane.b32.xlu0 %v1639_v1, %s4740_s12 }
 0x5a5   :  { %v1642_v44 = vmax.f32 %v1584_v14, 0.0 }
 0x5a6   :  { %v1641_v46 = vmax.f32 %v1579_v51, 0.0  ;;  %v4150_v52 = vpop.f32.mrb[34].mxu0 }
 0x5a7   :  { %v1594_v57 = vadd.f32 %v4150_v52, %v3508_v39  ;;  %v1588_v62 = vpop.f32.mrb[35].mxu0  ;;  %1679 = vrot.lane.b32.xlu1 %v1642_v44, %s4740_s12 }
 0x5a8   :  { %v1589_v18 = vadd.f32 %v3508_v39, %v1588_v62  ;;  %1677 = vrot.lane.b32.xlu0 %v1641_v46, %s4740_s12 }
 0x5a9   :  { %v1644_v8 = vmax.f32 %v1594_v57, 0.0 }
 0x5aa   :  { %v1643_v63 = vmax.f32 %v1589_v18, 0.0  ;;  %v4153_v58 = vpop.f32.mrb[36].mxu0 }
 0x5ab   :  { %v1604_v41 = vadd.f32 %v4153_v58, %v3508_v39  ;;  %v1598_v50 = vpop.f32.mrb[37].mxu0  ;;  %1683 = vrot.lane.b32.xlu1 %v1644_v8, %s4740_s12 }
 0x5ac   :  { %v1599_v7 = vadd.f32 %v3508_v39, %v1598_v50  ;;  %1681 = vrot.lane.b32.xlu0 %v1643_v63, %s4740_s12 }
 0x5ad   :  { %v1646_v49 = vmax.f32 %v1604_v41, 0.0 }
 0x5ae   :  { %v1645_v47 = vmax.f32 %v1599_v7, 0.0  ;;  %v4156_v10 = vpop.f32.mrb[38].mxu0 }
 0x5af   :  { %v1614_v61 = vadd.f32 %v4156_v10, %v3508_v39  ;;  %v1608_v16 = vpop.f32.mrb[39].mxu0  ;;  %1687 = vrot.lane.b32.xlu1 %v1646_v49, %s4740_s12 }
 0x5b0   :  { %v1609_v59 = vadd.f32 %v3508_v39, %v1608_v16  ;;  %1685 = vrot.lane.b32.xlu0 %v1645_v47, %s4740_s12 }
 0x5b1   :  { %v1648_v13 = vmax.f32 %v1614_v61, 0.0 }
 0x5b2   :  { %v1647_v17 = vmax.f32 %v1609_v59, 0.0  ;;  %v4159_v19 = vpop.f32.mrb[40].mxu0 }
 0x5b3   :  { %v1624_v12 = vadd.f32 %v4159_v19, %v3508_v39  ;;  %v1618_v15 = vpop.f32.mrb[41].mxu0  ;;  %1691 = vrot.lane.b32.xlu1 %v1648_v13, %s4740_s12 }
 0x5b4   :  { %v1619_v1 = vadd.f32 %v3508_v39, %v1618_v15  ;;  %1689 = vrot.lane.b32.xlu0 %v1647_v17, %s4740_s12 }
 0x5b5   :  { %v1650_v45 = vmax.f32 %v1624_v12, 0.0 }
 0x5b6   :  { %v1649_v14 = vmax.f32 %v1619_v1, 0.0  ;;  %v4162_v40 = vpop.f32.mrb[42].mxu0 }
 0x5b7   :  { %v1634_v51 = vadd.f32 %v4162_v40, %v3508_v39  ;;  %1695 = vrot.lane.b32.xlu1 %v1650_v45, %s4740_s12  ;;  %v1628_v44 = vpop.f32.mrb[43].mxu0 }
 0x5b8   :  { %v1629_v46 = vadd.f32 %v3508_v39, %v1628_v44  ;;  %1693 = vrot.lane.b32.xlu0 %v1649_v14, %s4740_s12 }
 0x5b9   :  { %v1652_v52 = vmax.f32 %v1634_v51, 0.0 }
 0x5ba   :  { %v1651_v57 = vmax.f32 %v1629_v46, 0.0 }
 0x5bb   :  { %1699 = vrot.lane.b32.xlu1 %v1652_v52, %s4740_s12 }
 0x5bc   :  { %1697 = vrot.lane.b32.xlu0 %v1651_v57, %s4740_s12 }
 0x611   :  { %v1672_v62 = vpop.permute.xlu1 %1671 }
 0x612   :  { %v1670_v18 = vpop.permute.xlu0 %1669  ;;  %v1718_v63 = vsel %vm6478_vm13, %v5700_v4, %v1672_v62  ;;  %vm6486_vm13 = vmmov %vm6482_vm12 }
 0x613   :  { %v1717_v8 = vsel %vm6477_vm15, %v5694_v34, %v1670_v18  ;;  %vm6485_vm15 = vmmov %vm6482_vm12 }
 0x614   :  { %4187 = vmatprep.mubr.msk.f32.mxu1 %vm6479_vm2, %v1717_v8  ;;  %vm6487_vm2 = vmmov %vm6480_vm1 }
 0x615   :  { %v1676_v58 = vpop.permute.xlu1 %1675  ;;  %4188 = vmatmul.mubr.msk.f32.vlgmr.msra.gmra.mrb[36].mxu1 %vm6480_vm1, %v1718_v63 }
 0x616   :  { %v1674_v39 = vpop.permute.xlu0 %1673  ;;  %v1720_v50 = vsel %vm6482_vm12, %v5711_v42, %v1676_v58 }
 0x617   :  { %v1719_v41 = vsel %vm6481_vm14, %v5704_v20, %v1674_v39  ;;  %vm6490_vm14 = vmmov %vm6480_vm1 }
 0x618   :  { %4190 = vmatprep.mubr.msk.f32.mxu1 %vm6483_vm10, %v1719_v41  ;;  %vm6488_vm10 = vmmov %vm6482_vm12 }
 0x619   :  { %v1680_v7 = vpop.permute.xlu1 %1679  ;;  %4191 = vmatmul.mubr.msk.f32.gmra.mrb[38].mxu1 %vm6484_vm11, %v1720_v50  ;;  %vm6489_vm11 = vmmov %vm6480_vm1 }
 0x61a   :  { %v1678_v34 = vpop.permute.xlu0 %1677  ;;  %v1722_v49 = vsel %vm6486_vm13, %v5723_v56, %v1680_v7  ;;  %vm6492_vm13 = vmmov %vm6488_vm10 }
 0x61b   :  { %v1721_v4 = vsel %vm6485_vm15, %v5716_v43, %v1678_v34  ;;  %vm6491_vm15 = vmmov %vm6488_vm10 }
 0x61c   :  { %4193 = vmatprep.mubr.msk.f32.mxu1 %vm6480_vm1, %v1721_v4 }
 0x61d   :  { %v1684_v47 = vpop.permute.xlu1 %1683  ;;  %4194 = vmatmul.mubr.msk.f32.gmra.mrb[40].mxu1 %vm6487_vm2, %v1722_v49  ;;  %vm6493_vm2 = vmmov %vm6480_vm1 }
 0x61e   :  { %v1682_v20 = vpop.permute.xlu0 %1681  ;;  %v1724_v10 = vsel %vm6488_vm10, %v5735_v0, %v1684_v47 }
 0x61f   :  { %v1723_v42 = vsel %vm6482_vm12, %v5728_v48, %v1682_v20  ;;  %vm6494_vm12 = vmmov %vm6488_vm10 }
 0x620   :  { %4196 = vmatprep.mubr.msk.f32.mxu1 %vm6489_vm11, %v1723_v42  ;;  %vm6495_vm11 = vmmov %vm6480_vm1 }
 0x621   :  { %v1688_v61 = vpop.permute.xlu1 %1687  ;;  %4197 = vmatmul.mubr.msk.f32.gmra.mrb[42].mxu1 %vm6490_vm14, %v1724_v10  ;;  %vm6496_vm14 = vmmov %vm6480_vm1 }
 0x622   :  { %v1686_v43 = vpop.permute.xlu0 %1685  ;;  %v1726_v16 = vsel %vm6492_vm13, %v5747_v31, %v1688_v61  ;;  %vm6498_vm13 = vmmov %vm6488_vm10 }
 0x623   :  { %v1725_v56 = vsel %vm6491_vm15, %v5740_v54, %v1686_v43  ;;  %vm6497_vm15 = vmmov %vm6488_vm10 }
 0x624   :  { %4199 = vmatprep.mubr.msk.f32.mxu1 %vm6480_vm1, %v1725_v56 }
 0x625   :  { %v1692_v59 = vpop.permute.xlu1 %1691  ;;  %4200 = vmatmul.mubr.msk.f32.gmra.mrb[44].mxu1 %vm6493_vm2, %v1726_v16  ;;  %vm6499_vm2 = vmmov %vm6480_vm1 }
 0x626   :  { %v1690_v48 = vpop.permute.xlu0 %1689  ;;  %v1728_v13 = vsel %vm6488_vm10, %v5759_v55, %v1692_v59 }
 0x627   :  { %v1727_v0 = vsel %vm6494_vm12, %v5752_v60, %v1690_v48  ;;  %vm6500_vm12 = vmmov %vm6488_vm10 }
 0x628   :  { %4202 = vmatprep.mubr.msk.f32.mxu1 %vm6495_vm11, %v1727_v0  ;;  %vm6501_vm11 = vmmov %vm6480_vm1 }
 0x629   :  { %v1696_v17 = vpop.permute.xlu1 %1695  ;;  %4203 = vmatmul.mubr.msk.f32.gmra.mrb[46].mxu1 %vm6496_vm14, %v1728_v13  ;;  %vm6502_vm14 = vmmov %vm6480_vm1 }
 0x62a   :  { %v1694_v54 = vpop.permute.xlu0 %1693  ;;  %v1730_v19 = vsel %vm6498_vm13, %v5771_v5, %v1696_v17 }
 0x62b   :  { %v1729_v31 = vsel %vm6497_vm15, %v5764_v3, %v1694_v54  ;;  %v3538_v3 = vld [vmem:[%s6445_s8 + $0x1] ss:$0 sm:$0xff] }
 0x62c   :  { %4205 = vmatprep.mubr.msk.f32.mxu1 %vm6480_vm1, %v1729_v31 }
 0x62d   :  { %v1700_v12 = vpop.permute.xlu1 %1699  ;;  %4206 = vmatmul.mubr.msk.f32.gmra.mrb[48].mxu1 %vm6499_vm2, %v1730_v19 }
 0x62e   :  { %v1698_v60 = vpop.permute.xlu0 %1697  ;;  %v1732_v15 = vsel %vm6488_vm10, %v5783_v2, %v1700_v12 }
 0x62f   :  { %v1731_v55 = vsel %vm6500_vm12, %v5776_v33, %v1698_v60 }
 0x630   :  { %4208 = vmatprep.mubr.msk.f32.mxu1 %vm6501_vm11, %v1731_v55 }
 0x631   :  { %4209 = vmatmul.mubr.msk.f32.gmra.mrb[50].mxu1 %vm6502_vm14, %v1732_v15 }
 0x6e8   :  { %v4189_v5 = vpop.f32.mrb[36].mxu1 }
 0x6e9   :  { %v5894_v1 = vadd.f32 %v4189_v5, %v3538_v3  ;;  %v1868_v45 = vpop.f32.mrb[37].mxu1 }
 0x6ea   :  { %v5896_v14 = vadd.f32 %v3538_v3, %v1868_v45 }
 0x6eb   :  { %1948 = vst.msk [vmem:[#allocation2 + $0x8] sm:$0xff] %vm922_vm3, %v5894_v1 }
 0x6ec   :  { %1947 = vst.msk [vmem:[#allocation2] sm:$0xff] %vm922_vm3, %v5896_v14  ;;  %v4192_v33 = vpop.f32.mrb[38].mxu1 }
 0x6ed   :  { %v5902_v2 = vadd.f32 %v4192_v33, %v3538_v3  ;;  %v1878_v40 = vpop.f32.mrb[39].mxu1 }
 0x6ee   :  { %v5904_v51 = vadd.f32 %v3538_v3, %v1878_v40 }
 0x6ef   :  { %1950 = vst.msk [vmem:[#allocation2 + $0x18] sm:$0xff] %vm922_vm3, %v5902_v2 }
 0x6f0   :  { %1949 = vst.msk [vmem:[#allocation2 + $0x10] sm:$0xff] %vm922_vm3, %v5904_v51  ;;  %v4195_v44 = vpop.f32.mrb[40].mxu1 }
 0x6f1   :  { %v5910_v46 = vadd.f32 %v4195_v44, %v3538_v3  ;;  %v1888_v52 = vpop.f32.mrb[41].mxu1 }
 0x6f2   :  { %v5912_v57 = vadd.f32 %v3538_v3, %v1888_v52 }
 0x6f3   :  { %1952 = vst.msk [vmem:[#allocation2 + $0x28] sm:$0xff] %vm922_vm3, %v5910_v46 }
 0x6f4   :  { %1951 = vst.msk [vmem:[#allocation2 + $0x20] sm:$0xff] %vm922_vm3, %v5912_v57  ;;  %v4198_v62 = vpop.f32.mrb[42].mxu1 }
 0x6f5   :  { %v5918_v18 = vadd.f32 %v4198_v62, %v3538_v3  ;;  %v1898_v8 = vpop.f32.mrb[43].mxu1 }
 0x6f6   :  { %v5920_v63 = vadd.f32 %v3538_v3, %v1898_v8 }
 0x6f7   :  { %1954 = vst.msk [vmem:[#allocation2 + $0x38] sm:$0xff] %vm922_vm3, %v5918_v18 }
 0x6f8   :  { %1953 = vst.msk [vmem:[#allocation2 + $0x30] sm:$0xff] %vm922_vm3, %v5920_v63  ;;  %v4201_v58 = vpop.f32.mrb[44].mxu1 }
 0x6f9   :  { %v5926_v39 = vadd.f32 %v4201_v58, %v3538_v3  ;;  %v1908_v41 = vpop.f32.mrb[45].mxu1 }
 0x6fa   :  { %v5928_v50 = vadd.f32 %v3538_v3, %v1908_v41 }
 0x6fb   :  { %1956 = vst.msk [vmem:[#allocation2 + $0x48] sm:$0xff] %vm922_vm3, %v5926_v39 }
 0x6fc   :  { %1955 = vst.msk [vmem:[#allocation2 + $0x40] sm:$0xff] %vm922_vm3, %v5928_v50  ;;  %v4204_v7 = vpop.f32.mrb[46].mxu1 }
 0x6fd   :  { %v5934_v34 = vadd.f32 %v4204_v7, %v3538_v3  ;;  %v1918_v4 = vpop.f32.mrb[47].mxu1 }
 0x6fe   :  { %v5936_v49 = vadd.f32 %v3538_v3, %v1918_v4 }
 0x6ff   :  { %1958 = vst.msk [vmem:[#allocation2 + $0x58] sm:$0xff] %vm922_vm3, %v5934_v34 }
 0x700   :  { %1957 = vst.msk [vmem:[#allocation2 + $0x50] sm:$0xff] %vm922_vm3, %v5936_v49  ;;  %v4207_v47 = vpop.f32.mrb[48].mxu1 }
 0x701   :  { %v5942_v20 = vadd.f32 %v4207_v47, %v3538_v3  ;;  %v1928_v42 = vpop.f32.mrb[49].mxu1 }
 0x702   :  { %v5944_v10 = vadd.f32 %v3538_v3, %v1928_v42 }
 0x703   :  { %1960 = vst.msk [vmem:[#allocation2 + $0x68] sm:$0xff] %vm922_vm3, %v5942_v20 }
 0x704   :  { %1959 = vst.msk [vmem:[#allocation2 + $0x60] sm:$0xff] %vm922_vm3, %v5944_v10  ;;  %v4210_v61 = vpop.f32.mrb[50].mxu1 }
 0x705   :  { %v5950_v43 = vadd.f32 %v4210_v61, %v3538_v3  ;;  %v1938_v56 = vpop.f32.mrb[51].mxu1 }
 0x706   :  { %v5952_v16 = vadd.f32 %v3538_v3, %v1938_v56 }
 0x707   :  { %1962 = vst.msk [vmem:[#allocation2 + $0x78] sm:$0xff] %vm922_vm3, %v5950_v43 }
 0x708   :  { %1961 = vst.msk [vmem:[#allocation2 + $0x70] sm:$0xff] %vm922_vm3, %v5952_v16 }
 0x709 LB: > { %s5964_s27 = sshll.u32 %s4737_s24, 3  ;;  %s2032_s24 = sadd.s32 1, %s4737_s24   ;;  %s4737_s24 = sphi %s5958_s24, %s2032_s24  }
 0x70a   : > { %s2034_s28 = sld [smem:[#allocation7 + %s5964_s27]]  ;;  %s2042_s3 = sadd.s32 1, %s5964_s27 }
 0x70b   : > { %s2050_s29 = sadd.s32 2, %s5964_s27  ;;  %s5969_s2 = sld [smem:[#allocation7 + %s2042_s3]] }
 0x70c   : > { %s5971_s4 = sld [smem:[#allocation7 + %s2050_s29]]  ;;  %s2058_s30 = sadd.s32 3, %s5964_s27 }
 0x70d   : > { %s2066_s13 = sadd.s32 4, %s5964_s27  ;;  %s2059_s14 = sld [smem:[#allocation7 + %s2058_s30]] }
 0x70e   : > { %s5975_s15 = sld [smem:[#allocation7 + %s2066_s13]]  ;;  %s5978_s16 = scalar_lea.vmem [#allocation2], %s5964_s27 }
 0x70f   : > { %v2038_v59 = vld [vmem:[%s5978_s16] sm:$0x1]  ;;  %s2074_s17 = sadd.s32 5, %s5964_s27  ;;  %s2082_s18 = sadd.s32 6, %s5964_s27  ;;  %v3557_v48 = vld [vmem:[%s5978_s16 + $0x1] sm:$0x1] }
 0x710   : > { %s5984_s19 = sld [smem:[#allocation7 + %s2074_s17]]  ;;  %s2035_s20 = scalar_lea.vmem [#allocation3], %s2034_s28  ;;  %v3559_v13 = vld [vmem:[%s5978_s16 + $0x2] sm:$0x1]  ;;  %v3561_v19 = vld [vmem:[%s5978_s16 + $0x3] sm:$0x1] }
 0x711   : > { %v2036_v0 = vld [vmem:[%s2035_s20] sm:$0x1]  ;;  %s5987_s22 = sld [smem:[#allocation7 + %s2082_s18]]  ;;  %s2090_s1 = sadd.s32 7, %s5964_s27  ;;  %v3563_v3 = vld [vmem:[%s5978_s16 + $0x4] sm:$0x1] }
 0x712   : > { %v2039_v17 = vmax.f32 %v2036_v0, %v2038_v59  ;;  %s2044_s23 = scalar_lea.vmem [#allocation4], %s5969_s2  ;;  %s2052_s0 = scalar_lea.vmem [#allocation5], %s5971_s4  ;;  %v3565_v45 = vld [vmem:[%s5978_s16 + $0x5] sm:$0x1]  ;;  %v3567_v33 = vld [vmem:[%s5978_s16 + $0x6] sm:$0x1] }
 0x713   : > { %v2045_v54 = vld [vmem:[%s2044_s23] sm:$0x1]  ;;  %s2091_s25 = sld [smem:[#allocation7 + %s2090_s1]]  ;;  %s2060_s26 = scalar_lea.vmem [#allocation6], %s2059_s14  ;;  %v3569_v62 = vld [vmem:[%s5978_s16 + $0x7] sm:$0x1] }
 0x714   : > { %v2053_v31 = vld [vmem:[%s2052_s0] sm:$0x1]  ;;  %2041 = vst.msk [vmem:[%s2035_s20] sm:$0x1] %vm1016_vm0, %v2039_v17  ;;  %v2048_v12 = vmax.f32 %v2045_v54, %v3557_v48  ;;  %s2068_s27 = scalar_lea.vmem [#allocation3], %s5975_s15  ;;  %p2029_p6 = scmp.ge.s32.totalorder %s2032_s24, 16  }
 0x715   : > { %v2056_v60 = vmax.f32 %v2053_v31, %v3559_v13  ;;  %v2061_v55 = vld [vmem:[%s2060_s26] sm:$0x1]  ;;  %4243 = vmatprep.mubr.msk.f32.mxu0 (%p2029_p6), %vm118_vm4, %v6460_v53  ;;  %vm6505_vm15 = vcmp.eq.s32.totalorder (%p2029_p6), %v5143_v22, %v5167_v26  ;;  %vm6506_vm13 = vcmp.eq.s32.totalorder (%p2029_p6), %v5143_v22, %v5181_v29  ;;  %vm6507_vm1 = vcmp.eq.s32.totalorder (%p2029_p6), %v5143_v22, %v5175_v28 }
 0x716   : > { %2049 = vst.msk [vmem:[%s2044_s23] sm:$0x1] %vm1016_vm0, %v2048_v12  ;;  %v2064_v15 = vmax.f32 %v2061_v55, %v3561_v19  ;;  %s2076_s28 = scalar_lea.vmem [#allocation4], %s5984_s19  ;;  %vm6508_vm2 = vcmp.eq.s32.totalorder (%p2029_p6), %v5143_v22, %v5189_v32  ;;  %vm6509_vm12 = vcmp.eq.s32.totalorder (%p2029_p6), %v5143_v22, %v5183_v30  ;;  %vm6510_vm10 = vcmp.eq.s32.totalorder (%p2029_p6), %v5143_v22, %v5197_v36  ;;  %v3642_v6 = vld [vmem:[%s6447_s10] ss:$0 sm:$0xff] (%p2029_p6)  ;;  %s4749_s10 = smov (%p2029_p6), [#allocation10]  }
 0x717   : > { %2057 = vst.msk [vmem:[%s2052_s0] sm:$0x1] %vm1016_vm0, %v2056_v60  ;;  %s2084_s3 = scalar_lea.vmem [#allocation5], %s5987_s22  ;;  %vm6511_vm11 = vcmp.eq.s32.totalorder (%p2029_p6), %v5143_v22, %v5191_v35  ;;  %vm6512_vm14 = vcmp.eq.s32.totalorder (%p2029_p6), %v5143_v22, %v5201_v37  ;;  %s3316_s2 = sshll.u32 (%p2029_p6), %s4749_s10, 4  ;;  %s3317_s2 = int_to_ptr.vmem [resolvable:$true] %s3316_s2 }
 0x718   : > { %2065 = vst.msk [vmem:[%s2060_s26] sm:$0x1] %vm1016_vm0, %v2064_v15  ;;  %s4697_s4 = scalar_lea.vmem (%p2029_p6), %s3317_s2, 512  ;;  %p4702_p8 = scmp.lt.s32.totalorder (%p2029_p6), %s3317_s2, %s3317_s2 }
 0x719   : > { %s2092_s29 = scalar_lea.vmem [#allocation6], %s2091_s25  ;;  %p4698_p7 = scmp.ne.s32.totalorder (%p2029_p6), %s3317_s2, %s4697_s4 }
 0x71a   :  { %p4703_p9 = scmp.lt.s32.totalorder (%p2029_p6), %s4697_s4, %s4697_s4 }
 0x71b   : > { %v2069_v5 = vld [vmem:[%s2068_s27] sm:$0x1] }
 0x71c   : > { %v2072_v40 = vmax.f32 %v2069_v5, %v3563_v3  ;;  %2031 = sbr.rel (!%p2029_p6) target bundleno = 1801 (0x709), region = 133  ;;  %p4704_p10 = por (%p2029_p6), %p4703_p9, %p4702_p8 }
 0x71d   : > { %v2077_v44 = vld [vmem:[%s2076_s28] sm:$0x1] }
 0x71e   : > { %v2085_v52 = vld [vmem:[%s2084_s3] sm:$0x1]  ;;  %2073 = vst.msk [vmem:[%s2068_s27] sm:$0x1] %vm1016_vm0, %v2072_v40  ;;  %v2080_v8 = vmax.f32 %v2077_v44, %v3565_v45  ;;  %p4705_p11 = pnand (%p2029_p6), %p4704_p10, %p4698_p7 }
 0x71f   : > { %v2088_v58 = vmax.f32 %v2085_v52, %v3567_v33  ;;  %v2093_v41 = vld [vmem:[%s2092_s29] sm:$0x1] }
 0x720   : > { %2081 = vst.msk [vmem:[%s2076_s28] sm:$0x1] %vm1016_vm0, %v2080_v8  ;;  %v2096_v7 = vmax.f32 %v2093_v41, %v3569_v62 }
 0x721   : > { %2089 = vst.msk [vmem:[%s2084_s3] sm:$0x1] %vm1016_vm0, %v2088_v58 }
 0x722   : > { %2097 = vst.msk [vmem:[%s2092_s29] sm:$0x1] %vm1016_vm0, %v2096_v7  ;;  %vm6504_vm0 = vcmp.eq.s32.totalorder (%p2029_p6), %v5143_v22, %v5173_v27 }
 0x725   :  { %v2098_v4 = vld [vmem:[#allocation3] sm:$0xff]  ;;  %v2099_v47 = vld [vmem:[#allocation3 + $0x8] sm:$0xff]  ;;  %v2100_v54 = vld [vmem:[#allocation3 + $0x10] sm:$0xff] }
 0x726   :  { %v2101_v19 = vld [vmem:[#allocation3 + $0x18] sm:$0xff]  ;;  %v2102_v52 = vld [vmem:[#allocation3 + $0x20] sm:$0xff]  ;;  %v2103_v62 = vld [vmem:[#allocation3 + $0x28] sm:$0xff] }
 0x727   :  { %v2114_v42 = vld [vmem:[#allocation4] sm:$0xff]  ;;  %v2115_v61 = vld [vmem:[#allocation4 + $0x8] sm:$0xff]  ;;  %v2116_v12 = vld [vmem:[#allocation4 + $0x10] sm:$0xff] }
 0x728   :  { %v2130_v56 = vmax.f32 %v2098_v4, %v2114_v42  ;;  %v2146_v59 = vld [vmem:[#allocation5] sm:$0xff]  ;;  %v2147_v48 = vld [vmem:[#allocation5 + $0x8] sm:$0xff]  ;;  %v2131_v0 = vmax.f32 %v2099_v47, %v2115_v61  ;;  %v2117_v60 = vld [vmem:[#allocation4 + $0x18] sm:$0xff]  ;;  %v2132_v15 = vmax.f32 %v2100_v54, %v2116_v12 }
 0x729   :  { %v2178_v13 = vld [vmem:[#allocation6] sm:$0xff]  ;;  %v2179_v17 = vld [vmem:[#allocation6 + $0x8] sm:$0xff]  ;;  %v2133_v3 = vmax.f32 %v2101_v19, %v2117_v60  ;;  %v2148_v5 = vld [vmem:[#allocation5 + $0x10] sm:$0xff] }
 0x72a   :  { %v2162_v31 = vmax.f32 %v2130_v56, %v2146_v59  ;;  %v2163_v55 = vmax.f32 %v2131_v0, %v2147_v48  ;;  %v2149_v45 = vld [vmem:[#allocation5 + $0x18] sm:$0xff]  ;;  %v2180_v33 = vld [vmem:[#allocation6 + $0x10] sm:$0xff]  ;;  %v2164_v58 = vmax.f32 %v2132_v15, %v2148_v5  ;;  %v2118_v7 = vld [vmem:[#allocation4 + $0x20] sm:$0xff] }
 0x72b   :  { %v2181_v44 = vld [vmem:[#allocation6 + $0x18] sm:$0xff]  ;;  %v2165_v41 = vmax.f32 %v2133_v3, %v2149_v45  ;;  %v2119_v4 = vld [vmem:[#allocation4 + $0x28] sm:$0xff]  ;;  %v2150_v47 = vld [vmem:[#allocation5 + $0x20] sm:$0xff]  ;;  %v2134_v42 = vmax.f32 %v2102_v52, %v2118_v7 }
 0x72c   :  { %v2194_v40 = vmax.f32 %v2162_v31, %v2178_v13  ;;  %v2195_v8 = vmax.f32 %v2163_v55, %v2179_v17  ;;  %v2135_v61 = vmax.f32 %v2103_v62, %v2119_v4  ;;  %v2151_v56 = vld [vmem:[#allocation5 + $0x28] sm:$0xff]  ;;  %v2182_v59 = vld [vmem:[#allocation6 + $0x20] sm:$0xff]  ;;  %v2196_v54 = vmax.f32 %v2164_v58, %v2180_v33  ;;  %v2104_v12 = vld [vmem:[#allocation3 + $0x30] sm:$0xff] }
 0x72d   :  { %v2183_v48 = vld [vmem:[#allocation6 + $0x28] sm:$0xff]  ;;  %v2197_v19 = vmax.f32 %v2165_v41, %v2181_v44  ;;  %v2105_v60 = vld [vmem:[#allocation3 + $0x38] sm:$0xff]  ;;  %v2120_v13 = vld [vmem:[#allocation4 + $0x30] sm:$0xff]  ;;  %v2166_v31 = vmax.f32 %v2134_v42, %v2150_v47 }
 0x72e   :  { %v4546_v0 = vpack.c.bf16 %v2195_v8, %v2194_v40  ;;  %v2167_v21 = vmax.f32 %v2135_v61, %v2151_v56  ;;  %v2121_v53 = vld [vmem:[#allocation4 + $0x38] sm:$0xff]  ;;  %v2136_v17 = vmax.f32 %v2104_v12, %v2120_v13  ;;  %v2152_v55 = vld [vmem:[#allocation5 + $0x30] sm:$0xff]  ;;  %v2106_v62 = vld [vmem:[#allocation3 + $0x40] sm:$0xff] }
 0x72f   :  { %v2153_v15 = vld [vmem:[#allocation5 + $0x38] sm:$0xff]  ;;  %v4550_v3 = vpack.c.bf16 %v2197_v19, %v2196_v54  ;;  %v2137_v5 = vmax.f32 %v2105_v60, %v2121_v53  ;;  %v2184_v45 = vld [vmem:[#allocation6 + $0x30] sm:$0xff]  ;;  %v2198_v7 = vmax.f32 %v2166_v31, %v2182_v59  ;;  %v2107_v44 = vld [vmem:[#allocation3 + $0x48] sm:$0xff] }
 0x730   :  { %4547 = vmatprep.subr.bf16.mxu0 %v4546_v0  ;;  %v2185_v52 = vld [vmem:[#allocation6 + $0x38] sm:$0xff]  ;;  %v2199_v40 = vmax.f32 %v2167_v21, %v2183_v48  ;;  %v2168_v33 = vmax.f32 %v2136_v17, %v2152_v55  ;;  %v2122_v8 = vld [vmem:[#allocation4 + $0x40] sm:$0xff]  ;;  %v2123_v58 = vld [vmem:[#allocation4 + $0x48] sm:$0xff] }
 0x731   :  { %4549 = vmatpush3.bf16.msra.mxu0 %v4546_v0  ;;  %v2169_v41 = vmax.f32 %v2137_v5, %v2153_v15  ;;  %v2138_v4 = vmax.f32 %v2106_v62, %v2122_v8  ;;  %v2139_v47 = vmax.f32 %v2107_v44, %v2123_v58  ;;  %v2154_v42 = vld [vmem:[#allocation5 + $0x40] sm:$0xff]  ;;  %v2155_v61 = vld [vmem:[#allocation5 + $0x48] sm:$0xff]  ;;  %v2108_v19 = vld [vmem:[#allocation3 + $0x50] sm:$0xff] }
 0x732   :  { %4551 = vmatprep.subr.bf16.mxu0 %v4550_v3  ;;  %v2186_v56 = vld [vmem:[#allocation6 + $0x40] sm:$0xff]  ;;  %v4554_v12 = vpack.c.bf16 %v2199_v40, %v2198_v7  ;;  %v2200_v54 = vmax.f32 %v2168_v33, %v2184_v45  ;;  %v2187_v53 = vld [vmem:[#allocation6 + $0x48] sm:$0xff]  ;;  %v2109_v60 = vld [vmem:[#allocation3 + $0x58] sm:$0xff] }
 0x733   :  { %v2201_v13 = vmax.f32 %v2169_v41, %v2185_v52  ;;  %v2170_v0 = vmax.f32 %v2138_v4, %v2154_v42  ;;  %v2171_v59 = vmax.f32 %v2139_v47, %v2155_v61  ;;  %v2124_v21 = vld [vmem:[#allocation4 + $0x50] sm:$0xff]  ;;  %v2125_v48 = vld [vmem:[#allocation4 + $0x58] sm:$0xff]  ;;  %v2110_v45 = vld [vmem:[#allocation3 + $0x60] sm:$0xff] }
 0x734   :  { %v2156_v31 = vld [vmem:[#allocation5 + $0x50] sm:$0xff]  ;;  %v2140_v17 = vmax.f32 %v2108_v19, %v2124_v21  ;;  %v2141_v55 = vmax.f32 %v2109_v60, %v2125_v48  ;;  %v2157_v15 = vld [vmem:[#allocation5 + $0x58] sm:$0xff]  ;;  %v2111_v40 = vld [vmem:[#allocation3 + $0x68] sm:$0xff] }
 0x735   :  { %4553 = vmatpush3.bf16.msra.mxu0 %v4550_v3  ;;  %v2188_v5 = vld [vmem:[#allocation6 + $0x50] sm:$0xff]  ;;  %v2189_v62 = vld [vmem:[#allocation6 + $0x58] sm:$0xff]  ;;  %v4558_v44 = vpack.c.bf16 %v2201_v13, %v2200_v54  ;;  %v2202_v8 = vmax.f32 %v2170_v0, %v2186_v56  ;;  %v2203_v7 = vmax.f32 %v2171_v59, %v2187_v53  ;;  %v2126_v33 = vld [vmem:[#allocation4 + $0x60] sm:$0xff] }
 0x736   :  { %4555 = vmatprep.subr.bf16.mxu0 %v4554_v12  ;;  %v2172_v58 = vmax.f32 %v2140_v17, %v2156_v31  ;;  %v2173_v52 = vmax.f32 %v2141_v55, %v2157_v15  ;;  %v2127_v41 = vld [vmem:[#allocation4 + $0x68] sm:$0xff]  ;;  %v2142_v4 = vmax.f32 %v2110_v45, %v2126_v33  ;;  %v2158_v47 = vld [vmem:[#allocation5 + $0x60] sm:$0xff]  ;;  %v2112_v3 = vld [vmem:[#allocation3 + $0x70] sm:$0xff] }
 0x737   :  { %v2159_v42 = vld [vmem:[#allocation5 + $0x68] sm:$0xff]  ;;  %v2143_v61 = vmax.f32 %v2111_v40, %v2127_v41  ;;  %v4562_v19 = vpack.c.bf16 %v2203_v7, %v2202_v8  ;;  %v2113_v48 = vld [vmem:[#allocation3 + $0x78] sm:$0xff]  ;;  %v2128_v23 = vld [vmem:[#allocation4 + $0x70] sm:$0xff] }
 0x738   :  { %v2204_v60 = vmax.f32 %v2172_v58, %v2188_v5  ;;  %v2205_v21 = vmax.f32 %v2173_v52, %v2189_v62  ;;  %v2129_v54 = vld [vmem:[#allocation4 + $0x78] sm:$0xff]  ;;  %v2174_v56 = vmax.f32 %v2142_v4, %v2158_v47  ;;  %v2190_v13 = vld [vmem:[#allocation6 + $0x60] sm:$0xff]  ;;  %v2144_v0 = vmax.f32 %v2112_v3, %v2128_v23  ;;  %v2191_v31 = vld [vmem:[#allocation6 + $0x68] sm:$0xff] }
 0x739   :  { %4557 = vmatpush3.bf16.msra.mxu0 %v4554_v12  ;;  %v2175_v53 = vmax.f32 %v2143_v61, %v2159_v42  ;;  %v2145_v59 = vmax.f32 %v2113_v48, %v2129_v54  ;;  %v2160_v17 = vld [vmem:[#allocation5 + $0x70] sm:$0xff]  ;;  %v2161_v55 = vld [vmem:[#allocation5 + $0x78] sm:$0xff]  ;;  %v3586_v52 = vld [vmem:[%s6442_s5 + $0x80] sm:$0xff] }
 0x73a   :  { %4559 = vmatprep.subr.bf16.mxu0 %v4558_v44  ;;  %v4566_v15 = vpack.c.bf16 %v2205_v21, %v2204_v60  ;;  %v2206_v45 = vmax.f32 %v2174_v56, %v2190_v13  ;;  %v2176_v8 = vmax.f32 %v2144_v0, %v2160_v17  ;;  %v2192_v62 = vld [vmem:[#allocation6 + $0x70] sm:$0xff]  ;;  %v2193_v7 = vld [vmem:[#allocation6 + $0x78] sm:$0xff]  ;;  %v3587_v41 = vld [vmem:[%s6442_s5 + $0x88] sm:$0xff] }
 0x73b   :  { %v2207_v12 = vmax.f32 %v2175_v53, %v2191_v31  ;;  %v2177_v5 = vmax.f32 %v2145_v59, %v2161_v55  ;;  %v3588_v4 = vld [vmem:[%s6442_s5 + $0x90] sm:$0xff]  ;;  %v4578_v47 = vpack.c.bf16 %v3587_v41, %v3586_v52  ;;  %v3589_v42 = vld [vmem:[%s6442_s5 + $0x98] sm:$0xff]  ;;  %v3590_v3 = vld [vmem:[%s6442_s5 + $0xa0] sm:$0xff] }
 0x73c   :  { %v2208_v33 = vmax.f32 %v2176_v8, %v2192_v62  ;;  %v4582_v61 = vpack.c.bf16 %v3589_v42, %v3588_v4  ;;  %v3592_v21 = vld [vmem:[%s6442_s5 + $0xb0] sm:$0xff]  ;;  %v3593_v48 = vld [vmem:[%s6442_s5 + $0xb8] sm:$0xff] }
 0x73d   :  { %4561 = vmatpush3.bf16.msra.mxu0 %v4558_v44  ;;  %v4570_v40 = vpack.c.bf16 %v2207_v12, %v2206_v45  ;;  %v2209_v58 = vmax.f32 %v2177_v5, %v2193_v7  ;;  %v6503_v44 = vmov 1.0   ;;  %4579 = vmatprep.subr.bf16.mxu1 %v4578_v47  ;;  %v4590_v54 = vpack.c.bf16 %v3593_v48, %v3592_v21 }
 0x73e   :  { %4563 = vmatprep.subr.bf16.mxu0 %v4562_v19  ;;  %4581 = vmatpush3.bf16.msra.mxu1 %v4578_v47 }
 0x73f   :  { %v4574_v23 = vpack.c.bf16 %v2209_v58, %v2208_v33  ;;  %4583 = vmatprep.subr.bf16.mxu1 %v4582_v61 }
 0x741   :  { %4565 = vmatpush3.bf16.msra.mxu0 %v4562_v19  ;;  %v3591_v19 = vld [vmem:[%s6442_s5 + $0xa8] sm:$0xff] }
 0x742   :  { %4567 = vmatprep.subr.bf16.mxu0 %v4566_v15  ;;  %v4586_v60 = vpack.c.bf16 %v3591_v19, %v3590_v3  ;;  %4585 = vmatpush3.bf16.msra.mxu1 %v4582_v61 }
 0x744   :  { %4587 = vmatprep.subr.bf16.mxu1 %v4586_v60 }
 0x745   :  { %4569 = vmatpush3.bf16.msra.mxu0 %v4566_v15 }
 0x746   :  { %4571 = vmatprep.subr.bf16.mxu0 %v4570_v40  ;;  %4589 = vmatpush3.bf16.msra.mxu1 %v4586_v60 }
 0x747   :  { %4591 = vmatprep.subr.bf16.mxu1 %v4590_v54 }
 0x749   :  { %4573 = vmatpush3.bf16.msra.mxu0 %v4570_v40 }
 0x74a   :  { %4575 = vmatprep.subr.bf16.mxu0 %v4574_v23  ;;  %4593 = vmatpush3.bf16.msra.mxu1 %v4590_v54 }
 0x74d   :  { %4577 = vmatpush3.bf16.msra.mxu0 %v4574_v23 }
 0x750   :  { %4244 = vmatmul.mubr.msk.f32.vlgmr.msra.gmra.mrb[44].mxu0 %vm119_vm5, %v6503_v44 }
 0x751   :  { %4246 = vmatprep.mubr.msk.f32.mxu0 %vm120_vm7, %v6503_v44 }
 0x754   :  { %4247 = vmatmul.mubr.msk.f32.gmra.mrb[46].mxu0 %vm121_vm6, %v6503_v44 }
 0x755   :  { %4249 = vmatprep.mubr.msk.f32.mxu0 %vm122_vm9, %v6503_v44 }
 0x758   :  { %4250 = vmatmul.mubr.msk.f32.gmra.mrb[48].mxu0 %vm123_vm8, %v6503_v44 }
 0x759   :  { %4252 = vmatprep.mubr.msk.f32.mxu0 %vm6504_vm0, %v6503_v44  ;;  %vm6513_vm0 = vcmp.eq.s32.totalorder %v5143_v22, %v5203_v38 }
 0x75c   :  { %4253 = vmatmul.mubr.msk.f32.gmra.mrb[50].mxu0 %vm6505_vm15, %v6503_v44  ;;  %vm6514_vm15 = vcmask 523264  }
 0x75d   :  { %4255 = vmatprep.mubr.msk.f32.mxu0 %vm6506_vm13, %v6503_v44  ;;  %vm6515_vm13 = vmmov %vm6514_vm15 }
 0x760   :  { %4256 = vmatmul.mubr.msk.f32.gmra.mrb[52].mxu0 %vm6507_vm1, %v6503_v44  ;;  %vm6516_vm1 = vmmov %vm6515_vm13 }
 0x761   :  { %4258 = vmatprep.mubr.msk.f32.mxu0 %vm6508_vm2, %v6503_v44  ;;  %vm6517_vm2 = vmmov %vm6516_vm1 }
 0x764   :  { %4259 = vmatmul.mubr.msk.f32.gmra.mrb[54].mxu0 %vm6509_vm12, %v6503_v44  ;;  %vm6518_vm12 = vmmov %vm6516_vm1 }
 0x765   :  { %4261 = vmatprep.mubr.msk.f32.mxu0 %vm6510_vm10, %v6503_v44  ;;  %vm6519_vm10 = vmmov %vm6516_vm1 }
 0x768   :  { %4262 = vmatmul.mubr.msk.f32.gmra.mrb[56].mxu0 %vm6511_vm11, %v6503_v44  ;;  %vm6520_vm11 = vmmov %vm6516_vm1 }
 0x769   :  { %4264 = vmatprep.mubr.msk.f32.mxu0 %vm6512_vm14, %v6503_v44  ;;  %vm6521_vm14 = vmmov %vm6516_vm1 }
 0x76c   :  { %4265 = vmatmul.mubr.msk.f32.gmra.mrb[58].mxu0 %vm6513_vm0, %v6503_v44  ;;  %vm6522_vm0 = vmmov %vm6516_vm1 }
 0x823   :  { %v4245_v56 = vpop.f32.mrb[44].mxu0 }
 0x824   :  { %v2276_v53 = vpop.f32.mrb[45].mxu0 }
 0x825   :  { %2371 = vrot.lane.b32.xlu0 %v2276_v53, %s4744_s21 }
 0x827   :  { %v4248_v13 = vpop.f32.mrb[46].mxu0 }
 0x828   :  { %v2286_v0 = vpop.f32.mrb[47].mxu0 }
 0x829   :  { %2373 = vrot.lane.b32.xlu0 %v4245_v56, %s4744_s21  ;;  %2375 = vrot.lane.b32.xlu1 %v2286_v0, %s4744_s21 }
 0x82b   :  { %v4251_v59 = vpop.f32.mrb[48].mxu0 }
 0x82c   :  { %v2296_v31 = vpop.f32.mrb[49].mxu0 }
 0x82d   :  { %2377 = vrot.lane.b32.xlu1 %v4248_v13, %s4744_s21  ;;  %2379 = vrot.lane.b32.xlu0 %v2296_v31, %s4744_s21 }
 0x82f   :  { %v4254_v17 = vpop.f32.mrb[50].mxu0 }
 0x830   :  { %v2306_v55 = vpop.f32.mrb[51].mxu0 }
 0x831   :  { %2381 = vrot.lane.b32.xlu1 %v4251_v59, %s4744_s21  ;;  %2383 = vrot.lane.b32.xlu0 %v2306_v55, %s4744_s21 }
 0x833   :  { %v4257_v15 = vpop.f32.mrb[52].mxu0 }
 0x834   :  { %v2316_v45 = vpop.f32.mrb[53].mxu0 }
 0x835   :  { %2385 = vrot.lane.b32.xlu1 %v4254_v17, %s4744_s21  ;;  %2387 = vrot.lane.b32.xlu0 %v2316_v45, %s4744_s21 }
 0x837   :  { %v4260_v12 = vpop.f32.mrb[54].mxu0 }
 0x838   :  { %v2326_v8 = vpop.f32.mrb[55].mxu0 }
 0x839   :  { %2389 = vrot.lane.b32.xlu1 %v4257_v15, %s4744_s21  ;;  %2391 = vrot.lane.b32.xlu0 %v2326_v8, %s4744_s21 }
 0x83b   :  { %v4263_v5 = vpop.f32.mrb[56].mxu0 }
 0x83c   :  { %v2336_v62 = vpop.f32.mrb[57].mxu0 }
 0x83d   :  { %2393 = vrot.lane.b32.xlu1 %v4260_v12, %s4744_s21  ;;  %2395 = vrot.lane.b32.xlu0 %v2336_v62, %s4744_s21 }
 0x83f   :  { %v4266_v7 = vpop.f32.mrb[58].mxu0 }
 0x840   :  { %v2346_v40 = vpop.f32.mrb[59].mxu0 }
 0x841   :  { %2397 = vrot.lane.b32.xlu1 %v4263_v5, %s4744_s21  ;;  %2399 = vrot.lane.b32.xlu0 %v2346_v40, %s4744_s21 }
 0x845   :  { %2401 = vrot.lane.b32.xlu1 %v4266_v7, %s4744_s21 }
 0x897   :  { %v2372_v33 = vpop.permute.xlu0 %2371 }
 0x898   :  { %v6117_v58 = vsel %vm922_vm3, %v5896_v14, %v2372_v33 }
 0x899   :  { %v2435_v23 = vmax.f32 %v6117_v58, 0.0 }
 0x89b   :  { %4283 = vmatprep.mubr.msk.f32.mxu1 %vm6514_vm15, %v2435_v23  ;;  %v2374_v44 = vpop.permute.xlu0 %2373  ;;  %v2376_v52 = vpop.permute.xlu1 %2375  ;;  %vm6523_vm15 = vmmov %vm6522_vm0 }
 0x89c   :  { %v6123_v41 = vsel %vm922_vm3, %v5894_v1, %v2374_v44  ;;  %v6127_v4 = vsel %vm922_vm3, %v5904_v51, %v2376_v52  ;;  %v3613_v44 = vld [vmem:[%s6444_s7 + $0xc8] sm:$0xff]  ;;  %v3614_v52 = vld [vmem:[%s6444_s7 + $0xd0] sm:$0xff] }
 0x89d   :  { %v2436_v47 = vmax.f32 %v6123_v41, 0.0  ;;  %v2437_v42 = vmax.f32 %v6127_v4, 0.0 }
 0x89f   :  { %4284 = vmatmul.mubr.msk.f32.vlgmr.msra.gmra.mrb[52].mxu1 %vm6515_vm13, %v2436_v47  ;;  %v2378_v14 = vpop.permute.xlu1 %2377  ;;  %v2380_v61 = vpop.permute.xlu0 %2379  ;;  %vm6524_vm13 = vmmov %vm6522_vm0  ;;  %v3615_v47 = vld [vmem:[%s6444_s7 + $0xd8] sm:$0xff] }
 0x8a0   :  { %v6134_v3 = vsel %vm922_vm3, %v5902_v2, %v2378_v14  ;;  %4286 = vmatprep.mubr.msk.f32.mxu1 %vm6516_vm1, %v2437_v42  ;;  %v6139_v1 = vsel %vm922_vm3, %v5912_v57, %v2380_v61  ;;  %vm6525_vm1 = vmmov %vm6522_vm0  ;;  %v4598_v42 = vpack.c.bf16 %v3615_v47, %v3614_v52  ;;  %v3616_v14 = vld [vmem:[%s6444_s7 + $0xe0] sm:$0xff]  ;;  %v3617_v61 = vld [vmem:[%s6444_s7 + $0xe8] sm:$0xff] }
 0x8a1   :  { %v2438_v51 = vmax.f32 %v6134_v3, 0.0  ;;  %v2439_v19 = vmax.f32 %v6139_v1, 0.0 }
 0x8a3   :  { %4287 = vmatmul.mubr.msk.f32.gmra.mrb[54].mxu1 %vm6517_vm2, %v2438_v51  ;;  %v2382_v60 = vpop.permute.xlu1 %2381  ;;  %v2384_v21 = vpop.permute.xlu0 %2383  ;;  %vm6526_vm2 = vmmov %vm6522_vm0  ;;  %v4602_v51 = vpack.c.bf16 %v3617_v61, %v3616_v14 }
 0x8a4   :  { %v6146_v48 = vsel %vm922_vm3, %v5910_v46, %v2382_v60  ;;  %4289 = vmatprep.mubr.msk.f32.mxu1 %vm6518_vm12, %v2439_v19  ;;  %v6151_v2 = vsel %vm922_vm3, %v5920_v63, %v2384_v21  ;;  %vm6527_vm12 = vmmov %vm6522_vm0  ;;  %v3618_v19 = vld [vmem:[%s6444_s7 + $0xf0] sm:$0xff]  ;;  %v3619_v60 = vld [vmem:[%s6444_s7 + $0xf8] sm:$0xff] }
 0x8a5   :  { %v2440_v57 = vmax.f32 %v6146_v48, 0.0  ;;  %v2441_v54 = vmax.f32 %v6151_v2, 0.0  ;;  %v4606_v21 = vpack.c.bf16 %v3619_v60, %v3618_v19 }
 0x8a7   :  { %4290 = vmatmul.mubr.msk.f32.gmra.mrb[56].mxu1 %vm6519_vm10, %v2440_v57  ;;  %v2386_v56 = vpop.permute.xlu1 %2385  ;;  %v2388_v53 = vpop.permute.xlu0 %2387  ;;  %vm6528_vm10 = vmmov %vm6522_vm0  ;;  %v3620_v57 = vld [vmem:[%s6444_s7 + $0x100] sm:$0xff] }
 0x8a8   :  { %v6158_v13 = vsel %vm922_vm3, %v5918_v18, %v2386_v56  ;;  %4292 = vmatprep.mubr.msk.f32.mxu1 %vm6520_vm11, %v2441_v54  ;;  %v6163_v46 = vsel %vm922_vm3, %v5928_v50, %v2388_v53  ;;  %vm6529_vm11 = vmmov %vm6522_vm0  ;;  %v3621_v54 = vld [vmem:[%s6444_s7 + $0x108] sm:$0xff]  ;;  %v3622_v53 = vld [vmem:[%s6444_s7 + $0x110] sm:$0xff] }
 0x8a9   :  { %v2442_v63 = vmax.f32 %v6158_v13, 0.0  ;;  %v2443_v0 = vmax.f32 %v6163_v46, 0.0  ;;  %v4610_v56 = vpack.c.bf16 %v3621_v54, %v3620_v57 }
 0x8ab   :  { %4293 = vmatmul.mubr.msk.f32.gmra.mrb[58].mxu1 %vm6521_vm14, %v2442_v63  ;;  %v2390_v59 = vpop.permute.xlu1 %2389  ;;  %v2392_v31 = vpop.permute.xlu0 %2391  ;;  %v3623_v63 = vld [vmem:[%s6444_s7 + $0x118] sm:$0xff]  ;;  %vm6530_vm14 = vmmov %vm6522_vm0 }
 0x8ac   :  { %v6170_v17 = vsel %vm922_vm3, %v5926_v39, %v2390_v59  ;;  %4295 = vmatprep.mubr.msk.f32.mxu1 %vm6522_vm0, %v2443_v0  ;;  %v6175_v18 = vsel %vm922_vm3, %v5936_v49, %v2392_v31  ;;  %v4614_v0 = vpack.c.bf16 %v3623_v63, %v3622_v53  ;;  %v6250_v59 = vld [vmem:[%s6443_s6 + $0x2] ss:$0 sm:$0xff] }
 0x8ad   :  { %v2444_v50 = vmax.f32 %v6170_v17, 0.0  ;;  %v2445_v55 = vmax.f32 %v6175_v18, 0.0 }
 0x8af   :  { %4296 = vmatmul.mubr.msk.f32.gmra.mrb[60].mxu1 %vm6523_vm15, %v2444_v50  ;;  %v2394_v15 = vpop.permute.xlu1 %2393  ;;  %v2396_v45 = vpop.permute.xlu0 %2395  ;;  %vm6531_vm15 = vcmask 785408  }
 0x8b0   :  { %v6182_v12 = vsel %vm922_vm3, %v5934_v34, %v2394_v15  ;;  %4298 = vmatprep.mubr.msk.f32.mxu1 %vm6524_vm13, %v2445_v55  ;;  %v6187_v39 = vsel %vm922_vm3, %v5944_v10, %v2396_v45  ;;  %vm6532_vm13 = vmmov %vm6531_vm15 }
 0x8b1   :  { %v2446_v49 = vmax.f32 %v6182_v12, 0.0  ;;  %v2447_v8 = vmax.f32 %v6187_v39, 0.0 }
 0x8b3   :  { %4299 = vmatmul.mubr.msk.f32.gmra.mrb[62].mxu1 %vm6525_vm1, %v2446_v49  ;;  %v2398_v5 = vpop.permute.xlu1 %2397  ;;  %v2400_v62 = vpop.permute.xlu0 %2399  ;;  %vm6533_vm1 = vmmov %vm6522_vm0 }
 0x8b4   :  { %v6194_v7 = vsel %vm922_vm3, %v5942_v20, %v2398_v5  ;;  %4301 = vmatprep.mubr.msk.f32.mxu1 %vm6526_vm2, %v2447_v8  ;;  %v6199_v34 = vsel %vm922_vm3, %v5952_v16, %v2400_v62  ;;  %v3612_v16 = vld [vmem:[%s6444_s7 + $0xc0] sm:$0xff]  ;;  %vm6534_vm2 = vmmov %vm6522_vm0 }
 0x8b5   :  { %v2448_v10 = vmax.f32 %v6194_v7, 0.0  ;;  %v2449_v40 = vmax.f32 %v6199_v34, 0.0 }
 0x8b7   :  { %4302 = vmatmul.mubr.msk.f32.gmra.mrb[64].mxu1 %vm6527_vm12, %v2448_v10  ;;  %v2402_v33 = vpop.permute.xlu1 %2401  ;;  %vm6535_vm12 = vmmov %vm6532_vm13 }
 0x8b8   :  { %v6206_v23 = vsel %vm922_vm3, %v5950_v43, %v2402_v33  ;;  %4304 = vmatprep.mubr.msk.f32.mxu1 %vm6528_vm10, %v2449_v40  ;;  %v4594_v43 = vpack.c.bf16 %v3613_v44, %v3612_v16  ;;  %vm6536_vm10 = vmmov %vm6535_vm12 }
 0x8b9   :  { %v2450_v20 = vmax.f32 %v6206_v23, 0.0 }
 0x8ba   :  { %4595 = vmatprep.subr.bf16.mxu0 %v4594_v43 }
 0x8bb   :  { %4305 = vmatmul.mubr.msk.f32.gmra.mrb[66].mxu1 %vm6529_vm11, %v2450_v20  ;;  %4597 = vmatpush3.bf16.msra.mxu0 %v4594_v43  ;;  %vm6537_vm11 = vmmov %vm6522_vm0 }
 0x8bc   :  { %4599 = vmatprep.subr.bf16.mxu0 %v4598_v42 }
 0x8bf   :  { %4601 = vmatpush3.bf16.msra.mxu0 %v4598_v42 }
 0x8c0   :  { %4603 = vmatprep.subr.bf16.mxu0 %v4602_v51 }
 0x8c3   :  { %4605 = vmatpush3.bf16.msra.mxu0 %v4602_v51 }
 0x8c4   :  { %4607 = vmatprep.subr.bf16.mxu0 %v4606_v21 }
 0x8c7   :  { %4609 = vmatpush3.bf16.msra.mxu0 %v4606_v21 }
 0x8c8   :  { %4611 = vmatprep.subr.bf16.mxu0 %v4610_v56 }
 0x8cb   :  { %4613 = vmatpush3.bf16.msra.mxu0 %v4610_v56 }
 0x8cc   :  { %4615 = vmatprep.subr.bf16.mxu0 %v4614_v0 }
 0x8cf   :  { %4617 = vmatpush3.bf16.msra.mxu0 %v4614_v0 }
 0x972   :  { %v4285_v31 = vpop.f32.mrb[52].mxu1 }
 0x973   :  { %v2588_v50 = vadd.f32 %v4285_v31, %v6250_v59  ;;  %v2582_v55 = vpop.f32.mrb[53].mxu1 }
 0x974   :  { %v2583_v15 = vadd.f32 %v6250_v59, %v2582_v55 }
 0x975   :  { %v2662_v45 = vmax.f32 %v2588_v50, 0.0 }
 0x976   :  { %v2661_v49 = vmax.f32 %v2583_v15, 0.0  ;;  %v4288_v8 = vpop.f32.mrb[54].mxu1 }
 0x977   :  { %v2598_v5 = vadd.f32 %v4288_v8, %v6250_v59  ;;  %v2592_v62 = vpop.f32.mrb[55].mxu1  ;;  %2695 = vrot.lane.b32.xlu1 %v2662_v45, %s4740_s12  ;;  %v2971_v45 = vld [vmem:[%s6446_s9] sm:$0xff]  ;;  %v2973_v8 = vld [vmem:[%s6446_s9 + $0x10] sm:$0xff] }
 0x978   :  { %v2593_v10 = vadd.f32 %v6250_v59, %v2592_v62  ;;  %2693 = vrot.lane.b32.xlu0 %v2661_v49, %s4740_s12  ;;  %v2972_v49 = vld [vmem:[%s6446_s9 + $0x8] sm:$0xff] }
 0x979   :  { %v2664_v40 = vmax.f32 %v2598_v5, 0.0 }
 0x97a   :  { %v2663_v33 = vmax.f32 %v2593_v10, 0.0  ;;  %v4291_v20 = vpop.f32.mrb[56].mxu1  ;;  %v4618_v10 = vpack.c.bf16 %v2972_v49, %v2971_v45 }
 0x97b   :  { %v2608_v16 = vadd.f32 %v4291_v20, %v6250_v59  ;;  %v2602_v44 = vpop.f32.mrb[57].mxu1  ;;  %2699 = vrot.lane.b32.xlu1 %v2664_v40, %s4740_s12  ;;  %v2974_v40 = vld [vmem:[%s6446_s9 + $0x18] sm:$0xff] }
 0x97c   :  { %v2603_v52 = vadd.f32 %v6250_v59, %v2602_v44  ;;  %2697 = vrot.lane.b32.xlu0 %v2663_v33, %s4740_s12  ;;  %4619 = vmatprep.subr.bf16.mxu1 %v4618_v10 }
 0x97d   :  { %v2666_v43 = vmax.f32 %v2608_v16, 0.0  ;;  %v4622_v16 = vpack.c.bf16 %v2974_v40, %v2973_v8  ;;  %4621 = vmatpush3.bf16.msra.mxu1 %v4618_v10 }
 0x97e   :  { %v2665_v47 = vmax.f32 %v2603_v52, 0.0  ;;  %v4294_v42 = vpop.f32.mrb[58].mxu1 }
 0x97f   :  { %v2618_v14 = vadd.f32 %v4294_v42, %v6250_v59  ;;  %v2612_v61 = vpop.f32.mrb[59].mxu1  ;;  %2703 = vrot.lane.b32.xlu1 %v2666_v43, %s4740_s12  ;;  %4623 = vmatprep.subr.bf16.mxu1 %v4622_v16 }
 0x980   :  { %v2613_v51 = vadd.f32 %v6250_v59, %v2612_v61  ;;  %2701 = vrot.lane.b32.xlu0 %v2665_v47, %s4740_s12 }
 0x981   :  { %v2668_v19 = vmax.f32 %v2618_v14, 0.0  ;;  %4625 = vmatpush3.bf16.msra.mxu1 %v4622_v16 }
 0x982   :  { %v2667_v60 = vmax.f32 %v2613_v51, 0.0  ;;  %v4297_v21 = vpop.f32.mrb[60].mxu1 }
 0x983   :  { %v2628_v57 = vadd.f32 %v4297_v21, %v6250_v59  ;;  %v2622_v54 = vpop.f32.mrb[61].mxu1  ;;  %2707 = vrot.lane.b32.xlu1 %v2668_v19, %s4740_s12 }
 0x984   :  { %v2623_v56 = vadd.f32 %v6250_v59, %v2622_v54  ;;  %2705 = vrot.lane.b32.xlu0 %v2667_v60, %s4740_s12 }
 0x985   :  { %v2670_v53 = vmax.f32 %v2628_v57, 0.0 }
 0x986   :  { %v2669_v63 = vmax.f32 %v2623_v56, 0.0  ;;  %v4300_v0 = vpop.f32.mrb[62].mxu1 }
 0x987   :  { %v2638_v31 = vadd.f32 %v4300_v0, %v6250_v59  ;;  %v2632_v50 = vpop.f32.mrb[63].mxu1  ;;  %2711 = vrot.lane.b32.xlu1 %v2670_v53, %s4740_s12 }
 0x988   :  { %v2633_v55 = vadd.f32 %v6250_v59, %v2632_v50  ;;  %2709 = vrot.lane.b32.xlu0 %v2669_v63, %s4740_s12 }
 0x989   :  { %v2672_v15 = vmax.f32 %v2638_v31, 0.0 }
 0x98a   :  { %v2671_v5 = vmax.f32 %v2633_v55, 0.0  ;;  %v4303_v62 = vpop.f32.mrb[64].mxu1 }
 0x98b   :  { %v2648_v33 = vadd.f32 %v4303_v62, %v6250_v59  ;;  %v2642_v20 = vpop.f32.mrb[65].mxu1  ;;  %2715 = vrot.lane.b32.xlu1 %v2672_v15, %s4740_s12 }
 0x98c   :  { %v2643_v44 = vadd.f32 %v6250_v59, %v2642_v20  ;;  %2713 = vrot.lane.b32.xlu0 %v2671_v5, %s4740_s12 }
 0x98d   :  { %v2674_v52 = vmax.f32 %v2648_v33, 0.0 }
 0x98e   :  { %v2673_v43 = vmax.f32 %v2643_v44, 0.0  ;;  %v4306_v47 = vpop.f32.mrb[66].mxu1 }
 0x98f   :  { %v2658_v42 = vadd.f32 %v4306_v47, %v6250_v59  ;;  %2719 = vrot.lane.b32.xlu1 %v2674_v52, %s4740_s12  ;;  %v2652_v14 = vpop.f32.mrb[67].mxu1 }
 0x990   :  { %v2653_v61 = vadd.f32 %v6250_v59, %v2652_v14  ;;  %2717 = vrot.lane.b32.xlu0 %v2673_v43, %s4740_s12 }
 0x991   :  { %v2676_v51 = vmax.f32 %v2658_v42, 0.0 }
 0x992   :  { %v2675_v19 = vmax.f32 %v2653_v61, 0.0 }
 0x993   :  { %2723 = vrot.lane.b32.xlu1 %v2676_v51, %s4740_s12 }
 0x994   :  { %2721 = vrot.lane.b32.xlu0 %v2675_v19, %s4740_s12 }
 0x9e9   :  { %v2696_v60 = vpop.permute.xlu1 %2695 }
 0x9ea   :  { %v2694_v21 = vpop.permute.xlu0 %2693  ;;  %v2742_v54 = vsel %vm6522_vm0, %v6123_v41, %v2696_v60 }
 0x9eb   :  { %v2741_v57 = vsel %vm6530_vm14, %v6117_v58, %v2694_v21  ;;  %vm6538_vm14 = vmmov %vm6522_vm0 }
 0x9ec   :  { %4331 = vmatprep.mubr.msk.f32.mxu0 %vm6531_vm15, %v2741_v57  ;;  %vm6539_vm0 = vmmov %vm6536_vm10 }
 0x9ed   :  { %v2700_v59 = vpop.permute.xlu1 %2699  ;;  %4332 = vmatmul.mubr.msk.f32.vlgmr.msra.gmra.mrb[60].mxu0 %vm6532_vm13, %v2742_v54  ;;  %vm6540_vm15 = vmmov %vm6539_vm0 }
 0x9ee   :  { %v2698_v56 = vpop.permute.xlu0 %2697  ;;  %v2744_v63 = vsel %vm6534_vm2, %v6134_v3, %v2700_v59  ;;  %vm6541_vm13 = vmmov %vm6533_vm1 }
 0x9ef   :  { %v2743_v53 = vsel %vm6533_vm1, %v6127_v4, %v2698_v56  ;;  %vm6542_vm2 = vmmov %vm6539_vm0 }
 0x9f0   :  { %4334 = vmatprep.mubr.msk.f32.mxu0 %vm6535_vm12, %v2743_v53  ;;  %vm6543_vm12 = vmmov %vm6539_vm0 }
 0x9f1   :  { %v2704_v0 = vpop.permute.xlu1 %2703  ;;  %4335 = vmatmul.mubr.msk.f32.gmra.mrb[62].mxu0 %vm6536_vm10, %v2744_v63  ;;  %vm6544_vm10 = vmmov %vm6533_vm1 }
 0x9f2   :  { %v2702_v58 = vpop.permute.xlu0 %2701  ;;  %v2746_v31 = vsel %vm6538_vm14, %v6146_v48, %v2704_v0  ;;  %vm6546_vm14 = vmmov %vm6539_vm0 }
 0x9f3   :  { %v2745_v41 = vsel %vm6537_vm11, %v6139_v1, %v2702_v58  ;;  %vm6545_vm11 = vmmov %vm6533_vm1 }
 0x9f4   :  { %4337 = vmatprep.mubr.msk.f32.mxu0 %vm6539_vm0, %v2745_v41 }
 0x9f5   :  { %v2708_v50 = vpop.permute.xlu1 %2707  ;;  %4338 = vmatmul.mubr.msk.f32.gmra.mrb[64].mxu0 %vm6540_vm15, %v2746_v31  ;;  %vm6547_vm15 = vmmov %vm6533_vm1 }
 0x9f6   :  { %v2706_v4 = vpop.permute.xlu0 %2705  ;;  %v2748_v55 = vsel %vm6533_vm1, %v6158_v13, %v2708_v50 }
 0x9f7   :  { %v2747_v3 = vsel %vm6541_vm13, %v6151_v2, %v2706_v4  ;;  %vm6548_vm13 = vmmov %vm6533_vm1 }
 0x9f8   :  { %4340 = vmatprep.mubr.msk.f32.mxu0 %vm6542_vm2, %v2747_v3  ;;  %vm6549_vm1 = vmmov %vm6539_vm0 }
 0x9f9   :  { %v2712_v15 = vpop.permute.xlu1 %2711  ;;  %4341 = vmatmul.mubr.msk.f32.gmra.mrb[66].mxu0 %vm6543_vm12, %v2748_v55  ;;  %vm6550_vm2 = vmmov %vm6539_vm0 }
 0x9fa   :  { %v2710_v1 = vpop.permute.xlu0 %2709  ;;  %v2750_v45 = vsel %vm6545_vm11, %v6170_v17, %v2712_v15  ;;  %vm6551_vm12 = vmmov %vm6544_vm10 }
 0x9fb   :  { %v2749_v48 = vsel %vm6544_vm10, %v6163_v46, %v2710_v1  ;;  %vm6552_vm11 = vmmov %vm6539_vm0 }
 0x9fc   :  { %4343 = vmatprep.mubr.msk.f32.mxu0 %vm6546_vm14, %v2749_v48  ;;  %vm6553_vm14 = vmmov %vm6539_vm0  ;;  %v4745_v48 = vmov 0.0|0.0  }
 0x9fd   :  { %v2716_v49 = vpop.permute.xlu1 %2715  ;;  %4344 = vmatmul.mubr.msk.f32.gmra.mrb[68].mxu0 %vm6539_vm0, %v2750_v45  ;;  %vm6554_vm0 = vmmov %vm6544_vm10  ;;  %4626 = vmatprep.subr.bf16.mxu0 %v4745_v48  ;;  %v4747_v45 = vmov 0.0  }
 0x9fe   :  { %v2714_v2 = vpop.permute.xlu0 %2713  ;;  %v2752_v8 = vsel %vm6548_vm13, %v6182_v12, %v2716_v49  ;;  %vm6556_vm13 = vmmov %vm6549_vm1  ;;  %v4748_v49 = vmov 1.0|1.0  }
 0x9ff   :  { %v2751_v13 = vsel %vm6547_vm15, %v6175_v18, %v2714_v2  ;;  %vm6555_vm15 = vmmov %vm6554_vm0 }
 0xa00   :  { %4346 = vmatprep.mubr.msk.f32.mxu0 %vm6549_vm1, %v2751_v13 }
 0xa01   :  { %v2720_v5 = vpop.permute.xlu1 %2719  ;;  %4347 = vmatmul.mubr.msk.f32.gmra.mrb[70].mxu0 %vm6550_vm2, %v2752_v8  ;;  %vm4627_vm2 = vmpackc.low %vm119_vm5, %vm118_vm4  ;;  %vm6558_vm5 = vcmp.eq.s32.totalorder %v5143_v22, %v5173_v27 }
 0xa02   :  { %v2718_v46 = vpop.permute.xlu0 %2717  ;;  %v2754_v62 = vsel %vm6544_vm10, %v6194_v7, %v2720_v5  ;;  %4628 = vmatpush3.bf16.msk.msra.mxu0 %vm4627_vm2, %v4748_v49  ;;  %vm4633_vm4 = vmpackc.low %vm123_vm8, %vm122_vm9  ;;  %vm6559_vm10 = vcmp.eq.s32.totalorder %v5143_v22, %v5167_v26  ;;  %vm6562_vm8 = vcmp.eq.s32.totalorder %v5143_v22, %v5189_v32  ;;  %vm6563_vm9 = vcmp.eq.s32.totalorder %v5143_v22, %v5183_v30 }
 0xa03   :  { %v2753_v17 = vsel %vm6551_vm12, %v6187_v39, %v2718_v46  ;;  %v3625_v39 = vld [vmem:[%s6445_s8 + $0x2] ss:$0 sm:$0xff]  ;;  %vm4746_vm12 = vmmov 0   ;;  %4629 = vmatprep.subr.bf16.mxu0 %v4745_v48  ;;  %vm6566_vm2 = vcmp.eq.s32.totalorder %v5143_v22, %v5201_v37 }
 0xa04   :  { %4349 = vmatprep.mubr.msk.f32.mxu0 %vm6552_vm11, %v2753_v17  ;;  %vm4636_vm11 = vmpackc.low %vm6559_vm10, %vm6558_vm5 }
 0xa05   :  { %v2724_v10 = vpop.permute.xlu1 %2723  ;;  %4350 = vmatmul.mubr.msk.f32.gmra.mrb[72].mxu0 %vm6553_vm14, %v2754_v62 }
 0xa06   :  { %v2722_v18 = vpop.permute.xlu0 %2721  ;;  %v2756_v40 = vsel %vm6555_vm15, %v6206_v23, %v2724_v10  ;;  %vm6564_vm15 = vcmp.eq.s32.totalorder %v5143_v22, %v5197_v36 }
 0xa07   :  { %v2755_v12 = vsel %vm6554_vm0, %v6199_v34, %v2722_v18  ;;  %vm4642_vm0 = vmpackc.low %vm6563_vm9, %vm6562_vm8 }
 0xa08   :  { %4352 = vmatprep.mubr.msk.f32.mxu0 %vm6556_vm13, %v2755_v12  ;;  %vm6565_vm13 = vcmp.eq.s32.totalorder %v5143_v22, %v5191_v35 }
 0xa09   :  { %4353 = vmatmul.mubr.msk.f32.gmra.mrb[74].mxu0 %vm6549_vm1, %v2756_v40  ;;  %vm4645_vm1 = vmpackc.low %vm6565_vm13, %vm6564_vm15 }
 0xa0a   :  { %4419 = vmatprep.mubr.msk.f32.mxu0 %vm4746_vm12, %v4747_v45 }
 0xac0   :  { %v4333_v7 = vpop.f32.mrb[60].mxu0 }
 0xac1   :  { %v2892_v33 = vpop.f32.mrb[61].mxu0  ;;  %v2898_v16 = vadd.f32 %v4333_v7, %v3625_v39 }
 0xac2   :  { %v2893_v20 = vadd.f32 %v3625_v39, %v2892_v33 }
 0xac4   :  { %v4336_v44 = vpop.f32.mrb[62].mxu0  ;;  %4363 = vmatprep.mubr.msk.f32.mxu1 %vm922_vm3, %v2893_v20 }
 0xac5   :  { %v2902_v52 = vpop.f32.mrb[63].mxu0  ;;  %4364 = vmatmul.mubr.msk.f32.vlgmr.msra.gmra.mrb[68].mxu1 %vm922_vm3, %v2898_v16  ;;  %v2908_v23 = vadd.f32 %v4336_v44, %v3625_v39 }
 0xac6   :  { %v2903_v34 = vadd.f32 %v3625_v39, %v2902_v52 }
 0xac8   :  { %v4339_v43 = vpop.f32.mrb[64].mxu0  ;;  %4366 = vmatprep.mubr.msk.f32.mxu1 %vm922_vm3, %v2903_v34 }
 0xac9   :  { %v2912_v47 = vpop.f32.mrb[65].mxu0  ;;  %4367 = vmatmul.mubr.msk.f32.gmra.mrb[70].mxu1 %vm922_vm3, %v2908_v23  ;;  %v2918_v14 = vadd.f32 %v4339_v43, %v3625_v39 }
 0xaca   :  { %v2913_v42 = vadd.f32 %v3625_v39, %v2912_v47 }
 0xacc   :  { %v4342_v61 = vpop.f32.mrb[66].mxu0  ;;  %4369 = vmatprep.mubr.msk.f32.mxu1 %vm922_vm3, %v2913_v42 }
 0xacd   :  { %v2922_v51 = vpop.f32.mrb[67].mxu0  ;;  %4370 = vmatmul.mubr.msk.f32.gmra.mrb[72].mxu1 %vm922_vm3, %v2918_v14  ;;  %v2928_v60 = vadd.f32 %v4342_v61, %v3625_v39 }
 0xace   :  { %v2923_v19 = vadd.f32 %v3625_v39, %v2922_v51 }
 0xad0   :  { %v4345_v21 = vpop.f32.mrb[68].mxu0  ;;  %4372 = vmatprep.mubr.msk.f32.mxu1 %vm922_vm3, %v2923_v19 }
 0xad1   :  { %v2932_v57 = vpop.f32.mrb[69].mxu0  ;;  %4373 = vmatmul.mubr.msk.f32.gmra.mrb[74].mxu1 %vm922_vm3, %v2928_v60  ;;  %v2938_v59 = vadd.f32 %v4345_v21, %v3625_v39  ;;  %v6568_v21 = vlaneseq }
 0xad2   :  { %v2933_v54 = vadd.f32 %v3625_v39, %v2932_v57 }
 0xad3   :  { %v3299_v57 = vshrl.u32 %v6568_v21, 7 }
 0xad4   :  { %v4348_v56 = vpop.f32.mrb[70].mxu0  ;;  %4375 = vmatprep.mubr.msk.f32.mxu1 %vm922_vm3, %v2933_v54 }
 0xad5   :  { %v2942_v53 = vpop.f32.mrb[71].mxu0  ;;  %4376 = vmatmul.mubr.msk.f32.gmra.mrb[76].mxu1 %vm922_vm3, %v2938_v59  ;;  %v2948_v0 = vadd.f32 %v4348_v56, %v3625_v39  ;;  %v3300_v56 = vsub.s32 0, %v3299_v57 }
 0xad6   :  { %v2943_v63 = vadd.f32 %v3625_v39, %v2942_v53 }
 0xad8   :  { %v4351_v58 = vpop.f32.mrb[72].mxu0  ;;  %4378 = vmatprep.mubr.msk.f32.mxu1 %vm922_vm3, %v2943_v63 }
 0xad9   :  { %v2952_v41 = vpop.f32.mrb[73].mxu0  ;;  %4379 = vmatmul.mubr.msk.f32.gmra.mrb[78].mxu1 %vm922_vm3, %v2948_v0  ;;  %v2958_v50 = vadd.f32 %v4351_v58, %v3625_v39 }
 0xada   :  { %v2953_v31 = vadd.f32 %v3625_v39, %v2952_v41 }
 0xadc   :  { %v4354_v4 = vpop.f32.mrb[74].mxu0  ;;  %4381 = vmatprep.mubr.msk.f32.mxu1 %vm922_vm3, %v2953_v31 }
 0xadd   :  { %v2962_v3 = vpop.f32.mrb[75].mxu0  ;;  %4382 = vmatmul.mubr.msk.f32.gmra.mrb[80].mxu1 %vm922_vm3, %v2958_v50  ;;  %v2968_v15 = vadd.f32 %v4354_v4, %v3625_v39 }
 0xade   :  { %v2963_v55 = vadd.f32 %v3625_v39, %v2962_v3 }
 0xae0   :  { %4384 = vmatprep.mubr.msk.f32.mxu1 %vm922_vm3, %v2963_v55 }
 0xae1   :  { %4385 = vmatmul.mubr.msk.f32.gmra.mrb[82].mxu1 %vm922_vm3, %v2968_v15  ;;  %vm4630_vm3 = vmpackc.low %vm121_vm6, %vm120_vm7  ;;  %vm6560_vm6 = vcmp.eq.s32.totalorder %v5143_v22, %v5181_v29  ;;  %vm6561_vm7 = vcmp.eq.s32.totalorder %v5143_v22, %v5175_v28 }
 0xae2   :  { %4631 = vmatpush3.bf16.msk.msra.mxu0 %vm4630_vm3, %v4748_v49  ;;  %vm4639_vm14 = vmpackc.low %vm6561_vm7, %vm6560_vm6  ;;  %vm6567_vm3 = vcmp.eq.s32.totalorder %v5143_v22, %v5203_v38 }
 0xae3   :  { %4632 = vmatprep.subr.bf16.mxu0 %v4745_v48 }
 0xae6   :  { %4634 = vmatpush3.bf16.msk.msra.mxu0 %vm4633_vm4, %v4748_v49  ;;  %vm4648_vm4 = vmpackc.low %vm6567_vm3, %vm6566_vm2 }
 0xae7   :  { %4635 = vmatprep.subr.bf16.mxu0 %v4745_v48 }
 0xaea   :  { %4637 = vmatpush3.bf16.msk.msra.mxu0 %vm4636_vm11, %v4748_v49 }
 0xaeb   :  { %4638 = vmatprep.subr.bf16.mxu0 %v4745_v48 }
 0xaee   :  { %4640 = vmatpush3.bf16.msk.msra.mxu0 %vm4639_vm14, %v4748_v49 }
 0xaef   :  { %4641 = vmatprep.subr.bf16.mxu0 %v4745_v48 }
 0xaf2   :  { %4643 = vmatpush3.bf16.msk.msra.mxu0 %vm4642_vm0, %v4748_v49 }
 0xaf3   :  { %4644 = vmatprep.subr.bf16.mxu0 %v4745_v48 }
 0xaf6   :  { %4646 = vmatpush3.bf16.msk.msra.mxu0 %vm4645_vm1, %v4748_v49 }
 0xaf7   :  { %4647 = vmatprep.subr.bf16.mxu0 %v4745_v48 }
 0xafa   :  { %4649 = vmatpush3.bf16.msk.msra.mxu0 %vm4648_vm4, %v4748_v49 }
 0xb98   :  { %v4365_v9 = vpop.f32.mrb[68].mxu1 }
 0xb99   :  { %v3096_v11 = vpop.f32.mrb[69].mxu1  ;;  %v3102_v27 = vadd.f32 %v4365_v9, %v3642_v6 }
 0xb9a   :  { %v3097_v24 = vadd.f32 %v3642_v6, %v3096_v11 }
 0xb9c   :  { %3175 = vxpose.xlu0.b32.start [1/16] (narrow) %v3097_v24, 40  ;;  %v4368_v25 = vpop.f32.mrb[70].mxu1 }
 0xb9d   :  { %v3106_v26 = vpop.f32.mrb[71].mxu1  ;;  %v3112_v35 = vadd.f32 %v4368_v25, %v3642_v6 }
 0xb9e   :  { %v3107_v30 = vadd.f32 %v3642_v6, %v3106_v26 }
 0xba0   :  { %3176 = vxpose.xlu0.b32.cont [2/16] (narrow) %v3102_v27, 40  ;;  %v4371_v28 = vpop.f32.mrb[72].mxu1 }
 0xba1   :  { %v3116_v29 = vpop.f32.mrb[73].mxu1  ;;  %v3122_v8 = vadd.f32 %v4371_v28, %v3642_v6 }
 0xba2   :  { %v3117_v38 = vadd.f32 %v3642_v6, %v3116_v29 }
 0xba4   :  { %3177 = vxpose.xlu0.b32.cont [3/16] (narrow) %v3107_v30, 40  ;;  %v4374_v32 = vpop.f32.mrb[74].mxu1 }
 0xba5   :  { %v3126_v22 = vpop.f32.mrb[75].mxu1  ;;  %v3132_v18 = vadd.f32 %v4374_v32, %v3642_v6 }
 0xba6   :  { %v3127_v17 = vadd.f32 %v3642_v6, %v3126_v22 }
 0xba8   :  { %3178 = vxpose.xlu0.b32.cont [4/16] (narrow) %v3112_v35, 40  ;;  %v4377_v36 = vpop.f32.mrb[76].mxu1 }
 0xba9   :  { %v3136_v37 = vpop.f32.mrb[77].mxu1  ;;  %v3142_v40 = vadd.f32 %v4377_v36, %v3642_v6 }
 0xbaa   :  { %v3137_v12 = vadd.f32 %v3642_v6, %v3136_v37 }
 0xbac   :  { %3179 = vxpose.xlu0.b32.cont [5/16] (narrow) %v3117_v38, 40  ;;  %v4380_v2 = vpop.f32.mrb[78].mxu1 }
 0xbad   :  { %v3146_v13 = vpop.f32.mrb[79].mxu1  ;;  %v3152_v7 = vadd.f32 %v4380_v2, %v3642_v6 }
 0xbae   :  { %v3147_v39 = vadd.f32 %v3642_v6, %v3146_v13 }
 0xbb0   :  { %3180 = vxpose.xlu0.b32.cont [6/16] (narrow) %v3122_v8, 40  ;;  %v4383_v5 = vpop.f32.mrb[80].mxu1 }
 0xbb1   :  { %v3156_v46 = vpop.f32.mrb[81].mxu1  ;;  %v3162_v20 = vadd.f32 %v4383_v5, %v3642_v6 }
 0xbb2   :  { %v3157_v33 = vadd.f32 %v3642_v6, %v3156_v46 }
 0xbb4   :  { %3181 = vxpose.xlu0.b32.cont [7/16] (narrow) %v3127_v17, 40  ;;  %v4386_v62 = vpop.f32.mrb[82].mxu1 }
 0xbb5   :  { %v3166_v10 = vpop.f32.mrb[83].mxu1  ;;  %v3172_v44 = vadd.f32 %v4386_v62, %v3642_v6 }
 0xbb6   :  { %v3167_v16 = vadd.f32 %v3642_v6, %v3166_v10 }
 0xbb8   :  { %3182 = vxpose.xlu0.b32.cont [8/16] (narrow) %v3132_v18, 40 }
 0xbbc   :  { %3183 = vxpose.xlu0.b32.cont [9/16] (narrow) %v3137_v12, 40 }
 0xbc0   :  { %3184 = vxpose.xlu0.b32.cont [10/16] (narrow) %v3142_v40, 40 }
 0xbc4   :  { %3185 = vxpose.xlu0.b32.cont [11/16] (narrow) %v3147_v39, 40 }
 0xbc8   :  { %3186 = vxpose.xlu0.b32.cont [12/16] (narrow) %v3152_v7, 40 }
 0xbcc   :  { %3187 = vxpose.xlu0.b32.cont [13/16] (narrow) %v3157_v33, 40 }
 0xbd0   :  { %3188 = vxpose.xlu0.b32.cont [14/16] (narrow) %v3162_v20, 40 }
 0xbd4   :  { %3189 = vxpose.xlu0.b32.cont [15/16] (narrow) %v3167_v16, 40 }
 0xbd8   :  { %3190 = vxpose.xlu0.b32.end [16/16] (narrow) %v3172_v44, 40 }
 0xc1c   :  { %v3191_v52 = vpop.trf.xlu0 }
 0xc1d   :  { %4420 = vmatmul.mubr.f32.vlgmr.msra.gmra.mrb[76].mxu0 %v3191_v52 }
 0xc1e   :  { %4422 = vmatprep.mubr.msk.f32.mxu0 %vm4746_vm12, %v4747_v45 }
 0xc20   :  { %v3192_v34 = vpop.trf.xlu0 }
 0xc21   :  { %4423 = vmatmul.mubr.f32.gmra.mrb[78].mxu0 %v3192_v34 }
 0xc22   :  { %4425 = vmatprep.mubr.msk.f32.mxu0 %vm4746_vm12, %v4747_v45 }
 0xc24   :  { %v3193_v23 = vpop.trf.xlu0 }
 0xc25   :  { %4426 = vmatmul.mubr.f32.gmra.mrb[80].mxu0 %v3193_v23 }
 0xc26   :  { %4428 = vmatprep.mubr.msk.f32.mxu0 %vm4746_vm12, %v4747_v45 }
 0xc28   :  { %v3194_v43 = vpop.trf.xlu0 }
 0xc29   :  { %4429 = vmatmul.mubr.f32.gmra.mrb[82].mxu0 %v3194_v43 }
 0xc2a   :  { %4431 = vmatprep.mubr.msk.f32.mxu0 %vm4746_vm12, %v4747_v45 }
 0xc2c   :  { %v3195_v47 = vpop.trf.xlu0 }
 0xc2d   :  { %4432 = vmatmul.mubr.f32.gmra.mrb[84].mxu0 %v3195_v47 }
 0xcf0   :  { %v3273_v42 = vpop.f32.mrb[76].mxu0 }
 0xcf1   :  { %v4421_v14 = vpop.f32.mrb[77].mxu0 }
 0xcf4   :  { %v3278_v61 = vpop.f32.mrb[78].mxu0 }
 0xcf5   :  { %v4424_v51 = vpop.f32.mrb[79].mxu0 }
 0xcf8   :  { %v3283_v19 = vpop.f32.mrb[80].mxu0 }
 0xcf9   :  { %v4427_v60 = vpop.f32.mrb[81].mxu0 }
 0xcfc   :  { %v3288_v54 = vpop.f32.mrb[82].mxu0 }
 0xcfd   :  { %v4430_v59 = vpop.f32.mrb[83].mxu0 }
 0xd00   :  { %v3293_v53 = vpop.f32.mrb[84].mxu0 }
 0xd01   :  { %v3297_v63 = vmax.f32 %v3293_v53, 1.0  ;;  %v4433_v0 = vpop.f32.mrb[85].mxu0 }
 0xd03   :  { %v3301_v58 = vrot.slane %v3297_v63, %v3300_v56 }
 0xd05   :  { %4683 = vrcp.f32 %v3301_v58 }
 0xd0f   :  { %v4684_v41 = vpop.eup %4683 }
 0xd10   :  { %v3303_v31 = vmul.f32 %v4684_v41, %v3273_v42  ;;  %v3304_v50 = vmul.f32 %v4684_v41, %v3278_v61  ;;  %v3305_v4 = vmul.f32 %v4684_v41, %v3283_v19  ;;  %v3306_v3 = vmul.f32 %v4684_v41, %v3288_v54 }
 0xd12   :  { %3307 = vst [vmem:[#allocation10] sm:$0xff] %v3303_v31  ;;  %3308 = vst [vmem:[#allocation10 + $0x8] sm:$0xff] %v3304_v50 }
 0xd13   :  { %3309 = vst [vmem:[#allocation10 + $0x10] sm:$0xff] %v3305_v4  ;;  %3310 = vst [vmem:[#allocation10 + $0x18] sm:$0xff] %v3306_v3 }
 0xd14   :  { %4708 = shalt.err (!%p4705_p11)
}
 0xd15   :  { %s4709_s14 = scalar_lea.hbm %s6448_s11, 512 }
 0xd16   :  { %p4710_p12 = scmp.ne.s32.totalorder %s6448_s11, %s4709_s14  ;;  %p4713_p13 = scmp.lt.u32.totalorder %s4709_s14, %s6448_s11 }
 0xd18   :  { %p4715_p0 = pnand %p4713_p13, %p4710_p12 }
 0xd1a   :  { %4718 = shalt.err (!%p4715_p0)
}
 0xd1b   :  { %s4750_s19 = smov 128   ;;  %s4751_s20 = smov 8  }
 0xd1c   :  { %3322 = dma.vmem_to_hbm [thread:$0]  %s3317_s2, 512, %s6448_s11, [#allocation8], %s4750_s19, %s4750_s19, %s4751_s20  }
 0xd1d   :  { %4729 = dma.done.wait [#allocation8], 512  }
 0xd1e   :  { %4730 = vsyncadd [#allocation8], 4294966784 }
 0xd1f   :  { %3326 = vsyncpa [#allocation8], 1 }
 0xd20   :  { %3327 = vsyncpa [#allocation9], 1 }

</bundles_post_ra>
